<compile_context>
chip_gen: v6e
topology: v6e:2x2x1
jax: 0.10.0
libtpu: 0.0.40
codegen_flags: <defaults>
</compile_context>

<pallas_src>
import functools

import jax
import jax.numpy as jnp
import numpy as np
from jax.experimental import pallas as pl
from jax.experimental.pallas import tpu as pltpu  # noqa: F401  (kept for TPU-specific extensions)


# ----------------------------------------------------------------------------
# Fused decoder kernel: all levels in one invocation.
# ----------------------------------------------------------------------------
def fused_decoder_kernel(
    xemb_ref,                     # (L*B, Demb)  bf16   level-major flattened embeddings
    enc_ref,                      # (B, P, E)    f32    encoder output
    initw_ref, initb_ref,         # init_h Linear       (E, A) bf16 / (1, A) f32
    wenc_ref, benc_ref,           # attention w_enc     (E, A) bf16 / (1, A) f32
    wdec_ref, bdec_ref,           # attention w_dec     (A, A) bf16 / (1, A) f32
    wfa_row_ref, bfa_ref,         # full_att            (1, A) f32  / (1, 1) f32
    wihc_ref, wihe_ref, whh_ref,  # GRU weights         bf16
    bih_ref, bhh_ref,             # GRU biases          f32
    wfc1_ref, bfc1_ref,           # fc1                 (A, A) bf16 / (1, A) f32
    wfc3_ref, bfc3_ref,           # fc3 heads           (L, A, V_pad) bf16 / (L, 1, V_pad) f32
    pred_ref,                     # (L, B, V_pad) f32   output slab
):
    f32 = jnp.float32
    bf16 = jnp.bfloat16
    B, P, E = enc_ref.shape
    L = wfc3_ref.shape[0]
    A = wdec_ref.shape[0]

    enc = enc_ref[...]                                             # (B, P, E) f32
    enc_bf = enc.astype(bf16)

    # ---- level-invariant precompute (off the serial recurrence) -------------
    # init hidden: mean over pixels -> Linear
    mean_enc = jnp.mean(enc, axis=1)                               # (B, E)
    h = (jnp.dot(mean_enc.astype(bf16), initw_ref[...],
                 preferred_element_type=f32) + initb_ref[...])     # (B, A)

    # Bahdanau encoder projection, one clean (B*P, E) @ (E, A) matmul
    enc_proj = (jnp.dot(enc_bf.reshape(B * P, E), wenc_ref[...],
                        preferred_element_type=f32).reshape(B, P, A)
                + benc_ref[...][None, :, :])                       # (B, P, A)

    # Level-independent GRU input half for ALL levels at once (M = L*B)
    gi_e_all = (jnp.dot(xemb_ref[...], wihe_ref[...],
                        preferred_element_type=f32) + bih_ref[...])  # (L*B, 3A)

    wfa_row = wfa_row_ref[...]                                     # (1, A) f32
    bfa = bfa_ref[...]                                             # (1, 1) f32

    # ---- serial level recurrence (attention + GRU only) ---------------------
    hs = []
    for lev in range(L):  # L is small & static; fully unrolled, indices concrete
        # Bahdanau attention
        dec_proj = (jnp.dot(h.astype(bf16), wdec_ref[...],
                            preferred_element_type=f32) + bdec_ref[...])   # (B, A)
        att_h = jnp.tanh(enc_proj + dec_proj[:, None, :])                  # (B, P, A)
        # full_att has out_features=1 -> VPU multiply + lane reduction
        scores = jnp.sum(att_h * wfa_row[None, :, :], axis=-1) + bfa       # (B, P)
        m = jnp.max(scores, axis=1, keepdims=True)
        e = jnp.exp(scores - m)
        alpha = e * pl.reciprocal(jnp.sum(e, axis=1, keepdims=True), approx=True)
        ctx = jnp.sum(enc * alpha[:, :, None], axis=1)                     # (B, E)

        # GRUCell: the x_emb half of the input projection is precomputed above.
        gi = (jnp.dot(ctx.astype(bf16), wihc_ref[...],
                      preferred_element_type=f32)
              + gi_e_all[lev * B:(lev + 1) * B, :])                        # (B, 3A)
        gh = (jnp.dot(h.astype(bf16), whh_ref[...],
                      preferred_element_type=f32) + bhh_ref[...])          # (B, 3A)
        r = jax.nn.sigmoid(gi[:, 0:A] + gh[:, 0:A])
        z = jax.nn.sigmoid(gi[:, A:2 * A] + gh[:, A:2 * A])
        n = jnp.tanh(gi[:, 2 * A:3 * A] + r * gh[:, 2 * A:3 * A])
        h = (1.0 - z) * n + z * h                                          # (B, A)
        hs.append(h)

    # ---- deferred output heads (fc1 -> ReLU -> Dropout(identity) -> fc3) ----
    h_all = jnp.concatenate(hs, axis=0)                                    # (L*B, A)
    f1 = (jnp.dot(h_all.astype(bf16), wfc1_ref[...],
                  preferred_element_type=f32) + bfc1_ref[...])
    f1 = jnp.maximum(f1, 0.0)                                              # (L*B, A)
    for lev in range(L):
        pred_ref[lev] = (
            jnp.dot(f1[lev * B:(lev + 1) * B, :].astype(bf16), wfc3_ref[lev],
                    preferred_element_type=f32) + bfc3_ref[lev]
        )


# ----------------------------------------------------------------------------
# Wrapper
# ----------------------------------------------------------------------------
def _pad_last(x, target):
    pad = target - x.shape[-1]
    if pad == 0:
        return x
    return jnp.pad(x, [(0, 0)] * (x.ndim - 1) + [(0, pad)])


@functools.partial(jax.jit, static_argnames=("vocab_sizes",))
def decoder_forward(params, context_vec, src, vocab_sizes):
    """Mirrors AttnRNNLevelWiseDecoder.forward: returns list of per-level preds."""
    B, P, E = context_vec.shape
    A = params["wdec"].shape[0]
    DEMB = params["emb_tables"][0].shape[1]
    L = len(vocab_sizes)
    V_pad = max(128, ((max(vocab_sizes) + 127) // 128) * 128)
    bf = lambda x: x.astype(jnp.bfloat16)

    # Embedding lookup for all levels at once (tiny gather; plain-JAX glue).
    emb_stack = jnp.stack(params["emb_tables"])                       # (L, emb_size, Demb)
    x_emb_all = jax.vmap(lambda tbl, ids: tbl[ids])(emb_stack, src.T)  # (L, B, Demb)
    x_emb_flat = bf(x_emb_all.reshape(L * B, DEMB))                   # level-major rows

    # Stack + zero-pad level-wise fc3 heads into one lane-dense slab.
    fc3_w = bf(jnp.stack([_pad_last(w, V_pad) for w in params["fc3_ws"]]))  # (L, A, V_pad)
    fc3_b = jnp.stack([_pad_last(b, V_pad) for b in params["fc3_bs"]])      # (L, 1, V_pad)

    # Single invocation: no grid, every operand is a whole-array VMEM block
    # (~0.6 MiB total resident -> fits every generation with huge margin).
    preds = pl.pallas_call(
        fused_decoder_kernel,
        out_shape=jax.ShapeDtypeStruct((L, B, V_pad), jnp.float32),
    )(
        x_emb_flat, context_vec,
        bf(params["init_h_w"]), params["init_h_b"],
        bf(params["wenc"]), params["benc"],
        bf(params["wdec"]), params["bdec"],
        params["wfa_row"], params["bfa"],
        bf(params["wih_c"]), bf(params["wih_e"]), bf(params["whh"]),
        params["bih"], params["bhh"],
        bf(params["fc1_w"]), params["fc1_b"],
        fc3_w, fc3_b,
    )
    # Slice back to the true per-level vocabulary sizes.
    return [preds[i, :, :v] for i, v in enumerate(vocab_sizes)]


# ----------------------------------------------------------------------------
# Pure-JAX reference (mirrors the kernel's bf16-operand / f32-accumulate dots)
# ----------------------------------------------------------------------------
def reference_forward(params, context_vec, src, vocab_sizes):
    f32, bf16 = jnp.float32, jnp.bfloat16
    dot = lambda a, b: jnp.dot(a.astype(bf16), b.astype(bf16),
                               preferred_element_type=f32)
    enc = context_vec.astype(f32)
    B, P, E = enc.shape
    hidden = dot(jnp.mean(enc, axis=1), params["init_h_w"]) + params["init_h_b"]
    A = hidden.shape[1]
    enc_proj = (dot(enc.reshape(B * P, E), params["wenc"]).reshape(B, P, A)
                + params["benc"][None])
    outs = []
    for lev in range(len(vocab_sizes)):
        dec_proj = dot(hidden, params["wdec"]) + params["bdec"]
        att_h = jnp.tanh(enc_proj + dec_proj[:, None, :])
        scores = jnp.sum(att_h * params["wfa_row"][None, :, :], axis=-1) + params["bfa"]
        alpha = jax.nn.softmax(scores, axis=1)
        ctx = jnp.sum(enc * alpha[:, :, None], axis=1)
        x_emb = jnp.take(params["emb_tables"][lev], src[:, lev], axis=0)
        gi = dot(ctx, params["wih_c"]) + dot(x_emb, params["wih_e"]) + params["bih"]
        gh = dot(hidden, params["whh"]) + params["bhh"]
        r = jax.nn.sigmoid(gi[:, :A] + gh[:, :A])
        z = jax.nn.sigmoid(gi[:, A:2 * A] + gh[:, A:2 * A])
        n = jnp.tanh(gi[:, 2 * A:] + r * gh[:, 2 * A:])
        hidden = (1.0 - z) * n + z * hidden
        f1 = jnp.maximum(dot(hidden, params["fc1_w"]) + params["fc1_b"], 0.0)
        outs.append(dot(f1, params["fc3_ws"][lev]) + params["fc3_bs"][lev])
    return outs


# ----------------------------------------------------------------------------
# Deterministic parameter construction
# ----------------------------------------------------------------------------
def make_params(key, *, emb_size, emb_dim, att_dim, enc_dim, vocab_sizes):
    ks = iter(jax.random.split(key, 64))
    s = 0.1
    nrm = lambda shape: (s * jax.random.normal(next(ks), shape)).astype(jnp.float32)
    return dict(
        # init_h: Linear(emb_dim -> att_dim); forward requires emb_dim == enc_dim
        init_h_w=nrm((emb_dim, att_dim)), init_h_b=nrm((1, att_dim)),
        # Bahdanau attention
        wenc=nrm((enc_dim, att_dim)), benc=nrm((1, att_dim)),
        wdec=nrm((att_dim, att_dim)), bdec=nrm((1, att_dim)),
        wfa_row=nrm((1, att_dim)), bfa=nrm((1, 1)),
        # GRUCell: input = concat([ctx(enc_dim), emb(emb_dim)]) -> 3*att_dim
        wih_c=nrm((enc_dim, 3 * att_dim)), wih_e=nrm((emb_dim, 3 * att_dim)),
        whh=nrm((att_dim, 3 * att_dim)),
        bih=nrm((1, 3 * att_dim)), bhh=nrm((1, 3 * att_dim)),
        # fc1
        fc1_w=nrm((att_dim, att_dim)), fc1_b=nrm((1, att_dim)),
        # level-wise embeddings & fc3 heads
        emb_tables=[nrm((emb_size, emb_dim)) for _ in vocab_sizes],
        fc3_ws=[nrm((att_dim, v)) for v in vocab_sizes],
        fc3_bs=[nrm((1, v)) for v in vocab_sizes],
    )


if __name__ == "__main__":
    # Small, forward-consistent shapes (in_features == decoder_embedding_dim,
    # as required by init_hidden_state).  A = 128 matches the module default
    # decoder_attention_dim and keeps all vector math lane-dense.
    B, P = 4, 16                    # batch, encoder "num_channels" (pixels)
    E = 128                         # in_features / encoder_dim
    DEMB = 128                      # decoder_embedding_dim (== E)
    A = 128                         # decoder_attention_dim
    EMB_SIZE = 16                   # embedding vocabulary size
    VOCAB_SIZES = (16, 24, 12, 20)  # per-level output vocab sizes
    L = len(VOCAB_SIZES)

    root = jax.random.PRNGKey(0)
    k_params, k_enc, k_src = jax.random.split(root, 3)

    params = make_params(
        k_params, emb_size=EMB_SIZE, emb_dim=DEMB, att_dim=A,
        enc_dim=E, vocab_sizes=VOCAB_SIZES,
    )
    context_vec = jax.random.normal(k_enc, (B, P, E), dtype=jnp.float32)
    src = jax.random.randint(k_src, (B, L), 0, EMB_SIZE, dtype=jnp.int32)

    outs = decoder_forward(params, context_vec, src, VOCAB_SIZES)
    outs = [jax.block_until_ready(o) for o in outs]

    refs = reference_forward(params, context_vec, src, VOCAB_SIZES)
    for o, r in zip(outs, refs):
        np.testing.assert_allclose(np.asarray(o), np.asarray(r), rtol=2e-2, atol=2e-2)

    print("KERNEL_OK")
</pallas_src>

<mosaic_0001>
module attributes {stable_mosaic.version = 11 : i64} {
  func.func @fused_decoder_kernel(%arg0: memref<16x128xbf16, #tpu.memory_space<vmem>>, %arg1: memref<4x16x128xf32, #tpu.memory_space<vmem>>, %arg2: memref<128x128xbf16, #tpu.memory_space<vmem>>, %arg3: memref<1x128xf32, #tpu.memory_space<vmem>>, %arg4: memref<128x128xbf16, #tpu.memory_space<vmem>>, %arg5: memref<1x128xf32, #tpu.memory_space<vmem>>, %arg6: memref<128x128xbf16, #tpu.memory_space<vmem>>, %arg7: memref<1x128xf32, #tpu.memory_space<vmem>>, %arg8: memref<1x128xf32, #tpu.memory_space<vmem>>, %arg9: memref<1x1xf32, #tpu.memory_space<vmem>>, %arg10: memref<128x384xbf16, #tpu.memory_space<vmem>>, %arg11: memref<128x384xbf16, #tpu.memory_space<vmem>>, %arg12: memref<128x384xbf16, #tpu.memory_space<vmem>>, %arg13: memref<1x384xf32, #tpu.memory_space<vmem>>, %arg14: memref<1x384xf32, #tpu.memory_space<vmem>>, %arg15: memref<128x128xbf16, #tpu.memory_space<vmem>>, %arg16: memref<1x128xf32, #tpu.memory_space<vmem>>, %arg17: memref<4x128x128xbf16, #tpu.memory_space<vmem>>, %arg18: memref<4x1x128xf32, #tpu.memory_space<vmem>>, %arg19: memref<4x4x128xf32, #tpu.memory_space<vmem>>) attributes {dimension_semantics = [], scalar_prefetch = 0 : i64, scratch_operands = 0 : i64, tpu.core_type = #tpu.core_type<tc>} {
    %c0 = arith.constant 0 : index
    %c0_0 = arith.constant 0 : index
    %c0_1 = arith.constant 0 : index
    %0 = vector.load %arg1[%c0, %c0_0, %c0_1] : memref<4x16x128xf32, #tpu.memory_space<vmem>>, vector<4x16x128xf32>
    %1 = arith.truncf %0 : vector<4x16x128xf32> to vector<4x16x128xbf16>
    %cst = arith.constant dense<0.000000e+00> : vector<4x128xf32>
    %2 = vector.multi_reduction <add>, %0, %cst [1] : vector<4x16x128xf32> to vector<4x128xf32>
    %cst_2 = arith.constant 1.600000e+01 : f32
    %3 = vector.broadcast %cst_2 : f32 to vector<4x128xf32>
    %4 = arith.divf %2, %3 : vector<4x128xf32>
    %5 = arith.truncf %4 : vector<4x128xf32> to vector<4x128xbf16>
    %c0_3 = arith.constant 0 : index
    %c0_4 = arith.constant 0 : index
    %6 = vector.load %arg2[%c0_3, %c0_4] : memref<128x128xbf16, #tpu.memory_space<vmem>>, vector<128x128xbf16>
    %cst_5 = arith.constant dense<0.000000e+00> : vector<4x128xf32>
    %7 = tpu.matmul %5, %6, %cst_5 {dimension_numbers = #tpu.dot_dimension_numbers<[1], [0], [0], [1], [0, 0, 1, 1], [], []>} : vector<4x128xbf16>, vector<128x128xbf16>, vector<4x128xf32> -> vector<4x128xf32>
    %c0_6 = arith.constant 0 : index
    %c0_7 = arith.constant 0 : index
    %8 = vector.load %arg3[%c0_6, %c0_7] : memref<1x128xf32, #tpu.memory_space<vmem>>, vector<1x128xf32>
    %9 = vector.broadcast %8 : vector<1x128xf32> to vector<4x128xf32>
    %10 = arith.addf %7, %9 : vector<4x128xf32>
    %11 = vector.shape_cast %1 : vector<4x16x128xbf16> to vector<64x128xbf16>
    %c0_8 = arith.constant 0 : index
    %c0_9 = arith.constant 0 : index
    %12 = vector.load %arg4[%c0_8, %c0_9] : memref<128x128xbf16, #tpu.memory_space<vmem>>, vector<128x128xbf16>
    %cst_10 = arith.constant dense<0.000000e+00> : vector<64x128xf32>
    %13 = tpu.matmul %11, %12, %cst_10 {dimension_numbers = #tpu.dot_dimension_numbers<[1], [0], [0], [1], [0, 0, 1, 1], [], []>} : vector<64x128xbf16>, vector<128x128xbf16>, vector<64x128xf32> -> vector<64x128xf32>
    %14 = vector.shape_cast %13 : vector<64x128xf32> to vector<4x16x128xf32>
    %c0_11 = arith.constant 0 : index
    %c0_12 = arith.constant 0 : index
    %15 = vector.load %arg5[%c0_11, %c0_12] : memref<1x128xf32, #tpu.memory_space<vmem>>, vector<1x128xf32>
    %16 = vector.shape_cast %15 : vector<1x128xf32> to vector<1x1x128xf32>
    %17 = vector.broadcast %16 : vector<1x1x128xf32> to vector<4x16x128xf32>
    %18 = arith.addf %14, %17 : vector<4x16x128xf32>
    %c0_13 = arith.constant 0 : index
    %c0_14 = arith.constant 0 : index
    %19 = vector.load %arg0[%c0_13, %c0_14] : memref<16x128xbf16, #tpu.memory_space<vmem>>, vector<16x128xbf16>
    %c0_15 = arith.constant 0 : index
    %c0_16 = arith.constant 0 : index
    %20 = vector.load %arg11[%c0_15, %c0_16] : memref<128x384xbf16, #tpu.memory_space<vmem>>, vector<128x384xbf16>
    %cst_17 = arith.constant dense<0.000000e+00> : vector<16x384xf32>
    %21 = tpu.matmul %19, %20, %cst_17 {dimension_numbers = #tpu.dot_dimension_numbers<[1], [0], [0], [1], [0, 0, 1, 1], [], []>} : vector<16x128xbf16>, vector<128x384xbf16>, vector<16x384xf32> -> vector<16x384xf32>
    %c0_18 = arith.constant 0 : index
    %c0_19 = arith.constant 0 : index
    %22 = vector.load %arg13[%c0_18, %c0_19] : memref<1x384xf32, #tpu.memory_space<vmem>>, vector<1x384xf32>
    %23 = vector.broadcast %22 : vector<1x384xf32> to vector<16x384xf32>
    %24 = arith.addf %21, %23 : vector<16x384xf32>
    %c0_20 = arith.constant 0 : index
    %c0_21 = arith.constant 0 : index
    %25 = vector.load %arg8[%c0_20, %c0_21] : memref<1x128xf32, #tpu.memory_space<vmem>>, vector<1x128xf32>
    %c0_22 = arith.constant 0 : index
    %c0_23 = arith.constant 0 : index
    %26 = vector.load %arg9[%c0_22, %c0_23] : memref<1x1xf32, #tpu.memory_space<vmem>>, vector<1x1xf32>
    %27 = arith.truncf %10 : vector<4x128xf32> to vector<4x128xbf16>
    %c0_24 = arith.constant 0 : index
    %c0_25 = arith.constant 0 : index
    %28 = vector.load %arg6[%c0_24, %c0_25] : memref<128x128xbf16, #tpu.memory_space<vmem>>, vector<128x128xbf16>
    %cst_26 = arith.constant dense<0.000000e+00> : vector<4x128xf32>
    %29 = tpu.matmul %27, %28, %cst_26 {dimension_numbers = #tpu.dot_dimension_numbers<[1], [0], [0], [1], [0, 0, 1, 1], [], []>} : vector<4x128xbf16>, vector<128x128xbf16>, vector<4x128xf32> -> vector<4x128xf32>
    %c0_27 = arith.constant 0 : index
    %c0_28 = arith.constant 0 : index
    %30 = vector.load %arg7[%c0_27, %c0_28] : memref<1x128xf32, #tpu.memory_space<vmem>>, vector<1x128xf32>
    %31 = vector.broadcast %30 : vector<1x128xf32> to vector<4x128xf32>
    %32 = arith.addf %29, %31 : vector<4x128xf32>
    %33 = vector.shape_cast %32 : vector<4x128xf32> to vector<4x1x128xf32>
    %34 = vector.broadcast %33 : vector<4x1x128xf32> to vector<4x16x128xf32>
    %35 = arith.addf %18, %34 : vector<4x16x128xf32>
    %36 = math.tanh %35 : vector<4x16x128xf32>
    %37 = vector.shape_cast %25 : vector<1x128xf32> to vector<1x1x128xf32>
    %38 = vector.broadcast %37 : vector<1x1x128xf32> to vector<4x16x128xf32>
    %39 = arith.mulf %36, %38 : vector<4x16x128xf32>
    %cst_29 = arith.constant dense<0.000000e+00> : vector<4x16xf32>
    %40 = vector.multi_reduction <add>, %39, %cst_29 [2] : vector<4x16x128xf32> to vector<4x16xf32>
    %41 = vector.broadcast %26 : vector<1x1xf32> to vector<4x16xf32>
    %42 = arith.addf %40, %41 : vector<4x16xf32>
    %cst_30 = arith.constant dense<0xFF800000> : vector<4xf32>
    %43 = vector.multi_reduction <maximumf>, %42, %cst_30 [1] : vector<4x16xf32> to vector<4xf32>
    %44 = vector.shape_cast %43 : vector<4xf32> to vector<4x1xf32>
    %45 = vector.broadcast %44 : vector<4x1xf32> to vector<4x16xf32>
    %46 = arith.subf %42, %45 : vector<4x16xf32>
    %47 = math.exp %46 : vector<4x16xf32>
    %cst_31 = arith.constant dense<0.000000e+00> : vector<4xf32>
    %48 = vector.multi_reduction <add>, %47, %cst_31 [1] : vector<4x16xf32> to vector<4xf32>
    %49 = vector.shape_cast %48 : vector<4xf32> to vector<4x1xf32>
    %50 = tpu.reciprocal %49 {approx = true} : vector<4x1xf32> -> vector<4x1xf32>
    %51 = vector.broadcast %50 : vector<4x1xf32> to vector<4x16xf32>
    %52 = arith.mulf %47, %51 : vector<4x16xf32>
    %53 = vector.shape_cast %52 : vector<4x16xf32> to vector<4x16x1xf32>
    %54 = vector.broadcast %53 : vector<4x16x1xf32> to vector<4x16x128xf32>
    %55 = arith.mulf %0, %54 : vector<4x16x128xf32>
    %cst_32 = arith.constant dense<0.000000e+00> : vector<4x128xf32>
    %56 = vector.multi_reduction <add>, %55, %cst_32 [1] : vector<4x16x128xf32> to vector<4x128xf32>
    %57 = arith.truncf %56 : vector<4x128xf32> to vector<4x128xbf16>
    %c0_33 = arith.constant 0 : index
    %c0_34 = arith.constant 0 : index
    %58 = vector.load %arg10[%c0_33, %c0_34] : memref<128x384xbf16, #tpu.memory_space<vmem>>, vector<128x384xbf16>
    %cst_35 = arith.constant dense<0.000000e+00> : vector<4x384xf32>
    %59 = tpu.matmul %57, %58, %cst_35 {dimension_numbers = #tpu.dot_dimension_numbers<[1], [0], [0], [1], [0, 0, 1, 1], [], []>} : vector<4x128xbf16>, vector<128x384xbf16>, vector<4x384xf32> -> vector<4x384xf32>
    %60 = vector.extract_strided_slice %24 {offsets = [0, 0], sizes = [4, 384], strides = [1, 1]} : vector<16x384xf32> to vector<4x384xf32>
    %61 = arith.addf %59, %60 : vector<4x384xf32>
    %62 = arith.truncf %10 : vector<4x128xf32> to vector<4x128xbf16>
    %c0_36 = arith.constant 0 : index
    %c0_37 = arith.constant 0 : index
    %63 = vector.load %arg12[%c0_36, %c0_37] : memref<128x384xbf16, #tpu.memory_space<vmem>>, vector<128x384xbf16>
    %cst_38 = arith.constant dense<0.000000e+00> : vector<4x384xf32>
    %64 = tpu.matmul %62, %63, %cst_38 {dimension_numbers = #tpu.dot_dimension_numbers<[1], [0], [0], [1], [0, 0, 1, 1], [], []>} : vector<4x128xbf16>, vector<128x384xbf16>, vector<4x384xf32> -> vector<4x384xf32>
    %c0_39 = arith.constant 0 : index
    %c0_40 = arith.constant 0 : index
    %65 = vector.load %arg14[%c0_39, %c0_40] : memref<1x384xf32, #tpu.memory_space<vmem>>, vector<1x384xf32>
    %66 = vector.broadcast %65 : vector<1x384xf32> to vector<4x384xf32>
    %67 = arith.addf %64, %66 : vector<4x384xf32>
    %68 = vector.extract_strided_slice %61 {offsets = [0, 0], sizes = [4, 128], strides = [1, 1]} : vector<4x384xf32> to vector<4x128xf32>
    %69 = vector.extract_strided_slice %67 {offsets = [0, 0], sizes = [4, 128], strides = [1, 1]} : vector<4x384xf32> to vector<4x128xf32>
    %70 = arith.addf %68, %69 : vector<4x128xf32>
    %71 = arith.negf %70 : vector<4x128xf32>
    %72 = math.exp %71 : vector<4x128xf32>
    %cst_41 = arith.constant 1.000000e+00 : f32
    %73 = vector.broadcast %cst_41 : f32 to vector<4x128xf32>
    %74 = arith.addf %73, %72 : vector<4x128xf32>
    %75 = arith.divf %73, %74 : vector<4x128xf32>
    %76 = vector.extract_strided_slice %61 {offsets = [0, 128], sizes = [4, 128], strides = [1, 1]} : vector<4x384xf32> to vector<4x128xf32>
    %77 = vector.extract_strided_slice %67 {offsets = [0, 128], sizes = [4, 128], strides = [1, 1]} : vector<4x384xf32> to vector<4x128xf32>
    %78 = arith.addf %76, %77 : vector<4x128xf32>
    %79 = arith.negf %78 : vector<4x128xf32>
    %80 = math.exp %79 : vector<4x128xf32>
    %cst_42 = arith.constant 1.000000e+00 : f32
    %81 = vector.broadcast %cst_42 : f32 to vector<4x128xf32>
    %82 = arith.addf %81, %80 : vector<4x128xf32>
    %83 = arith.divf %81, %82 : vector<4x128xf32>
    %84 = vector.extract_strided_slice %61 {offsets = [0, 256], sizes = [4, 128], strides = [1, 1]} : vector<4x384xf32> to vector<4x128xf32>
    %85 = vector.extract_strided_slice %67 {offsets = [0, 256], sizes = [4, 128], strides = [1, 1]} : vector<4x384xf32> to vector<4x128xf32>
    %86 = arith.mulf %75, %85 : vector<4x128xf32>
    %87 = arith.addf %84, %86 : vector<4x128xf32>
    %88 = math.tanh %87 : vector<4x128xf32>
    %cst_43 = arith.constant 1.000000e+00 : f32
    %89 = vector.broadcast %cst_43 : f32 to vector<4x128xf32>
    %90 = arith.subf %89, %83 : vector<4x128xf32>
    %91 = arith.mulf %90, %88 : vector<4x128xf32>
    %92 = arith.mulf %83, %10 : vector<4x128xf32>
    %93 = arith.addf %91, %92 : vector<4x128xf32>
    %94 = arith.truncf %93 : vector<4x128xf32> to vector<4x128xbf16>
    %c0_44 = arith.constant 0 : index
    %c0_45 = arith.constant 0 : index
    %95 = vector.load %arg6[%c0_44, %c0_45] : memref<128x128xbf16, #tpu.memory_space<vmem>>, vector<128x128xbf16>
    %cst_46 = arith.constant dense<0.000000e+00> : vector<4x128xf32>
    %96 = tpu.matmul %94, %95, %cst_46 {dimension_numbers = #tpu.dot_dimension_numbers<[1], [0], [0], [1], [0, 0, 1, 1], [], []>} : vector<4x128xbf16>, vector<128x128xbf16>, vector<4x128xf32> -> vector<4x128xf32>
    %c0_47 = arith.constant 0 : index
    %c0_48 = arith.constant 0 : index
    %97 = vector.load %arg7[%c0_47, %c0_48] : memref<1x128xf32, #tpu.memory_space<vmem>>, vector<1x128xf32>
    %98 = vector.broadcast %97 : vector<1x128xf32> to vector<4x128xf32>
    %99 = arith.addf %96, %98 : vector<4x128xf32>
    %100 = vector.shape_cast %99 : vector<4x128xf32> to vector<4x1x128xf32>
    %101 = vector.broadcast %100 : vector<4x1x128xf32> to vector<4x16x128xf32>
    %102 = arith.addf %18, %101 : vector<4x16x128xf32>
    %103 = math.tanh %102 : vector<4x16x128xf32>
    %104 = vector.shape_cast %25 : vector<1x128xf32> to vector<1x1x128xf32>
    %105 = vector.broadcast %104 : vector<1x1x128xf32> to vector<4x16x128xf32>
    %106 = arith.mulf %103, %105 : vector<4x16x128xf32>
    %cst_49 = arith.constant dense<0.000000e+00> : vector<4x16xf32>
    %107 = vector.multi_reduction <add>, %106, %cst_49 [2] : vector<4x16x128xf32> to vector<4x16xf32>
    %108 = vector.broadcast %26 : vector<1x1xf32> to vector<4x16xf32>
    %109 = arith.addf %107, %108 : vector<4x16xf32>
    %cst_50 = arith.constant dense<0xFF800000> : vector<4xf32>
    %110 = vector.multi_reduction <maximumf>, %109, %cst_50 [1] : vector<4x16xf32> to vector<4xf32>
    %111 = vector.shape_cast %110 : vector<4xf32> to vector<4x1xf32>
    %112 = vector.broadcast %111 : vector<4x1xf32> to vector<4x16xf32>
    %113 = arith.subf %109, %112 : vector<4x16xf32>
    %114 = math.exp %113 : vector<4x16xf32>
    %cst_51 = arith.constant dense<0.000000e+00> : vector<4xf32>
    %115 = vector.multi_reduction <add>, %114, %cst_51 [1] : vector<4x16xf32> to vector<4xf32>
    %116 = vector.shape_cast %115 : vector<4xf32> to vector<4x1xf32>
    %117 = tpu.reciprocal %116 {approx = true} : vector<4x1xf32> -> vector<4x1xf32>
    %118 = vector.broadcast %117 : vector<4x1xf32> to vector<4x16xf32>
    %119 = arith.mulf %114, %118 : vector<4x16xf32>
    %120 = vector.shape_cast %119 : vector<4x16xf32> to vector<4x16x1xf32>
    %121 = vector.broadcast %120 : vector<4x16x1xf32> to vector<4x16x128xf32>
    %122 = arith.mulf %0, %121 : vector<4x16x128xf32>
    %cst_52 = arith.constant dense<0.000000e+00> : vector<4x128xf32>
    %123 = vector.multi_reduction <add>, %122, %cst_52 [1] : vector<4x16x128xf32> to vector<4x128xf32>
    %124 = arith.truncf %123 : vector<4x128xf32> to vector<4x128xbf16>
    %c0_53 = arith.constant 0 : index
    %c0_54 = arith.constant 0 : index
    %125 = vector.load %arg10[%c0_53, %c0_54] : memref<128x384xbf16, #tpu.memory_space<vmem>>, vector<128x384xbf16>
    %cst_55 = arith.constant dense<0.000000e+00> : vector<4x384xf32>
    %126 = tpu.matmul %124, %125, %cst_55 {dimension_numbers = #tpu.dot_dimension_numbers<[1], [0], [0], [1], [0, 0, 1, 1], [], []>} : vector<4x128xbf16>, vector<128x384xbf16>, vector<4x384xf32> -> vector<4x384xf32>
    %127 = vector.extract_strided_slice %24 {offsets = [4, 0], sizes = [4, 384], strides = [1, 1]} : vector<16x384xf32> to vector<4x384xf32>
    %128 = arith.addf %126, %127 : vector<4x384xf32>
    %129 = arith.truncf %93 : vector<4x128xf32> to vector<4x128xbf16>
    %c0_56 = arith.constant 0 : index
    %c0_57 = arith.constant 0 : index
    %130 = vector.load %arg12[%c0_56, %c0_57] : memref<128x384xbf16, #tpu.memory_space<vmem>>, vector<128x384xbf16>
    %cst_58 = arith.constant dense<0.000000e+00> : vector<4x384xf32>
    %131 = tpu.matmul %129, %130, %cst_58 {dimension_numbers = #tpu.dot_dimension_numbers<[1], [0], [0], [1], [0, 0, 1, 1], [], []>} : vector<4x128xbf16>, vector<128x384xbf16>, vector<4x384xf32> -> vector<4x384xf32>
    %c0_59 = arith.constant 0 : index
    %c0_60 = arith.constant 0 : index
    %132 = vector.load %arg14[%c0_59, %c0_60] : memref<1x384xf32, #tpu.memory_space<vmem>>, vector<1x384xf32>
    %133 = vector.broadcast %132 : vector<1x384xf32> to vector<4x384xf32>
    %134 = arith.addf %131, %133 : vector<4x384xf32>
    %135 = vector.extract_strided_slice %128 {offsets = [0, 0], sizes = [4, 128], strides = [1, 1]} : vector<4x384xf32> to vector<4x128xf32>
    %136 = vector.extract_strided_slice %134 {offsets = [0, 0], sizes = [4, 128], strides = [1, 1]} : vector<4x384xf32> to vector<4x128xf32>
    %137 = arith.addf %135, %136 : vector<4x128xf32>
    %138 = arith.negf %137 : vector<4x128xf32>
    %139 = math.exp %138 : vector<4x128xf32>
    %cst_61 = arith.constant 1.000000e+00 : f32
    %140 = vector.broadcast %cst_61 : f32 to vector<4x128xf32>
    %141 = arith.addf %140, %139 : vector<4x128xf32>
    %142 = arith.divf %140, %141 : vector<4x128xf32>
    %143 = vector.extract_strided_slice %128 {offsets = [0, 128], sizes = [4, 128], strides = [1, 1]} : vector<4x384xf32> to vector<4x128xf32>
    %144 = vector.extract_strided_slice %134 {offsets = [0, 128], sizes = [4, 128], strides = [1, 1]} : vector<4x384xf32> to vector<4x128xf32>
    %145 = arith.addf %143, %144 : vector<4x128xf32>
    %146 = arith.negf %145 : vector<4x128xf32>
    %147 = math.exp %146 : vector<4x128xf32>
    %cst_62 = arith.constant 1.000000e+00 : f32
    %148 = vector.broadcast %cst_62 : f32 to vector<4x128xf32>
    %149 = arith.addf %148, %147 : vector<4x128xf32>
    %150 = arith.divf %148, %149 : vector<4x128xf32>
    %151 = vector.extract_strided_slice %128 {offsets = [0, 256], sizes = [4, 128], strides = [1, 1]} : vector<4x384xf32> to vector<4x128xf32>
    %152 = vector.extract_strided_slice %134 {offsets = [0, 256], sizes = [4, 128], strides = [1, 1]} : vector<4x384xf32> to vector<4x128xf32>
    %153 = arith.mulf %142, %152 : vector<4x128xf32>
    %154 = arith.addf %151, %153 : vector<4x128xf32>
    %155 = math.tanh %154 : vector<4x128xf32>
    %cst_63 = arith.constant 1.000000e+00 : f32
    %156 = vector.broadcast %cst_63 : f32 to vector<4x128xf32>
    %157 = arith.subf %156, %150 : vector<4x128xf32>
    %158 = arith.mulf %157, %155 : vector<4x128xf32>
    %159 = arith.mulf %150, %93 : vector<4x128xf32>
    %160 = arith.addf %158, %159 : vector<4x128xf32>
    %161 = arith.truncf %160 : vector<4x128xf32> to vector<4x128xbf16>
    %c0_64 = arith.constant 0 : index
    %c0_65 = arith.constant 0 : index
    %162 = vector.load %arg6[%c0_64, %c0_65] : memref<128x128xbf16, #tpu.memory_space<vmem>>, vector<128x128xbf16>
    %cst_66 = arith.constant dense<0.000000e+00> : vector<4x128xf32>
    %163 = tpu.matmul %161, %162, %cst_66 {dimension_numbers = #tpu.dot_dimension_numbers<[1], [0], [0], [1], [0, 0, 1, 1], [], []>} : vector<4x128xbf16>, vector<128x128xbf16>, vector<4x128xf32> -> vector<4x128xf32>
    %c0_67 = arith.constant 0 : index
    %c0_68 = arith.constant 0 : index
    %164 = vector.load %arg7[%c0_67, %c0_68] : memref<1x128xf32, #tpu.memory_space<vmem>>, vector<1x128xf32>
    %165 = vector.broadcast %164 : vector<1x128xf32> to vector<4x128xf32>
    %166 = arith.addf %163, %165 : vector<4x128xf32>
    %167 = vector.shape_cast %166 : vector<4x128xf32> to vector<4x1x128xf32>
    %168 = vector.broadcast %167 : vector<4x1x128xf32> to vector<4x16x128xf32>
    %169 = arith.addf %18, %168 : vector<4x16x128xf32>
    %170 = math.tanh %169 : vector<4x16x128xf32>
    %171 = vector.shape_cast %25 : vector<1x128xf32> to vector<1x1x128xf32>
    %172 = vector.broadcast %171 : vector<1x1x128xf32> to vector<4x16x128xf32>
    %173 = arith.mulf %170, %172 : vector<4x16x128xf32>
    %cst_69 = arith.constant dense<0.000000e+00> : vector<4x16xf32>
    %174 = vector.multi_reduction <add>, %173, %cst_69 [2] : vector<4x16x128xf32> to vector<4x16xf32>
    %175 = vector.broadcast %26 : vector<1x1xf32> to vector<4x16xf32>
    %176 = arith.addf %174, %175 : vector<4x16xf32>
    %cst_70 = arith.constant dense<0xFF800000> : vector<4xf32>
    %177 = vector.multi_reduction <maximumf>, %176, %cst_70 [1] : vector<4x16xf32> to vector<4xf32>
    %178 = vector.shape_cast %177 : vector<4xf32> to vector<4x1xf32>
    %179 = vector.broadcast %178 : vector<4x1xf32> to vector<4x16xf32>
    %180 = arith.subf %176, %179 : vector<4x16xf32>
    %181 = math.exp %180 : vector<4x16xf32>
    %cst_71 = arith.constant dense<0.000000e+00> : vector<4xf32>
    %182 = vector.multi_reduction <add>, %181, %cst_71 [1] : vector<4x16xf32> to vector<4xf32>
    %183 = vector.shape_cast %182 : vector<4xf32> to vector<4x1xf32>
    %184 = tpu.reciprocal %183 {approx = true} : vector<4x1xf32> -> vector<4x1xf32>
    %185 = vector.broadcast %184 : vector<4x1xf32> to vector<4x16xf32>
    %186 = arith.mulf %181, %185 : vector<4x16xf32>
    %187 = vector.shape_cast %186 : vector<4x16xf32> to vector<4x16x1xf32>
    %188 = vector.broadcast %187 : vector<4x16x1xf32> to vector<4x16x128xf32>
    %189 = arith.mulf %0, %188 : vector<4x16x128xf32>
    %cst_72 = arith.constant dense<0.000000e+00> : vector<4x128xf32>
    %190 = vector.multi_reduction <add>, %189, %cst_72 [1] : vector<4x16x128xf32> to vector<4x128xf32>
    %191 = arith.truncf %190 : vector<4x128xf32> to vector<4x128xbf16>
    %c0_73 = arith.constant 0 : index
    %c0_74 = arith.constant 0 : index
    %192 = vector.load %arg10[%c0_73, %c0_74] : memref<128x384xbf16, #tpu.memory_space<vmem>>, vector<128x384xbf16>
    %cst_75 = arith.constant dense<0.000000e+00> : vector<4x384xf32>
    %193 = tpu.matmul %191, %192, %cst_75 {dimension_numbers = #tpu.dot_dimension_numbers<[1], [0], [0], [1], [0, 0, 1, 1], [], []>} : vector<4x128xbf16>, vector<128x384xbf16>, vector<4x384xf32> -> vector<4x384xf32>
    %194 = vector.extract_strided_slice %24 {offsets = [8, 0], sizes = [4, 384], strides = [1, 1]} : vector<16x384xf32> to vector<4x384xf32>
    %195 = arith.addf %193, %194 : vector<4x384xf32>
    %196 = arith.truncf %160 : vector<4x128xf32> to vector<4x128xbf16>
    %c0_76 = arith.constant 0 : index
    %c0_77 = arith.constant 0 : index
    %197 = vector.load %arg12[%c0_76, %c0_77] : memref<128x384xbf16, #tpu.memory_space<vmem>>, vector<128x384xbf16>
    %cst_78 = arith.constant dense<0.000000e+00> : vector<4x384xf32>
    %198 = tpu.matmul %196, %197, %cst_78 {dimension_numbers = #tpu.dot_dimension_numbers<[1], [0], [0], [1], [0, 0, 1, 1], [], []>} : vector<4x128xbf16>, vector<128x384xbf16>, vector<4x384xf32> -> vector<4x384xf32>
    %c0_79 = arith.constant 0 : index
    %c0_80 = arith.constant 0 : index
    %199 = vector.load %arg14[%c0_79, %c0_80] : memref<1x384xf32, #tpu.memory_space<vmem>>, vector<1x384xf32>
    %200 = vector.broadcast %199 : vector<1x384xf32> to vector<4x384xf32>
    %201 = arith.addf %198, %200 : vector<4x384xf32>
    %202 = vector.extract_strided_slice %195 {offsets = [0, 0], sizes = [4, 128], strides = [1, 1]} : vector<4x384xf32> to vector<4x128xf32>
    %203 = vector.extract_strided_slice %201 {offsets = [0, 0], sizes = [4, 128], strides = [1, 1]} : vector<4x384xf32> to vector<4x128xf32>
    %204 = arith.addf %202, %203 : vector<4x128xf32>
    %205 = arith.negf %204 : vector<4x128xf32>
    %206 = math.exp %205 : vector<4x128xf32>
    %cst_81 = arith.constant 1.000000e+00 : f32
    %207 = vector.broadcast %cst_81 : f32 to vector<4x128xf32>
    %208 = arith.addf %207, %206 : vector<4x128xf32>
    %209 = arith.divf %207, %208 : vector<4x128xf32>
    %210 = vector.extract_strided_slice %195 {offsets = [0, 128], sizes = [4, 128], strides = [1, 1]} : vector<4x384xf32> to vector<4x128xf32>
    %211 = vector.extract_strided_slice %201 {offsets = [0, 128], sizes = [4, 128], strides = [1, 1]} : vector<4x384xf32> to vector<4x128xf32>
    %212 = arith.addf %210, %211 : vector<4x128xf32>
    %213 = arith.negf %212 : vector<4x128xf32>
    %214 = math.exp %213 : vector<4x128xf32>
    %cst_82 = arith.constant 1.000000e+00 : f32
    %215 = vector.broadcast %cst_82 : f32 to vector<4x128xf32>
    %216 = arith.addf %215, %214 : vector<4x128xf32>
    %217 = arith.divf %215, %216 : vector<4x128xf32>
    %218 = vector.extract_strided_slice %195 {offsets = [0, 256], sizes = [4, 128], strides = [1, 1]} : vector<4x384xf32> to vector<4x128xf32>
    %219 = vector.extract_strided_slice %201 {offsets = [0, 256], sizes = [4, 128], strides = [1, 1]} : vector<4x384xf32> to vector<4x128xf32>
    %220 = arith.mulf %209, %219 : vector<4x128xf32>
    %221 = arith.addf %218, %220 : vector<4x128xf32>
    %222 = math.tanh %221 : vector<4x128xf32>
    %cst_83 = arith.constant 1.000000e+00 : f32
    %223 = vector.broadcast %cst_83 : f32 to vector<4x128xf32>
    %224 = arith.subf %223, %217 : vector<4x128xf32>
    %225 = arith.mulf %224, %222 : vector<4x128xf32>
    %226 = arith.mulf %217, %160 : vector<4x128xf32>
    %227 = arith.addf %225, %226 : vector<4x128xf32>
    %228 = arith.truncf %227 : vector<4x128xf32> to vector<4x128xbf16>
    %c0_84 = arith.constant 0 : index
    %c0_85 = arith.constant 0 : index
    %229 = vector.load %arg6[%c0_84, %c0_85] : memref<128x128xbf16, #tpu.memory_space<vmem>>, vector<128x128xbf16>
    %cst_86 = arith.constant dense<0.000000e+00> : vector<4x128xf32>
    %230 = tpu.matmul %228, %229, %cst_86 {dimension_numbers = #tpu.dot_dimension_numbers<[1], [0], [0], [1], [0, 0, 1, 1], [], []>} : vector<4x128xbf16>, vector<128x128xbf16>, vector<4x128xf32> -> vector<4x128xf32>
    %c0_87 = arith.constant 0 : index
    %c0_88 = arith.constant 0 : index
    %231 = vector.load %arg7[%c0_87, %c0_88] : memref<1x128xf32, #tpu.memory_space<vmem>>, vector<1x128xf32>
    %232 = vector.broadcast %231 : vector<1x128xf32> to vector<4x128xf32>
    %233 = arith.addf %230, %232 : vector<4x128xf32>
    %234 = vector.shape_cast %233 : vector<4x128xf32> to vector<4x1x128xf32>
    %235 = vector.broadcast %234 : vector<4x1x128xf32> to vector<4x16x128xf32>
    %236 = arith.addf %18, %235 : vector<4x16x128xf32>
    %237 = math.tanh %236 : vector<4x16x128xf32>
    %238 = vector.shape_cast %25 : vector<1x128xf32> to vector<1x1x128xf32>
    %239 = vector.broadcast %238 : vector<1x1x128xf32> to vector<4x16x128xf32>
    %240 = arith.mulf %237, %239 : vector<4x16x128xf32>
    %cst_89 = arith.constant dense<0.000000e+00> : vector<4x16xf32>
    %241 = vector.multi_reduction <add>, %240, %cst_89 [2] : vector<4x16x128xf32> to vector<4x16xf32>
    %242 = vector.broadcast %26 : vector<1x1xf32> to vector<4x16xf32>
    %243 = arith.addf %241, %242 : vector<4x16xf32>
    %cst_90 = arith.constant dense<0xFF800000> : vector<4xf32>
    %244 = vector.multi_reduction <maximumf>, %243, %cst_90 [1] : vector<4x16xf32> to vector<4xf32>
    %245 = vector.shape_cast %244 : vector<4xf32> to vector<4x1xf32>
    %246 = vector.broadcast %245 : vector<4x1xf32> to vector<4x16xf32>
    %247 = arith.subf %243, %246 : vector<4x16xf32>
    %248 = math.exp %247 : vector<4x16xf32>
    %cst_91 = arith.constant dense<0.000000e+00> : vector<4xf32>
    %249 = vector.multi_reduction <add>, %248, %cst_91 [1] : vector<4x16xf32> to vector<4xf32>
    %250 = vector.shape_cast %249 : vector<4xf32> to vector<4x1xf32>
    %251 = tpu.reciprocal %250 {approx = true} : vector<4x1xf32> -> vector<4x1xf32>
    %252 = vector.broadcast %251 : vector<4x1xf32> to vector<4x16xf32>
    %253 = arith.mulf %248, %252 : vector<4x16xf32>
    %254 = vector.shape_cast %253 : vector<4x16xf32> to vector<4x16x1xf32>
    %255 = vector.broadcast %254 : vector<4x16x1xf32> to vector<4x16x128xf32>
    %256 = arith.mulf %0, %255 : vector<4x16x128xf32>
    %cst_92 = arith.constant dense<0.000000e+00> : vector<4x128xf32>
    %257 = vector.multi_reduction <add>, %256, %cst_92 [1] : vector<4x16x128xf32> to vector<4x128xf32>
    %258 = arith.truncf %257 : vector<4x128xf32> to vector<4x128xbf16>
    %c0_93 = arith.constant 0 : index
    %c0_94 = arith.constant 0 : index
    %259 = vector.load %arg10[%c0_93, %c0_94] : memref<128x384xbf16, #tpu.memory_space<vmem>>, vector<128x384xbf16>
    %cst_95 = arith.constant dense<0.000000e+00> : vector<4x384xf32>
    %260 = tpu.matmul %258, %259, %cst_95 {dimension_numbers = #tpu.dot_dimension_numbers<[1], [0], [0], [1], [0, 0, 1, 1], [], []>} : vector<4x128xbf16>, vector<128x384xbf16>, vector<4x384xf32> -> vector<4x384xf32>
    %261 = vector.extract_strided_slice %24 {offsets = [12, 0], sizes = [4, 384], strides = [1, 1]} : vector<16x384xf32> to vector<4x384xf32>
    %262 = arith.addf %260, %261 : vector<4x384xf32>
    %263 = arith.truncf %227 : vector<4x128xf32> to vector<4x128xbf16>
    %c0_96 = arith.constant 0 : index
    %c0_97 = arith.constant 0 : index
    %264 = vector.load %arg12[%c0_96, %c0_97] : memref<128x384xbf16, #tpu.memory_space<vmem>>, vector<128x384xbf16>
    %cst_98 = arith.constant dense<0.000000e+00> : vector<4x384xf32>
    %265 = tpu.matmul %263, %264, %cst_98 {dimension_numbers = #tpu.dot_dimension_numbers<[1], [0], [0], [1], [0, 0, 1, 1], [], []>} : vector<4x128xbf16>, vector<128x384xbf16>, vector<4x384xf32> -> vector<4x384xf32>
    %c0_99 = arith.constant 0 : index
    %c0_100 = arith.constant 0 : index
    %266 = vector.load %arg14[%c0_99, %c0_100] : memref<1x384xf32, #tpu.memory_space<vmem>>, vector<1x384xf32>
    %267 = vector.broadcast %266 : vector<1x384xf32> to vector<4x384xf32>
    %268 = arith.addf %265, %267 : vector<4x384xf32>
    %269 = vector.extract_strided_slice %262 {offsets = [0, 0], sizes = [4, 128], strides = [1, 1]} : vector<4x384xf32> to vector<4x128xf32>
    %270 = vector.extract_strided_slice %268 {offsets = [0, 0], sizes = [4, 128], strides = [1, 1]} : vector<4x384xf32> to vector<4x128xf32>
    %271 = arith.addf %269, %270 : vector<4x128xf32>
    %272 = arith.negf %271 : vector<4x128xf32>
    %273 = math.exp %272 : vector<4x128xf32>
    %cst_101 = arith.constant 1.000000e+00 : f32
    %274 = vector.broadcast %cst_101 : f32 to vector<4x128xf32>
    %275 = arith.addf %274, %273 : vector<4x128xf32>
    %276 = arith.divf %274, %275 : vector<4x128xf32>
    %277 = vector.extract_strided_slice %262 {offsets = [0, 128], sizes = [4, 128], strides = [1, 1]} : vector<4x384xf32> to vector<4x128xf32>
    %278 = vector.extract_strided_slice %268 {offsets = [0, 128], sizes = [4, 128], strides = [1, 1]} : vector<4x384xf32> to vector<4x128xf32>
    %279 = arith.addf %277, %278 : vector<4x128xf32>
    %280 = arith.negf %279 : vector<4x128xf32>
    %281 = math.exp %280 : vector<4x128xf32>
    %cst_102 = arith.constant 1.000000e+00 : f32
    %282 = vector.broadcast %cst_102 : f32 to vector<4x128xf32>
    %283 = arith.addf %282, %281 : vector<4x128xf32>
    %284 = arith.divf %282, %283 : vector<4x128xf32>
    %285 = vector.extract_strided_slice %262 {offsets = [0, 256], sizes = [4, 128], strides = [1, 1]} : vector<4x384xf32> to vector<4x128xf32>
    %286 = vector.extract_strided_slice %268 {offsets = [0, 256], sizes = [4, 128], strides = [1, 1]} : vector<4x384xf32> to vector<4x128xf32>
    %287 = arith.mulf %276, %286 : vector<4x128xf32>
    %288 = arith.addf %285, %287 : vector<4x128xf32>
    %289 = math.tanh %288 : vector<4x128xf32>
    %cst_103 = arith.constant 1.000000e+00 : f32
    %290 = vector.broadcast %cst_103 : f32 to vector<4x128xf32>
    %291 = arith.subf %290, %284 : vector<4x128xf32>
    %292 = arith.mulf %291, %289 : vector<4x128xf32>
    %293 = arith.mulf %284, %227 : vector<4x128xf32>
    %294 = arith.addf %292, %293 : vector<4x128xf32>
    %295 = tpu.concatenate %93, %160, %227, %294 in 0 : vector<4x128xf32>, vector<4x128xf32>, vector<4x128xf32>, vector<4x128xf32> -> vector<16x128xf32>
    %296 = arith.truncf %295 : vector<16x128xf32> to vector<16x128xbf16>
    %c0_104 = arith.constant 0 : index
    %c0_105 = arith.constant 0 : index
    %297 = vector.load %arg15[%c0_104, %c0_105] : memref<128x128xbf16, #tpu.memory_space<vmem>>, vector<128x128xbf16>
    %cst_106 = arith.constant dense<0.000000e+00> : vector<16x128xf32>
    %298 = tpu.matmul %296, %297, %cst_106 {dimension_numbers = #tpu.dot_dimension_numbers<[1], [0], [0], [1], [0, 0, 1, 1], [], []>} : vector<16x128xbf16>, vector<128x128xbf16>, vector<16x128xf32> -> vector<16x128xf32>
    %c0_107 = arith.constant 0 : index
    %c0_108 = arith.constant 0 : index
    %299 = vector.load %arg16[%c0_107, %c0_108] : memref<1x128xf32, #tpu.memory_space<vmem>>, vector<1x128xf32>
    %300 = vector.broadcast %299 : vector<1x128xf32> to vector<16x128xf32>
    %301 = arith.addf %298, %300 : vector<16x128xf32>
    %cst_109 = arith.constant 0.000000e+00 : f32
    %302 = vector.broadcast %cst_109 : f32 to vector<16x128xf32>
    %303 = arith.maximumf %301, %302 : vector<16x128xf32>
    %304 = vector.extract_strided_slice %303 {offsets = [0, 0], sizes = [4, 128], strides = [1, 1]} : vector<16x128xf32> to vector<4x128xf32>
    %305 = arith.truncf %304 : vector<4x128xf32> to vector<4x128xbf16>
    %c0_110 = arith.constant 0 : index
    %c0_111 = arith.constant 0 : index
    %c0_112 = arith.constant 0 : index
    %306 = vector.load %arg17[%c0_110, %c0_111, %c0_112] : memref<4x128x128xbf16, #tpu.memory_space<vmem>>, vector<1x128x128xbf16>
    %307 = vector.shape_cast %306 : vector<1x128x128xbf16> to vector<128x128xbf16>
    %cst_113 = arith.constant dense<0.000000e+00> : vector<4x128xf32>
    %308 = tpu.matmul %305, %307, %cst_113 {dimension_numbers = #tpu.dot_dimension_numbers<[1], [0], [0], [1], [0, 0, 1, 1], [], []>} : vector<4x128xbf16>, vector<128x128xbf16>, vector<4x128xf32> -> vector<4x128xf32>
    %c0_114 = arith.constant 0 : index
    %c0_115 = arith.constant 0 : index
    %c0_116 = arith.constant 0 : index
    %309 = vector.load %arg18[%c0_114, %c0_115, %c0_116] : memref<4x1x128xf32, #tpu.memory_space<vmem>>, vector<1x1x128xf32>
    %310 = vector.shape_cast %309 : vector<1x1x128xf32> to vector<1x128xf32>
    %311 = vector.broadcast %310 : vector<1x128xf32> to vector<4x128xf32>
    %312 = arith.addf %308, %311 : vector<4x128xf32>
    %c0_117 = arith.constant 0 : index
    %c0_118 = arith.constant 0 : index
    %c0_119 = arith.constant 0 : index
    %313 = vector.load %arg19[%c0_117, %c0_118, %c0_119] : memref<4x4x128xf32, #tpu.memory_space<vmem>>, vector<1x4x128xf32>
    %314 = vector.shape_cast %313 : vector<1x4x128xf32> to vector<4x128xf32>
    %315 = vector.shape_cast %312 : vector<4x128xf32> to vector<1x4x128xf32>
    tpu.vector_store %arg19[%c0_117, %c0_118, %c0_119], %315 {strides = array<i32>} : memref<4x4x128xf32, #tpu.memory_space<vmem>>, vector<1x4x128xf32>,
    %316 = vector.extract_strided_slice %303 {offsets = [4, 0], sizes = [4, 128], strides = [1, 1]} : vector<16x128xf32> to vector<4x128xf32>
    %317 = arith.truncf %316 : vector<4x128xf32> to vector<4x128xbf16>
    %c1 = arith.constant 1 : index
    %c0_120 = arith.constant 0 : index
    %c0_121 = arith.constant 0 : index
    %318 = vector.load %arg17[%c1, %c0_120, %c0_121] : memref<4x128x128xbf16, #tpu.memory_space<vmem>>, vector<1x128x128xbf16>
    %319 = vector.shape_cast %318 : vector<1x128x128xbf16> to vector<128x128xbf16>
    %cst_122 = arith.constant dense<0.000000e+00> : vector<4x128xf32>
    %320 = tpu.matmul %317, %319, %cst_122 {dimension_numbers = #tpu.dot_dimension_numbers<[1], [0], [0], [1], [0, 0, 1, 1], [], []>} : vector<4x128xbf16>, vector<128x128xbf16>, vector<4x128xf32> -> vector<4x128xf32>
    %c1_123 = arith.constant 1 : index
    %c0_124 = arith.constant 0 : index
    %c0_125 = arith.constant 0 : index
    %321 = vector.load %arg18[%c1_123, %c0_124, %c0_125] : memref<4x1x128xf32, #tpu.memory_space<vmem>>, vector<1x1x128xf32>
    %322 = vector.shape_cast %321 : vector<1x1x128xf32> to vector<1x128xf32>
    %323 = vector.broadcast %322 : vector<1x128xf32> to vector<4x128xf32>
    %324 = arith.addf %320, %323 : vector<4x128xf32>
    %c1_126 = arith.constant 1 : index
    %c0_127 = arith.constant 0 : index
    %c0_128 = arith.constant 0 : index
    %325 = vector.load %arg19[%c1_126, %c0_127, %c0_128] : memref<4x4x128xf32, #tpu.memory_space<vmem>>, vector<1x4x128xf32>
    %326 = vector.shape_cast %325 : vector<1x4x128xf32> to vector<4x128xf32>
    %327 = vector.shape_cast %324 : vector<4x128xf32> to vector<1x4x128xf32>
    tpu.vector_store %arg19[%c1_126, %c0_127, %c0_128], %327 {strides = array<i32>} : memref<4x4x128xf32, #tpu.memory_space<vmem>>, vector<1x4x128xf32>,
    %328 = vector.extract_strided_slice %303 {offsets = [8, 0], sizes = [4, 128], strides = [1, 1]} : vector<16x128xf32> to vector<4x128xf32>
    %329 = arith.truncf %328 : vector<4x128xf32> to vector<4x128xbf16>
    %c2 = arith.constant 2 : index
    %c0_129 = arith.constant 0 : index
    %c0_130 = arith.constant 0 : index
    %330 = vector.load %arg17[%c2, %c0_129, %c0_130] : memref<4x128x128xbf16, #tpu.memory_space<vmem>>, vector<1x128x128xbf16>
    %331 = vector.shape_cast %330 : vector<1x128x128xbf16> to vector<128x128xbf16>
    %cst_131 = arith.constant dense<0.000000e+00> : vector<4x128xf32>
    %332 = tpu.matmul %329, %331, %cst_131 {dimension_numbers = #tpu.dot_dimension_numbers<[1], [0], [0], [1], [0, 0, 1, 1], [], []>} : vector<4x128xbf16>, vector<128x128xbf16>, vector<4x128xf32> -> vector<4x128xf32>
    %c2_132 = arith.constant 2 : index
    %c0_133 = arith.constant 0 : index
    %c0_134 = arith.constant 0 : index
    %333 = vector.load %arg18[%c2_132, %c0_133, %c0_134] : memref<4x1x128xf32, #tpu.memory_space<vmem>>, vector<1x1x128xf32>
    %334 = vector.shape_cast %333 : vector<1x1x128xf32> to vector<1x128xf32>
    %335 = vector.broadcast %334 : vector<1x128xf32> to vector<4x128xf32>
    %336 = arith.addf %332, %335 : vector<4x128xf32>
    %c2_135 = arith.constant 2 : index
    %c0_136 = arith.constant 0 : index
    %c0_137 = arith.constant 0 : index
    %337 = vector.load %arg19[%c2_135, %c0_136, %c0_137] : memref<4x4x128xf32, #tpu.memory_space<vmem>>, vector<1x4x128xf32>
    %338 = vector.shape_cast %337 : vector<1x4x128xf32> to vector<4x128xf32>
    %339 = vector.shape_cast %336 : vector<4x128xf32> to vector<1x4x128xf32>
    tpu.vector_store %arg19[%c2_135, %c0_136, %c0_137], %339 {strides = array<i32>} : memref<4x4x128xf32, #tpu.memory_space<vmem>>, vector<1x4x128xf32>,
    %340 = vector.extract_strided_slice %303 {offsets = [12, 0], sizes = [4, 128], strides = [1, 1]} : vector<16x128xf32> to vector<4x128xf32>
    %341 = arith.truncf %340 : vector<4x128xf32> to vector<4x128xbf16>
    %c3 = arith.constant 3 : index
    %c0_138 = arith.constant 0 : index
    %c0_139 = arith.constant 0 : index
    %342 = vector.load %arg17[%c3, %c0_138, %c0_139] : memref<4x128x128xbf16, #tpu.memory_space<vmem>>, vector<1x128x128xbf16>
    %343 = vector.shape_cast %342 : vector<1x128x128xbf16> to vector<128x128xbf16>
    %cst_140 = arith.constant dense<0.000000e+00> : vector<4x128xf32>
    %344 = tpu.matmul %341, %343, %cst_140 {dimension_numbers = #tpu.dot_dimension_numbers<[1], [0], [0], [1], [0, 0, 1, 1], [], []>} : vector<4x128xbf16>, vector<128x128xbf16>, vector<4x128xf32> -> vector<4x128xf32>
    %c3_141 = arith.constant 3 : index
    %c0_142 = arith.constant 0 : index
    %c0_143 = arith.constant 0 : index
    %345 = vector.load %arg18[%c3_141, %c0_142, %c0_143] : memref<4x1x128xf32, #tpu.memory_space<vmem>>, vector<1x1x128xf32>
    %346 = vector.shape_cast %345 : vector<1x1x128xf32> to vector<1x128xf32>
    %347 = vector.broadcast %346 : vector<1x128xf32> to vector<4x128xf32>
    %348 = arith.addf %344, %347 : vector<4x128xf32>
    %c3_144 = arith.constant 3 : index
    %c0_145 = arith.constant 0 : index
    %c0_146 = arith.constant 0 : index
    %349 = vector.load %arg19[%c3_144, %c0_145, %c0_146] : memref<4x4x128xf32, #tpu.memory_space<vmem>>, vector<1x4x128xf32>
    %350 = vector.shape_cast %349 : vector<1x4x128xf32> to vector<4x128xf32>
    %351 = vector.shape_cast %348 : vector<4x128xf32> to vector<1x4x128xf32>
    tpu.vector_store %arg19[%c3_144, %c0_145, %c0_146], %351 {strides = array<i32>} : memref<4x4x128xf32, #tpu.memory_space<vmem>>, vector<1x4x128xf32>,
    return
  }
}

</mosaic_0001>

<bundles_post_ra>
// kernel: decoder_forward.1
= control target key start
LH: loop header
LB: loop body
LE: loop exit
PB: predicated region body
PF: predicated region fallthrough
CT: control target
= control target key end

     0   :  { %v7423_v0 = vmov 0.0   ;;  %vm5364_vm0 = vmmov 0   ;;  %v7421_v3 = vmov 0   ;;  %vm145_vm1 = vcmask 1041409   ;;  %s7397_s2 = inlined_call_operand.vmem [shape: bf16[128,128], index: 2, kind: input, shape index: {}]   ;;  %s7398_s1 = inlined_call_operand.vmem [shape: f32[4,16,128], index: 1, kind: input, shape index: {}]   ;;  %s7399_s11 = inlined_call_operand.vmem [shape: bf16[128,384], index: 11, kind: input, shape index: {}]   ;;  %s7400_s4 = inlined_call_operand.vmem [shape: bf16[128,128], index: 4, kind: input, shape index: {}]   ;;  %s7401_s0 = inlined_call_operand.vmem [shape: bf16[16,128], index: 0, kind: input, shape index: {}]   ;;  %s7402_s6 = inlined_call_operand.vmem [shape: bf16[128,128], index: 6, kind: input, shape index: {}]   ;;  %s7403_s3 = inlined_call_operand.vmem [shape: f32[1,128], index: 3, kind: input, shape index: {}]   ;;  %s7404_s13 = inlined_call_operand.vmem [shape: f32[1,384], index: 13, kind: input, shape index: {}]   ;;  %s7405_s9 = inlined_call_operand.<no memory space> [shape: f32[1,1], index: 9, kind: input, shape index: {}]   ;;  %s7406_s7 = inlined_call_operand.vmem [shape: f32[1,128], index: 7, kind: input, shape index: {}]   ;;  %s7407_s5 = inlined_call_operand.vmem [shape: f32[1,128], index: 5, kind: input, shape index: {}]   ;;  %s7408_s8 = inlined_call_operand.vmem [shape: f32[1,128], index: 8, kind: input, shape index: {}]   ;;  %s7409_s10 = inlined_call_operand.vmem [shape: bf16[128,384], index: 10, kind: input, shape index: {}]   ;;  %s7410_s12 = inlined_call_operand.vmem [shape: bf16[128,384], index: 12, kind: input, shape index: {}]   ;;  %s7411_s14 = inlined_call_operand.vmem [shape: f32[1,384], index: 14, kind: input, shape index: {}]   ;;  %s7412_s15 = inlined_call_operand.vmem [shape: bf16[128,128], index: 15, kind: input, shape index: {}]   ;;  %s7413_s17 = inlined_call_operand.vmem [shape: bf16[4,128,128], index: 17, kind: input, shape index: {}]   ;;  %s7414_s16 = inlined_call_operand.vmem [shape: f32[1,128], index: 16, kind: input, shape index: {}]   ;;  %s7415_s18 = inlined_call_operand.vmem [shape: f32[4,1,128], index: 18, kind: input, shape index: {}]   ;;  %s7416_s19 = inlined_call_operand.vmem [shape: f32[4,4,128], index: 19, kind: output, shape index: {}]  }
   0x1   :  { %7493 = sst [smem:[#allocation42_spill]] %s7397_s2  ;;  %4531 = vmatprep.subr.bf16.mxu0 %v7423_v0  ;;  %4547 = vmatprep.mubr.msk.bf16.mxu0 %vm5364_vm0, %v7423_v0  ;;  %vm147_vm2 = vcmask 1042434   ;;  %vm149_vm3 = vcmask 1043459   ;;  %vm895_vm4 = vcmask 130112   ;;  %vm928_vm5 = vcmask 125952  }
   0x2   :  { %7494 = sst [smem:[#allocation43_spill]] %s7398_s1  ;;  %4939 = vset.pattern.permute.xlu0 %v7421_v3  ;;  %4940 = vset.pattern.permute.xlu1 %v7421_v3  ;;  %vm3552_vm6 = vcmask 1043456  }
   0x3   :  { %7495 = sst [smem:[#allocation44_spill]] %s7399_s11 }
   0x4   :  { %7496 = sst [smem:[#allocation45_spill]] %s7400_s4 }
   0x5   :  { %s7497_s20 = sld [smem:[#allocation42_spill]] }
   0x6   :  { %s7498_s26 = sld [smem:[#allocation43_spill]] }
   0x7   :  { %s7499_s23 = sld [smem:[#allocation45_spill]] }
   0x8   :  { %s7500_s30 = sld [smem:[#allocation44_spill]] }
   0xb   :  { %v4941_v1 = vld [vmem:[%s7497_s20 + $0x38] sm:$0xff]   ;;  %v4942_v2 = vld [vmem:[%s7497_s20 + $0x30] sm:$0xff]   ;;  %v4943_v4 = vld [vmem:[%s7497_s20 + $0x28] sm:$0xff]  }
   0xc   :  { %4532 = vmatpush3.bf16.msra.mxu0 %v4941_v1  ;;  %v4944_v5 = vld [vmem:[%s7497_s20 + $0x20] sm:$0xff]   ;;  %v66_v7 = vld [vmem:[%s7498_s26 + $0x8] sm:$0xff]  ;;  %v5495_v8 = vld [vmem:[%s7498_s26 + $0x10] sm:$0xff] }
   0xd   :  { %4533 = vmatprep.subr.bf16.mxu0 %v7423_v0  ;;  %v65_v6 = vld [vmem:[%s7498_s26] sm:$0xff]  ;;  %v5500_v9 = vld [vmem:[%s7498_s26 + $0x18] sm:$0xff]  ;;  %v5510_v11 = vld [vmem:[%s7498_s26 + $0x28] sm:$0xff] }
   0xe   :  { %v5505_v10 = vld [vmem:[%s7498_s26 + $0x20] sm:$0xff]  ;;  %v77_v12 = vadd.f32 %v66_v7, %v65_v6  ;;  %v73_v13 = vpack.c.bf16 %v66_v7, %v65_v6  ;;  %v5515_v14 = vld [vmem:[%s7498_s26 + $0x30] sm:$0xff]  ;;  %v5520_v15 = vld [vmem:[%s7498_s26 + $0x38] sm:$0xff]  ;;  %v84_v16 = vadd.f32 %v5500_v9, %v5495_v8 }
   0xf   :  { %v91_v17 = vadd.f32 %v5510_v11, %v5505_v10  ;;  %v98_v19 = vadd.f32 %v5520_v15, %v5515_v14  ;;  %v4945_v24 = vld [vmem:[%s7497_s20 + $0x18] sm:$0xff]   ;;  %v4946_v33 = vld [vmem:[%s7497_s20 + $0x10] sm:$0xff]   ;;  %v4947_v40 = vld [vmem:[%s7497_s20 + $0x8] sm:$0xff]  }
  0x10   :  { %4534 = vmatpush3.bf16.msra.mxu0 %v4942_v2  ;;  %v78_v18 = vrot.slane %v77_v12, 4  ;;  %4567 = vmatprep.mubr.bf16.mxu1 %v73_v13  ;;  %v85_v20 = vrot.slane %v84_v16, 4  ;;  %v4973_v43 = vld [vmem:[%s7499_s23 + $0x38] sm:$0xff]   ;;  %v4948_v48 = vld [vmem:[%s7497_s20] sm:$0xff]   ;;  %v4975_v51 = vld [vmem:[%s7499_s23 + $0x30] sm:$0xff]  }
  0x11   :  { %4535 = vmatprep.subr.bf16.mxu0 %v7423_v0  ;;  %v92_v21 = vrot.slane %v91_v17, 4  ;;  %v99_v23 = vrot.slane %v98_v19, 4  ;;  %4551 = vmatprep.subr.bf16.mxu1 %v4973_v43  ;;  %v4977_v54 = vld [vmem:[%s7499_s23 + $0x28] sm:$0xff]   ;;  %v4979_v63 = vld [vmem:[%s7499_s23 + $0x20] sm:$0xff]   ;;  %v4952_v13 = vld [vmem:[%s7500_s30 + $0x90] ss:$12 sps:$4 sm:$0xff]  }
  0x12   :  { %v79_v22 = vadd.f32 %v78_v18, %v77_v12  ;;  %v86_v25 = vadd.f32 %v85_v20, %v84_v16  ;;  %4552 = vmatpush3.bf16.msra.mxu1 %v4973_v43  ;;  %v4951_v59 = vld [vmem:[%s7500_s30 + $0xac] ss:$12 sps:$4 sm:$0xff]   ;;  %v4954_v7 = vld [vmem:[%s7500_s30 + $0x94] ss:$12 sps:$4 sm:$0xff]   ;;  %v4957_v16 = vld [vmem:[%s7500_s30 + $0x7c] ss:$12 sps:$4 sm:$0xff]  }
  0x13   :  { %v93_v26 = vadd.f32 %v92_v21, %v91_v17  ;;  %v100_v28 = vadd.f32 %v99_v23, %v98_v19  ;;  %4553 = vmatprep.subr.bf16.mxu1 %v4975_v51  ;;  %v4981_v12 = vld [vmem:[%s7499_s23 + $0x18] sm:$0xff]   ;;  %v4983_v17 = vld [vmem:[%s7499_s23 + $0x10] sm:$0xff]   ;;  %v4985_v20 = vld [vmem:[%s7499_s23 + $0x8] sm:$0xff]  }
  0x14   :  { %4536 = vmatpush3.bf16.msra.mxu0 %v4943_v4  ;;  %v80_v27 = vrot.slane %v79_v22, 2  ;;  %v87_v29 = vrot.slane %v86_v25, 2  ;;  %v4955_v18 = vld [vmem:[%s7500_s30 + $0x78] ss:$12 sps:$4 sm:$0xff]   ;;  %v4958_v21 = vld [vmem:[%s7500_s30 + $0x60] ss:$12 sps:$4 sm:$0xff]  }
  0x15   :  { %4537 = vmatprep.subr.bf16.mxu0 %v7423_v0  ;;  %v94_v30 = vrot.slane %v93_v26, 2  ;;  %v101_v32 = vrot.slane %v100_v28, 2  ;;  %v4960_v19 = vld [vmem:[%s7500_s30 + $0x64] ss:$12 sps:$4 sm:$0xff]  }
  0x16   :  { %v81_v31 = vadd.f32 %v80_v27, %v79_v22  ;;  %v88_v34 = vadd.f32 %v87_v29, %v86_v25  ;;  %4554 = vmatpush3.bf16.msra.mxu1 %v4975_v51  ;;  %v4963_v22 = vld [vmem:[%s7500_s30 + $0x4c] ss:$12 sps:$4 sm:$0xff]   ;;  %v4987_v23 = vld [vmem:[%s7499_s23] sm:$0xff]   ;;  %v74_v27 = vpack.c.bf16 %v5500_v9, %v5495_v8 }
  0x17   :  { %v95_v35 = vadd.f32 %v94_v30, %v93_v26  ;;  %v102_v37 = vadd.f32 %v101_v32, %v100_v28  ;;  %4555 = vmatprep.subr.bf16.mxu1 %v4977_v54  ;;  %v4966_v25 = vld [vmem:[%s7500_s30 + $0x34] ss:$12 sps:$4 sm:$0xff]   ;;  %v4964_v26 = vld [vmem:[%s7500_s30 + $0x30] ss:$12 sps:$4 sm:$0xff]   ;;  %v4967_v29 = vld [vmem:[%s7500_s30 + $0x18] ss:$12 sps:$4 sm:$0xff]  }
  0x18   :  { %4538 = vmatpush3.bf16.msra.mxu0 %v4944_v5  ;;  %v82_v36 = vrot.slane %v81_v31, 1  ;;  %v89_v38 = vrot.slane %v88_v34, 1  ;;  %v4949_v5 = vld [vmem:[%s7500_s30 + $0xa8] ss:$12 sps:$4 sm:$0xff]   ;;  %v4972_v30 = vld [vmem:[%s7500_s30 + $0x4] ss:$12 sps:$4 sm:$0xff]  }
  0x19   :  { %4539 = vmatprep.subr.bf16.mxu0 %v7423_v0  ;;  %v96_v39 = vrot.slane %v95_v35, 1  ;;  %v103_v42 = vrot.slane %v102_v37, 1  ;;  %v4969_v28 = vld [vmem:[%s7500_s30 + $0x1c] ss:$12 sps:$4 sm:$0xff]   ;;  %v4970_v8 = vld [vmem:[%s7500_s30] ss:$12 sps:$4 sm:$0xff]  }
  0x1a   :  { %v83_v41 = vadd.f32 %v82_v36, %v81_v31  ;;  %v90_v44 = vadd.f32 %v89_v38, %v88_v34  ;;  %4556 = vmatpush3.bf16.msra.mxu1 %v4977_v54  ;;  %v5627_v9 = vld [vmem:[%s7401_s0] sm:$0xff]   ;;  %v4976_v31 = vld [vmem:[%s7402_s6 + $0x38] sm:$0xff]   ;;  %v4978_v32 = vld [vmem:[%s7402_s6 + $0x30] sm:$0xff]  }
  0x1b   :  { %v97_v45 = vadd.f32 %v96_v39, %v95_v35  ;;  %v104_v46 = vadd.f32 %v103_v42, %v102_v37  ;;  %4557 = vmatprep.subr.bf16.mxu1 %v4979_v63  ;;  %v4982_v34 = vld [vmem:[%s7402_s6 + $0x20] sm:$0xff]   ;;  %v4984_v35 = vld [vmem:[%s7402_s6 + $0x18] sm:$0xff]   ;;  %v4986_v36 = vld [vmem:[%s7402_s6 + $0x10] sm:$0xff]   ;;  %v75_v39 = vpack.c.bf16 %v5510_v11, %v5505_v10 }
  0x1c   :  { %4540 = vmatpush3.bf16.msra.mxu0 %v4945_v24  ;;  %v106_v47 = vmul.f32 0.0625, %v83_v41  ;;  %v107_v49 = vmul.f32 0.0625, %v90_v44  ;;  %v4961_v24 = vld [vmem:[%s7500_s30 + $0x48] ss:$12 sps:$4 sm:$0xff]   ;;  %v4989_v38 = vld [vmem:[%s7402_s6] sm:$0xff]  }
  0x1d   :  { %4541 = vmatprep.subr.bf16.mxu0 %v7423_v0  ;;  %v108_v50 = vmul.f32 0.0625, %v97_v45  ;;  %v109_v52 = vmul.f32 0.0625, %v104_v46  ;;  %v4988_v37 = vld [vmem:[%s7402_s6 + $0x8] sm:$0xff]   ;;  %v4139_v41 = vld [vmem:[%s7403_s3] ss:$0 sm:$0xff] }
  0x1e   :  { %v110_v53 = vpack.c.bf16 %v106_v47, %v106_v47  ;;  %v111_v55 = vpack.c.bf16 %v107_v49, %v107_v49  ;;  %4558 = vmatpush3.bf16.msra.mxu1 %v4979_v63  ;;  %v5692_v47 = vld [vmem:[%s7404_s13] sm:$0x7] }
  0x1f   :  { %v112_v56 = vpack.c.bf16 %v108_v50, %v108_v50  ;;  %v113_v57 = vpack.c.bf16 %v109_v52, %v109_v52  ;;  %4559 = vmatprep.subr.bf16.mxu1 %v4981_v12  ;;  %v4182_v63 = vld [vmem:[%s7406_s7] ss:$0 sm:$0xff] }
  0x20   :  { %4542 = vmatpush3.bf16.msra.mxu0 %v4946_v33  ;;  %v141_v58 = vunpack.c.l.b16 %v110_v53  ;;  %v142_v60 = vunpack.c.l.b16 %v111_v55  ;;  %v4980_v33 = vld [vmem:[%s7402_s6 + $0x28] sm:$0xff]   ;;  %v24_v53 = vstv %s7405_s9 }
  0x21   :  { %4543 = vmatprep.subr.bf16.mxu0 %v7423_v0  ;;  %v143_v61 = vunpack.c.l.b16 %v112_v56  ;;  %v144_v62 = vunpack.c.l.b16 %v113_v57  ;;  %25 = vst [vmem:[#allocation2] sm:$0x1] %v24_v53  ;;  %v5366_v57 = vmov 1966171168  }
  0x22   :  { %v146_v1 = vsel %vm145_vm1, %v142_v60, %v141_v58  ;;  %4560 = vmatpush3.bf16.msra.mxu1 %v4981_v12  ;;  %v770_v58 = vunpack.c.l.s4 %v5366_v57  ;;  %v4156_v12 = vld [vmem:[%s7407_s5] ss:$0 sm:$0xff] }
  0x23   :  { %v148_v2 = vsel %vm147_vm2, %v143_v61, %v146_v1  ;;  %4561 = vmatprep.subr.bf16.mxu1 %v4983_v17 }
  0x24   :  { %4544 = vmatpush3.bf16.msra.mxu0 %v4947_v40  ;;  %v150_v4 = vsel %vm149_vm3, %v144_v62, %v148_v2  ;;  %v76_v40 = vpack.c.bf16 %v5520_v15, %v5515_v14  ;;  %v421_v14 = vlaneseq  ;;  %v771_v60 = vunpack.c.0.s8 %v770_v58 }
  0x25   :  { %4545 = vmatprep.subr.bf16.mxu0 %v7423_v0  ;;  %v151_v6 = vpack.c.b16 %v150_v4, %v150_v4 }
  0x26   :  { %4562 = vmatpush3.bf16.msra.mxu1 %v4983_v17  ;;  %v5684_v15 = vshrl.u32 %v421_v14, 7 }
  0x27   :  { %4563 = vmatprep.subr.bf16.mxu1 %v4985_v20 }
  0x28   :  { %4546 = vmatpush3.bf16.msra.mxu0 %v4948_v48  ;;  %v5687_v46 = vsub.s32 0, %v5684_v15  ;;  %v5714_v1 = vsub.s32 %v771_v60, %v5684_v15 }
  0x29   :  { %570 = vmatprep.subr.bf16.mxu0 %v4951_v59 }
  0x2a   :  { %4564 = vmatpush3.bf16.msra.mxu1 %v4985_v20  ;;  %v5698_v49 = vrot.slane %v5692_v47, %v5687_v46  ;;  %7503 = vst [vmem:[#allocation5_spill] sm:$0xff] %v5714_v1 }
  0x2b   :  { %4548 = vmatmul.mubr.bf16.vlgmr.msra.gmra.mxu0 %v151_v6  ;;  %4565 = vmatprep.subr.bf16.mxu1 %v4987_v23 }
  0x2c   :  { %571 = vmatpush1.bf16.msra.mxu0 %v4949_v5  ;;  %602 = vmatprep.mubr.bf16.mxu0 %v7421_v3 }
  0x2d   :  { %572 = vmatprep.subr.bf16.mxu0 %v4954_v7 }
  0x2e   :  { %4566 = vmatpush3.bf16.msra.mxu1 %v4987_v23 }
  0x2f   :  { %4575 = vmatprep.subr.bf16.mxu1 %v7423_v0 }
  0x30   :  { %573 = vmatpush1.bf16.msra.mxu0 %v4952_v13 }
  0x31   :  { %574 = vmatprep.subr.bf16.mxu0 %v4957_v16  ;;  %4568 = vmatmul.mubr.bf16.vlgmr.msra.gmra.mxu1 %v74_v27 }
  0x32   :  { %4571 = vmatprep.mubr.bf16.mxu1 %v75_v39 }
  0x34   :  { %575 = vmatpush1.bf16.msra.mxu0 %v4955_v18 }
  0x35   :  { %576 = vmatprep.subr.bf16.mxu0 %v4960_v19 }
  0x38   :  { %577 = vmatpush1.bf16.msra.mxu0 %v4958_v21 }
  0x39   :  { %578 = vmatprep.subr.bf16.mxu0 %v4963_v22  ;;  %4572 = vmatmul.mubr.bf16.gmra.mxu1 %v76_v40 }
  0x3a   :  { %4591 = vmatprep.mubr.msk.bf16.mxu1 %vm5364_vm0, %v7423_v0 }
  0x3c   :  { %579 = vmatpush1.bf16.msra.mxu0 %v4961_v24 }
  0x3d   :  { %580 = vmatprep.subr.bf16.mxu0 %v4966_v25 }
  0x40   :  { %581 = vmatpush1.bf16.msra.mxu0 %v4964_v26 }
  0x41   :  { %582 = vmatprep.subr.bf16.mxu0 %v4969_v28 }
  0x44   :  { %583 = vmatpush1.bf16.msra.mxu0 %v4967_v29 }
  0x45   :  { %584 = vmatprep.subr.bf16.mxu0 %v4972_v30 }
  0x48   :  { %585 = vmatpush1.bf16.msra.mxu0 %v4970_v8 }
  0x49   :  { %4595 = vmatprep.subr.bf16.mxu0 %v7423_v0 }
  0x4b   :  { %603 = vmatmul.mubr.bf16.vlgmr.msra.gmra.mxu0 %v5627_v9 }
  0x4c   :  { %4596 = vmatpush3.bf16.msra.mxu0 %v4976_v31  ;;  %4611 = vmatprep.mubr.msk.bf16.mxu0 %vm5364_vm0, %v7423_v0 }
  0x4d   :  { %4597 = vmatprep.subr.bf16.mxu0 %v7423_v0 }
  0x50   :  { %4598 = vmatpush3.bf16.msra.mxu0 %v4978_v32 }
  0x51   :  { %4599 = vmatprep.subr.bf16.mxu0 %v7423_v0 }
  0x54   :  { %4600 = vmatpush3.bf16.msra.mxu0 %v4980_v33 }
  0x55   :  { %4601 = vmatprep.subr.bf16.mxu0 %v7423_v0 }
  0x58   :  { %4602 = vmatpush3.bf16.msra.mxu0 %v4982_v34 }
  0x59   :  { %4603 = vmatprep.subr.bf16.mxu0 %v7423_v0 }
  0x5c   :  { %4604 = vmatpush3.bf16.msra.mxu0 %v4984_v35 }
  0x5d   :  { %4605 = vmatprep.subr.bf16.mxu0 %v7423_v0 }
  0x60   :  { %4606 = vmatpush3.bf16.msra.mxu0 %v4986_v36 }
  0x61   :  { %4607 = vmatprep.subr.bf16.mxu0 %v7423_v0 }
  0x64   :  { %4608 = vmatpush3.bf16.msra.mxu0 %v4988_v37 }
  0x65   :  { %4609 = vmatprep.subr.bf16.mxu0 %v7423_v0 }
  0x68   :  { %4610 = vmatpush3.bf16.msra.mxu0 %v4989_v38 }
  0x69   :  { %4615 = vmatprep.subr.bf16.mxu0 %v7423_v0 }
  0xeb   :  { %v235_v42 = vpop.f32.mrf.mxu0 }
  0xec   :  { %v5674_v43 = vadd.f32 %v4139_v41, %v235_v42 }
  0xed   :  { %v4549_v44 = vpop.f32.mrf.mxu0 }
  0xee   :  { %v5678_v45 = vpack.c.bf16 %v5674_v43, %v5674_v43  ;;  %v4191_v44 = vld [vmem:[%s7408_s8] ss:$0 sm:$0xff] }
  0xef   :  { %v238_v10 = vpop.f32.mrf.mxu0 }
  0xf0   :  { %4612 = vmatmul.mubr.bf16.vlgmr.msra.gmra.mxu0 %v5678_v45 }
  0xf1   :  { %v4550_v11 = vpop.f32.mrf.mxu0  ;;  %4631 = vmatprep.mubr.msk.bf16.mxu0 %vm5364_vm0, %v7423_v0  ;;  %v4569_v54 = vpop.f32.mrf.mxu1 }
  0xf2   :  { %v5725_v24 = vadd.f32 %v4569_v54, %v4156_v12 }
  0xf3   :  { %v339_v55 = vpop.f32.mrf.mxu1 }
  0xf4   :  { %v5721_v20 = vadd.f32 %v4156_v12, %v339_v55  ;;  %7505 = vst [vmem:[#allocation7_spill] sm:$0xff] %v5725_v24 }
  0xf5   :  { %v4570_v56 = vpop.f32.mrf.mxu1 }
  0xf6   :  { %7504 = vst [vmem:[#allocation6_spill] sm:$0xff] %v5721_v20  ;;  %v5727_v25 = vadd.f32 %v4570_v56, %v4156_v12 }
  0xf7   :  { %v342_v59 = vpop.f32.mrf.mxu1 }
  0xf8   :  { %7506 = vst [vmem:[#allocation8_spill] sm:$0xff] %v5727_v25  ;;  %v5729_v26 = vadd.f32 %v4156_v12, %v342_v59 }
  0xf9   :  { %v4573_v61 = vpop.f32.mrf.mxu1 }
  0xfa   :  { %7507 = vst [vmem:[#allocation9_spill] sm:$0xff] %v5729_v26  ;;  %v5741_v36 = vadd.f32 %v4573_v61, %v4156_v12 }
  0xfb   :  { %v355_v4 = vpop.f32.mrf.mxu1 }
  0xfc   :  { %v5731_v27 = vadd.f32 %v4156_v12, %v355_v4  ;;  %7510 = vst [vmem:[#allocation12_spill] sm:$0xff] %v5741_v36 }
  0xfd   :  { %v4574_v16 = vpop.f32.mrf.mxu1 }
  0xfe   :  { %7508 = vst [vmem:[#allocation10_spill] sm:$0xff] %v5731_v27  ;;  %v5745_v39 = vadd.f32 %v4574_v16, %v4156_v12 }
  0xff   :  { %v358_v28 = vpop.f32.mrf.mxu1 }
 0x100   :  { %v5739_v35 = vadd.f32 %v4156_v12, %v358_v28  ;;  %7511 = vst [vmem:[#allocation13_spill] sm:$0xff] %v5745_v39 }
 0x102   :  { %7509 = vst [vmem:[#allocation11_spill] sm:$0xff] %v5739_v35 }
 0x10b   :  { %v5694_v48 = vpop.f32.mrf.mxu0 }
 0x10d   :  { %v5700_v50 = vpop.f32.mrf.mxu0 }
 0x10f   :  { %v608_v51 = vpop.f32.mrf.mxu0 }
 0x110   :  { %v5703_v52 = vadd.f32 %v608_v51, %v5698_v49 }
 0x111   :  { %v5708_v62 = vpop.f32.mrf.mxu0 }
 0x112   :  { %7501 = vst [vmem:[#allocation3_spill] sm:$0xff] %v5703_v52  ;;  %7502 = vst [vmem:[#allocation4_spill] sm:$0xff] %v5708_v62  ;;  %v6069_v52 = vld [vmem:[%s7498_s26 + $0x20] sm:$0xff] }
 0x113   :  { %7520 = vst [vmem:[#allocation22_spill] sm:$0xff] %v6069_v52 }
 0x1b0   :  { %v762_v2 = vpop.f32.mrf.mxu0 }
 0x1b1   :  { %v763_v5 = vadd.f32 %v4182_v63, %v762_v2 }
 0x1b2   :  { %v4613_v6 = vpop.f32.mrf.mxu0 }
 0x1b3   :  { %v775_v7 = vrot.slane %v763_v5, %v5714_v1  ;;  %v4192_v6 = vld [vmem:[#allocation2] ss:$0 sm:$0xff] }
 0x1b4   :  { %v765_v13 = vpop.f32.mrf.mxu0 }
 0x1b5   :  { %v776_v17 = vcombine.high %v775_v7, %v775_v7  ;;  %v783_v18 = vrot.slane %v775_v7, %v5714_v1 }
 0x1b6   :  { %v4614_v19 = vpop.f32.mrf.mxu0 }
 0x1b7   :  { %v790_v21 = vrot.slane %v776_v17, %v5714_v1  ;;  %v791_v22 = vcombine.high %v783_v18, %v783_v18  ;;  %v796_v23 = vrot.slane %v783_v18, %v5687_v46  ;;  %v885_v18 = vand.u32 127, %v421_v14 }
 0x1b9   :  { %v792_v29 = vcombine.high %v790_v21, %v790_v21  ;;  %v800_v30 = vrot.slane %v790_v21, %v5687_v46  ;;  %v804_v8 = vrot.slane %v791_v22, %v5687_v46  ;;  %v813_v31 = vadd.f32 %v796_v23, %v5721_v20 }
 0x1ba   :  { %v814_v32 = vadd.f32 %v796_v23, %v5729_v26  ;;  %v890_v19 = vadd.s32 4294967288, %v885_v18  ;;  %v5755_v23 = vsub.s32 %v885_v18, %v5684_v15  ;;  %v5796_v18 = vsub.s32 2, %v5684_v15 }
 0x1bb   :  { %v815_v33 = vadd.f32 %v800_v30, %v5725_v24  ;;  %v816_v34 = vadd.f32 %v800_v30, %v5727_v25  ;;  %5102 = vtanh.f32 %v813_v31  ;;  %v808_v37 = vrot.slane %v792_v29, %v5687_v46 }
 0x1bc   :  { %5104 = vtanh.f32 %v814_v32  ;;  %v817_v38 = vadd.f32 %v804_v8, %v5731_v27  ;;  %v818_v40 = vadd.f32 %v804_v8, %v5739_v35  ;;  %7512 = vst [vmem:[#allocation14_spill] sm:$0xff] %v5755_v23  ;;  %v5758_v28 = vsub.s32 %v890_v19, %v5684_v15 }
 0x1bd   :  { %5106 = vtanh.f32 %v815_v33  ;;  %v819_v41 = vadd.f32 %v808_v37, %v5741_v36  ;;  %v820_v42 = vadd.f32 %v808_v37, %v5745_v39 }
 0x1be   :  { %5108 = vtanh.f32 %v816_v34  ;;  %7513 = vst [vmem:[#allocation15_spill] sm:$0xff] %v5758_v28 }
 0x1bf   :  { %5110 = vtanh.f32 %v817_v38 }
 0x1c0   :  { %5112 = vtanh.f32 %v818_v40 }
 0x1c1   :  { %5114 = vtanh.f32 %v819_v41 }
 0x1c2   :  { %5116 = vtanh.f32 %v820_v42 }
 0x1c8   :  { %v5103_v10 = vpop.eup %5102 }
 0x1c9   :  { %v5105_v11 = vpop.eup %5104  ;;  %v835_v51 = vmul.f32 %v5103_v10, %v4191_v44 }
 0x1ca   :  { %v5107_v53 = vpop.eup %5106  ;;  %v836_v56 = vmul.f32 %v5105_v11, %v4191_v44 }
 0x1cb   :  { %843 = vadd.xlane.f32.xlu0 %v835_v51  ;;  %v837_v54 = vmul.f32 %v5107_v53, %v4191_v44  ;;  %v5109_v55 = vpop.eup %5108 }
 0x1cc   :  { %v5111_v57 = vpop.eup %5110  ;;  %v838_v58 = vmul.f32 %v5109_v55, %v4191_v44 }
 0x1cd   :  { %847 = vadd.xlane.f32.xlu1 %v837_v54  ;;  %v5113_v59 = vpop.eup %5112  ;;  %v839_v60 = vmul.f32 %v5111_v57, %v4191_v44 }
 0x1ce   :  { %v5115_v61 = vpop.eup %5114  ;;  %v840_v63 = vmul.f32 %v5113_v59, %v4191_v44 }
 0x1cf   :  { %845 = vadd.xlane.f32.xlu0 %v836_v56  ;;  %v5117_v2 = vpop.eup %5116  ;;  %v841_v4 = vmul.f32 %v5115_v61, %v4191_v44 }
 0x1d0   :  { %v842_v5 = vmul.f32 %v5117_v2, %v4191_v44 }
 0x1d1   :  { %849 = vadd.xlane.f32.xlu1 %v838_v58 }
 0x1d3   :  { %851 = vadd.xlane.f32.xlu0 %v839_v60 }
 0x1d5   :  { %853 = vadd.xlane.f32.xlu1 %v840_v63  ;;  %v5787_v63 = vsub.s32 3, %v5684_v15 }
 0x1d7   :  { %855 = vadd.xlane.f32.xlu0 %v841_v4  ;;  %7515 = vst [vmem:[#allocation17_spill] sm:$0xff] %v5787_v63  ;;  %v5790_v4 = vsub.s32 1, %v5684_v15 }
 0x1d9   :  { %857 = vadd.xlane.f32.xlu1 %v842_v5 }
 0x1ed   :  { %865 = vperm.xlu0 %4939, %v4192_v6  }
 0x254   :  { %v844_v7 = vpop.xlane.xlu0 %843 }
 0x256   :  { %v848_v12 = vpop.xlane.xlu1 %847 }
 0x258   :  { %v846_v13 = vpop.xlane.xlu0 %845 }
 0x25a   :  { %v850_v16 = vpop.xlane.xlu1 %849 }
 0x25c   :  { %v852_v17 = vpop.xlane.xlu0 %851 }
 0x25e   :  { %v854_v21 = vpop.xlane.xlu1 %853 }
 0x260   :  { %v856_v22 = vpop.xlane.xlu0 %855 }
 0x262   :  { %v858_v30 = vpop.xlane.xlu1 %857 }
 0x268   :  { %v5760_v29 = vpop.permute.xlu0 %865 }
 0x269   :  { %7514 = vst [vmem:[#allocation16_spill] sm:$0xff] %v5760_v29  ;;  %v868_v8 = vadd.f32 %v5760_v29, %v844_v7  ;;  %v869_v31 = vadd.f32 %v5760_v29, %v846_v13  ;;  %v870_v32 = vadd.f32 %v5760_v29, %v848_v12  ;;  %v871_v14 = vadd.f32 %v5760_v29, %v850_v16 }
 0x26a   :  { %v872_v33 = vadd.f32 %v5760_v29, %v852_v17  ;;  %v873_v34 = vadd.f32 %v5760_v29, %v854_v21  ;;  %v874_v37 = vadd.f32 %v5760_v29, %v856_v22  ;;  %v875_v38 = vadd.f32 %v5760_v29, %v858_v30 }
 0x26b   :  { %v889_v40 = vrot.slane %v868_v8, %v5755_v23  ;;  %v894_v41 = vrot.slane %v869_v31, %v5758_v28  ;;  %v900_v42 = vrot.slane %v870_v32, %v5755_v23  ;;  %v904_v44 = vrot.slane %v871_v14, %v5758_v28 }
 0x26c   :  { %v909_v10 = vrot.slane %v872_v33, %v5755_v23  ;;  %v913_v11 = vrot.slane %v873_v34, %v5758_v28  ;;  %v918_v51 = vrot.slane %v874_v37, %v5755_v23  ;;  %v922_v53 = vrot.slane %v875_v38, %v5758_v28 }
 0x26d   :  { %v896_v54 = vsel %vm895_vm4, %v894_v41, %v889_v40  ;;  %v905_v55 = vsel %vm895_vm4, %v904_v44, %v900_v42 }
 0x26e   :  { %v914_v56 = vsel %vm895_vm4, %v913_v11, %v909_v10  ;;  %v924_v57 = vsel %vm145_vm1, %v905_v55, %v896_v54  ;;  %v923_v58 = vsel %vm895_vm4, %v922_v53, %v918_v51 }
 0x26f   :  { %v925_v59 = vsel %vm147_vm2, %v914_v56, %v924_v57 }
 0x270   :  { %v926_v60 = vsel %vm149_vm3, %v923_v58, %v925_v59 }
 0x271   :  { %v929_v61 = vsel %vm928_vm5, %v926_v60, -inf }
 0x272   :  { %930 = vmax.xlane.f32.xlu1 %v929_v61 }
 0x2fb   :  { %v931_v2 = vpop.xlane.xlu1 %930 }
 0x2fc   :  { %v936_v5 = vrot.slane %v931_v2, %v5687_v46  ;;  %v948_v6 = vrot.slane %v931_v2, %v5787_v63  ;;  %v940_v7 = vrot.slane %v931_v2, %v5790_v4  ;;  %v944_v30 = vrot.slane %v931_v2, %v5796_v18 }
 0x2fe   :  { %v953_v12 = vsub.f32 %v868_v8, %v936_v5  ;;  %v954_v13 = vsub.f32 %v869_v31, %v936_v5  ;;  %v960_v17 = vsub.f32 %v875_v38, %v948_v6  ;;  %v955_v19 = vsub.f32 %v870_v32, %v940_v7 }
 0x2ff   :  { %v956_v40 = vsub.f32 %v871_v14, %v940_v7  ;;  %v957_v42 = vsub.f32 %v872_v33, %v944_v30  ;;  %v958_v8 = vsub.f32 %v873_v34, %v944_v30  ;;  %v959_v15 = vsub.f32 %v874_v37, %v948_v6 }
 0x300   :  { %v961_v16 = vmul.f32 1.442695, %v953_v12  ;;  %v963_v21 = vmul.f32 1.442695, %v954_v13  ;;  %v975_v22 = vmul.f32 1.442695, %v960_v17 }
 0x301   :  { %v965_v41 = vmul.f32 1.442695, %v955_v19  ;;  %v967_v44 = vmul.f32 1.442695, %v956_v40  ;;  %v969_v31 = vmul.f32 1.442695, %v957_v42 }
 0x302   :  { %5118 = vpow2.f32 %v961_v16  ;;  %v971_v32 = vmul.f32 1.442695, %v958_v8  ;;  %v973_v33 = vmul.f32 1.442695, %v959_v15  ;;  %v4990_v8 = vld [vmem:[%s7500_s30 + $0xb0] ss:$12 sps:$4 sm:$0xff]  }
 0x303   :  { %5120 = vpow2.f32 %v963_v21  ;;  %4576 = vmatpush3.bf16.msra.mxu1 %v4990_v8  ;;  %v4992_v15 = vld [vmem:[%s7500_s30 + $0x80] ss:$12 sps:$4 sm:$0xff]   ;;  %v5987_v8 = vld [vmem:[%s7409_s10 + $0x30] ss:$12 sps:$4 sm:$0xff]  }
 0x304   :  { %5122 = vpow2.f32 %v975_v22  ;;  %4577 = vmatprep.subr.bf16.mxu1 %v7423_v0 }
 0x305   :  { %5124 = vpow2.f32 %v965_v41 }
 0x306   :  { %5126 = vpow2.f32 %v967_v44 }
 0x307   :  { %5128 = vpow2.f32 %v969_v31  ;;  %v4991_v31 = vld [vmem:[%s7500_s30 + $0x98] ss:$12 sps:$4 sm:$0xff]  }
 0x308   :  { %5130 = vpow2.f32 %v971_v32  ;;  %4578 = vmatpush3.bf16.msra.mxu1 %v4991_v31  ;;  %v4993_v32 = vld [vmem:[%s7500_s30 + $0x68] ss:$12 sps:$4 sm:$0xff]   ;;  %v5992_v31 = vld [vmem:[%s7409_s10 + $0x38] ss:$12 sps:$4 sm:$0xff]  }
 0x309   :  { %5132 = vpow2.f32 %v973_v33  ;;  %4579 = vmatprep.subr.bf16.mxu1 %v7423_v0  ;;  %v4994_v33 = vld [vmem:[%s7500_s30 + $0x50] ss:$12 sps:$4 sm:$0xff]  }
 0x30c   :  { %4580 = vmatpush3.bf16.msra.mxu1 %v4992_v15  ;;  %v5999_v15 = vld [vmem:[%s7409_s10 + $0x1c] ss:$12 sps:$4 sm:$0xff]  }
 0x30d   :  { %4581 = vmatprep.subr.bf16.mxu1 %v7423_v0 }
 0x30f   :  { %v5799_v38 = vpop.eup %5118 }
 0x310   :  { %986 = vperm.xlu1 %4940, %v5799_v38   ;;  %v5802_v10 = vpop.eup %5120  ;;  %4582 = vmatpush3.bf16.msra.mxu1 %v4993_v32  ;;  %v6004_v32 = vld [vmem:[%s7409_s10 + $0x18] ss:$12 sps:$4 sm:$0xff]  }
 0x311   :  { %v5805_v14 = vpop.eup %5122  ;;  %4583 = vmatprep.subr.bf16.mxu1 %v7423_v0 }
 0x312   :  { %v5807_v11 = vpop.eup %5124  ;;  %1007 = vperm.xlu0 %4939, %v5805_v14  }
 0x313   :  { %v5811_v34 = vpop.eup %5126 }
 0x314   :  { %989 = vperm.xlu1 %4940, %v5802_v10   ;;  %v5814_v37 = vpop.eup %5128  ;;  %4584 = vmatpush3.bf16.msra.mxu1 %v4994_v33  ;;  %v6010_v33 = vld [vmem:[%s7409_s10 + $0x20] ss:$12 sps:$4 sm:$0xff]  }
 0x315   :  { %v5817_v51 = vpop.eup %5130  ;;  %4585 = vmatprep.subr.bf16.mxu1 %v7423_v0 }
 0x316   :  { %v5820_v53 = vpop.eup %5132 }
 0x318   :  { %992 = vperm.xlu1 %4940, %v5807_v11  }
 0x31c   :  { %995 = vperm.xlu1 %4940, %v5811_v34  }
 0x320   :  { %998 = vperm.xlu1 %4940, %v5814_v37  }
 0x324   :  { %1001 = vperm.xlu1 %4940, %v5817_v51  }
 0x328   :  { %1004 = vperm.xlu1 %4940, %v5820_v53  }
 0x38b   :  { %v987_v54 = vpop.permute.xlu1 %986 }
 0x38c   :  { %v1012_v12 = vrot.slane %v987_v54, %v5755_v23 }
 0x38d   :  { %v1008_v6 = vpop.permute.xlu0 %1007 }
 0x38e   :  { %v1043_v19 = vrot.slane %v1008_v6, %v5758_v28 }
 0x38f   :  { %v990_v55 = vpop.permute.xlu1 %989 }
 0x390   :  { %v1016_v61 = vrot.slane %v990_v55, %v5758_v28 }
 0x392   :  { %v1017_v21 = vsel %vm895_vm4, %v1016_v61, %v1012_v12  ;;  %v5890_v12 = vld [vmem:[%s7409_s10 + $0xa8] ss:$12 sps:$4 sm:$0xff]  }
 0x393   :  { %v993_v56 = vpop.permute.xlu1 %992 }
 0x394   :  { %v1021_v2 = vrot.slane %v993_v56, %v5755_v23 }
 0x397   :  { %v996_v57 = vpop.permute.xlu1 %995 }
 0x398   :  { %v1025_v59 = vrot.slane %v996_v57, %v5758_v28  ;;  %v4995_v57 = vld [vmem:[%s7500_s30 + $0x38] ss:$12 sps:$4 sm:$0xff]  }
 0x399   :  { %4586 = vmatpush3.bf16.msra.mxu1 %v4995_v57  ;;  %v6035_v57 = vld [vmem:[%s7410_s12 + $0xac] ss:$12 sps:$4 sm:$0xff]  }
 0x39a   :  { %v1026_v13 = vsel %vm895_vm4, %v1025_v59, %v1021_v2  ;;  %4587 = vmatprep.subr.bf16.mxu1 %v7423_v0  ;;  %v4996_v2 = vld [vmem:[%s7500_s30 + $0x20] ss:$12 sps:$4 sm:$0xff]  }
 0x39b   :  { %v999_v58 = vpop.permute.xlu1 %998  ;;  %v1045_v30 = vsel %vm145_vm1, %v1026_v13, %v1017_v21  ;;  %v5910_v13 = vld [vmem:[%s7409_s10 + $0x90] ss:$12 sps:$4 sm:$0xff]  }
 0x39c   :  { %v1030_v7 = vrot.slane %v999_v58, %v5755_v23  ;;  %v5943_v21 = vld [vmem:[%s7409_s10 + $0x64] ss:$12 sps:$4 sm:$0xff]  }
 0x39d   :  { %4588 = vmatpush3.bf16.msra.mxu1 %v4996_v2 }
 0x39e   :  { %4589 = vmatprep.subr.bf16.mxu1 %v7423_v0 }
 0x39f   :  { %v1002_v60 = vpop.permute.xlu1 %1001 }
 0x3a0   :  { %v1034_v5 = vrot.slane %v1002_v60, %v5758_v28 }
 0x3a2   :  { %v1035_v16 = vsel %vm895_vm4, %v1034_v5, %v1030_v7  ;;  %v5885_v7 = vld [vmem:[%s7409_s10 + $0xac] ss:$12 sps:$4 sm:$0xff]  }
 0x3a3   :  { %v1005_v17 = vpop.permute.xlu1 %1004  ;;  %v1046_v41 = vsel %vm147_vm2, %v1035_v16, %v1045_v30  ;;  %v5954_v30 = vld [vmem:[%s7409_s10 + $0x68] ss:$12 sps:$4 sm:$0xff]  }
 0x3a4   :  { %v1039_v22 = vrot.slane %v1005_v17, %v5755_v23  ;;  %v5924_v17 = vld [vmem:[%s7409_s10 + $0x7c] ss:$12 sps:$4 sm:$0xff]  }
 0x3a6   :  { %v1044_v40 = vsel %vm895_vm4, %v1043_v19, %v1039_v22  ;;  %v5930_v19 = vld [vmem:[%s7409_s10 + $0x78] ss:$12 sps:$4 sm:$0xff]   ;;  %v5949_v22 = vld [vmem:[%s7409_s10 + $0x60] ss:$12 sps:$4 sm:$0xff]  }
 0x3a7   :  { %v1047_v42 = vsel %vm149_vm3, %v1044_v40, %v1046_v41  ;;  %v5962_v40 = vld [vmem:[%s7409_s10 + $0x4c] ss:$12 sps:$4 sm:$0xff]   ;;  %v5968_v41 = vld [vmem:[%s7409_s10 + $0x48] ss:$12 sps:$4 sm:$0xff]  }
 0x3a8   :  { %v1049_v44 = vsel %vm928_vm5, %v1047_v42, 0.0  ;;  %v5973_v42 = vld [vmem:[%s7409_s10 + $0x50] ss:$12 sps:$4 sm:$0xff]  }
 0x3a9   :  { %1050 = vadd.xlane.f32.xlu1 %v1049_v44  ;;  %v5981_v44 = vld [vmem:[%s7409_s10 + $0x34] ss:$12 sps:$4 sm:$0xff]  }
 0x432   :  { %v1051_v54 = vpop.xlane.xlu1 %1050 }
 0x433   :  { %5134 = vrcp.f32 %v1051_v54  ;;  %v6015_v54 = vld [vmem:[%s7409_s10 + $0x4] ss:$12 sps:$4 sm:$0xff]  }
 0x440   :  { %v5135_v55 = vpop.eup %5134 }
 0x441   :  { %v1057_v56 = vrot.slane %v5135_v55, %v5687_v46  ;;  %v1061_v60 = vrot.slane %v5135_v55, %v5790_v4 }
 0x443   :  { %v1074_v58 = vmul.f32 %v5799_v38, %v1057_v56  ;;  %v1075_v59 = vmul.f32 %v5802_v10, %v1057_v56  ;;  %v1076_v61 = vmul.f32 %v5807_v11, %v1061_v60  ;;  %v1077_v5 = vmul.f32 %v5811_v34, %v1061_v60  ;;  %v4997_v10 = vld [vmem:[%s7500_s30 + $0x8] ss:$12 sps:$4 sm:$0xff]  }
 0x444   :  { %v1065_v38 = vrot.slane %v5135_v55, %v5796_v18  ;;  %4590 = vmatpush3.bf16.msra.mxu1 %v4997_v10  ;;  %v1069_v34 = vrot.slane %v5135_v55, %v5787_v63  ;;  %v6022_v55 = vld [vmem:[%s7409_s10] ss:$12 sps:$4 sm:$0xff]   ;;  %v6027_v56 = vld [vmem:[%s7409_s10 + $0x8] ss:$12 sps:$4 sm:$0xff]  }
 0x445   :  { %1084 = vperm.xlu0 %4939, %v1074_v58   ;;  %1335 = vmatprep.subr.bf16.mxu1 %v5885_v7 }
 0x446   :  { %v1078_v11 = vmul.f32 %v5814_v37, %v1065_v38  ;;  %v1079_v6 = vmul.f32 %v5817_v51, %v1065_v38  ;;  %v1080_v37 = vmul.f32 %v5820_v53, %v1069_v34  ;;  %v5904_v51 = vld [vmem:[%s7409_s10 + $0x94] ss:$12 sps:$4 sm:$0xff]   ;;  %v5915_v53 = vld [vmem:[%s7409_s10 + $0x98] ss:$12 sps:$4 sm:$0xff]   ;;  %v1081_v16 = vmul.f32 %v5805_v14, %v1069_v34 }
 0x447   :  { %4592 = vmatmul.mubr.bf16.vlgmr.msra.gmra.mxu1 %v5627_v9  ;;  %v5896_v9 = vld [vmem:[%s7409_s10 + $0xb0] ss:$12 sps:$4 sm:$0xff]   ;;  %v5935_v14 = vld [vmem:[%s7409_s10 + $0x80] ss:$12 sps:$4 sm:$0xff]  }
 0x448   :  { %1367 = vmatprep.mubr.bf16.mxu1 %v7421_v3  ;;  %1336 = vmatpush1.bf16.msra.mxu1 %v5890_v12 }
 0x449   :  { %1089 = vperm.xlu0 %4939, %v1075_v59   ;;  %4616 = vmatpush3.bf16.msra.mxu0 %v5896_v9 }
 0x44a   :  { %4617 = vmatprep.subr.bf16.mxu0 %v7423_v0  ;;  %1337 = vmatprep.subr.bf16.mxu1 %v5904_v51 }
 0x44c   :  { %1338 = vmatpush1.bf16.msra.mxu1 %v5910_v13 }
 0x44d   :  { %1094 = vperm.xlu0 %4939, %v1076_v61   ;;  %4618 = vmatpush3.bf16.msra.mxu0 %v5915_v53  ;;  %v6045_v61 = vld [vmem:[%s7498_s26 + $0x8] sm:$0xff] }
 0x44e   :  { %4619 = vmatprep.subr.bf16.mxu0 %v7423_v0  ;;  %1339 = vmatprep.subr.bf16.mxu1 %v5924_v17  ;;  %7516 = vst [vmem:[#allocation18_spill] sm:$0xff] %v6045_v61 }
 0x450   :  { %1340 = vmatpush1.bf16.msra.mxu1 %v5930_v19 }
 0x451   :  { %1099 = vperm.xlu0 %4939, %v1077_v5   ;;  %4620 = vmatpush3.bf16.msra.mxu0 %v5935_v14  ;;  %v6051_v5 = vld [vmem:[%s7498_s26] sm:$0xff] }
 0x452   :  { %4621 = vmatprep.subr.bf16.mxu0 %v7423_v0  ;;  %1341 = vmatprep.subr.bf16.mxu1 %v5943_v21  ;;  %7517 = vst [vmem:[#allocation19_spill] sm:$0xff] %v6051_v5 }
 0x454   :  { %1342 = vmatpush1.bf16.msra.mxu1 %v5949_v22 }
 0x455   :  { %1104 = vperm.xlu0 %4939, %v1078_v11   ;;  %4622 = vmatpush3.bf16.msra.mxu0 %v5954_v30 }
 0x456   :  { %4623 = vmatprep.subr.bf16.mxu0 %v7423_v0  ;;  %1343 = vmatprep.subr.bf16.mxu1 %v5962_v40 }
 0x458   :  { %1344 = vmatpush1.bf16.msra.mxu1 %v5968_v41 }
 0x459   :  { %1109 = vperm.xlu0 %4939, %v1079_v6   ;;  %4624 = vmatpush3.bf16.msra.mxu0 %v5973_v42  ;;  %v6057_v6 = vld [vmem:[%s7498_s26 + $0x10] sm:$0xff] }
 0x45a   :  { %4625 = vmatprep.subr.bf16.mxu0 %v7423_v0  ;;  %1345 = vmatprep.subr.bf16.mxu1 %v5981_v44  ;;  %7518 = vst [vmem:[#allocation20_spill] sm:$0xff] %v6057_v6 }
 0x45c   :  { %1346 = vmatpush1.bf16.msra.mxu1 %v5987_v8 }
 0x45d   :  { %1114 = vperm.xlu0 %4939, %v1080_v37   ;;  %4626 = vmatpush3.bf16.msra.mxu0 %v5992_v31  ;;  %v6063_v37 = vld [vmem:[%s7498_s26 + $0x18] sm:$0xff] }
 0x45e   :  { %1347 = vmatprep.subr.bf16.mxu1 %v5999_v15  ;;  %4627 = vmatprep.subr.bf16.mxu0 %v7423_v0  ;;  %7519 = vst [vmem:[#allocation21_spill] sm:$0xff] %v6063_v37 }
 0x460   :  { %1348 = vmatpush1.bf16.msra.mxu1 %v6004_v32 }
 0x461   :  { %1119 = vperm.xlu0 %4939, %v1081_v16   ;;  %4628 = vmatpush3.bf16.msra.mxu0 %v6010_v33 }
 0x462   :  { %1349 = vmatprep.subr.bf16.mxu1 %v6015_v54  ;;  %4629 = vmatprep.subr.bf16.mxu0 %v7423_v0 }
 0x464   :  { %1350 = vmatpush1.bf16.msra.mxu1 %v6022_v55 }
 0x465   :  { %4630 = vmatpush3.bf16.msra.mxu0 %v6027_v56  ;;  %1593 = vmatprep.subr.bf16.mxu1 %v6035_v57 }
 0x466   :  { %4635 = vmatprep.subr.bf16.mxu0 %v7423_v0 }
 0x4c0   :  { %v1085_v58 = vpop.permute.xlu0 %1084 }
 0x4c1   :  { %v1122_v38 = vmul.f32 %v6051_v5, %v1085_v58 }
 0x4c4   :  { %v1090_v59 = vpop.permute.xlu0 %1089 }
 0x4c5   :  { %v1123_v2 = vmul.f32 %v6045_v61, %v1090_v59 }
 0x4c7   :  { %v1130_v11 = vadd.f32 %v1123_v2, %v1122_v38 }
 0x4c8   :  { %v1095_v60 = vpop.permute.xlu0 %1094 }
 0x4c9   :  { %v1124_v34 = vmul.f32 %v6057_v6, %v1095_v60  ;;  %v1131_v0 = vrot.slane %v1130_v11, 4  ;;  %v6075_v6 = vld [vmem:[%s7498_s26 + $0x28] sm:$0xff] }
 0x4ca   :  { %7521 = vst [vmem:[#allocation23_spill] sm:$0xff] %v6075_v6 }
 0x4cb   :  { %v1132_v38 = vadd.f32 %v1131_v0, %v1130_v11 }
 0x4cc   :  { %v1100_v10 = vpop.permute.xlu0 %1099 }
 0x4cd   :  { %v1125_v16 = vmul.f32 %v6063_v37, %v1100_v10 }
 0x4cf   :  { %v1137_v59 = vadd.f32 %v1125_v16, %v1124_v34 }
 0x4d0   :  { %v1105_v3 = vpop.permute.xlu0 %1104 }
 0x4d1   :  { %v1138_v58 = vrot.slane %v1137_v59, 4  ;;  %v1126_v60 = vmul.f32 %v6069_v52, %v1105_v3  ;;  %v6081_v3 = vld [vmem:[%s7498_s26 + $0x30] sm:$0xff] }
 0x4d2   :  { %7522 = vst [vmem:[#allocation24_spill] sm:$0xff] %v6081_v3 }
 0x4d3   :  { %v1139_v62 = vadd.f32 %v1138_v58, %v1137_v59  ;;  %v1133_v59 = vrot.slane %v1132_v38, 2 }
 0x4d4   :  { %v1110_v2 = vpop.permute.xlu0 %1109 }
 0x4d5   :  { %v1127_v10 = vmul.f32 %v6075_v6, %v1110_v2  ;;  %v1140_v34 = vrot.slane %v1139_v62, 2  ;;  %v1134_v61 = vadd.f32 %v1133_v59, %v1132_v38  ;;  %v6087_v2 = vld [vmem:[%s7498_s26 + $0x38] sm:$0xff] }
 0x4d6   :  { %7523 = vst [vmem:[#allocation25_spill] sm:$0xff] %v6087_v2 }
 0x4d7   :  { %v1144_v16 = vadd.f32 %v1127_v10, %v1126_v60  ;;  %v1141_v0 = vadd.f32 %v1140_v34, %v1139_v62 }
 0x4d8   :  { %v1115_v37 = vpop.permute.xlu0 %1114 }
 0x4d9   :  { %v1145_v58 = vrot.slane %v1144_v16, 4  ;;  %v1128_v52 = vmul.f32 %v6081_v3, %v1115_v37  ;;  %v1142_v10 = vrot.slane %v1141_v0, 1 }
 0x4db   :  { %v1146_v11 = vadd.f32 %v1145_v58, %v1144_v16  ;;  %v1135_v16 = vrot.slane %v1134_v61, 1  ;;  %v1143_v58 = vadd.f32 %v1142_v10, %v1141_v0  ;;  %v6166_v10 = vld [vmem:[%s7410_s12 + $0x4c] ss:$12 sps:$4 sm:$0xff]  }
 0x4dc   :  { %v1120_v5 = vpop.permute.xlu0 %1119 }
 0x4dd   :  { %v1147_v63 = vrot.slane %v1146_v11, 2  ;;  %v1129_v60 = vmul.f32 %v6087_v2, %v1120_v5  ;;  %v1136_v28 = vadd.f32 %v1135_v16, %v1134_v61  ;;  %v1159_v39 = vpack.c.bf16 %v1143_v58, %v1143_v58  ;;  %v6096_v61 = vld [vmem:[%s7410_s12 + $0xa8] ss:$12 sps:$4 sm:$0xff]  }
 0x4de   :  { %v6185_v16 = vld [vmem:[%s7410_s12 + $0x34] ss:$12 sps:$4 sm:$0xff]   ;;  %v6204_v58 = vld [vmem:[%s7410_s12 + $0x1c] ss:$12 sps:$4 sm:$0xff]  }
 0x4df   :  { %v1148_v62 = vadd.f32 %v1147_v63, %v1146_v11  ;;  %v1151_v34 = vadd.f32 %v1129_v60, %v1128_v52  ;;  %v1158_v36 = vpack.c.bf16 %v1136_v28, %v1136_v28  ;;  %v1199_v27 = vunpack.c.l.b16 %v1159_v39  ;;  %v6101_v39 = vld [vmem:[%s7410_s12 + $0xb0] ss:$12 sps:$4 sm:$0xff]   ;;  %v6159_v60 = vld [vmem:[%s7410_s12 + $0x68] ss:$12 sps:$4 sm:$0xff]  }
 0x4e0   :  { %v7525_v28 = vmov 0  }
 0x4e1   :  { %v1149_v38 = vrot.slane %v1148_v62, 1  ;;  %v1152_v59 = vrot.slane %v1151_v34, 4  ;;  %v1198_v5 = vunpack.c.l.b16 %v1158_v36  ;;  %v7524_v36 = vmov 0.0  }
 0x4e3   :  { %v1153_v6 = vadd.f32 %v1152_v59, %v1151_v34  ;;  %v1150_v23 = vadd.f32 %v1149_v38, %v1148_v62  ;;  %v1202_v52 = vsel %vm145_vm1, %v1199_v27, %v1198_v5  ;;  %v6118_v27 = vld [vmem:[%s7410_s12 + $0x98] ss:$12 sps:$4 sm:$0xff]   ;;  %v6173_v62 = vld [vmem:[%s7410_s12 + $0x48] ss:$12 sps:$4 sm:$0xff]   ;;  %v6178_v34 = vld [vmem:[%s7410_s12 + $0x50] ss:$12 sps:$4 sm:$0xff]  }
 0x4e4   :  { %v6192_v38 = vld [vmem:[%s7410_s12 + $0x30] ss:$12 sps:$4 sm:$0xff]   ;;  %v6197_v59 = vld [vmem:[%s7410_s12 + $0x38] ss:$12 sps:$4 sm:$0xff]   ;;  %v6216_v5 = vld [vmem:[%s7410_s12 + $0x20] ss:$12 sps:$4 sm:$0xff]  }
 0x4e5   :  { %v1154_v29 = vrot.slane %v1153_v6, 2  ;;  %v1160_v3 = vpack.c.bf16 %v1150_v23, %v1150_v23  ;;  %v6125_v23 = vld [vmem:[%s7410_s12 + $0x7c] ss:$12 sps:$4 sm:$0xff]  }
 0x4e7   :  { %v1155_v37 = vadd.f32 %v1154_v29, %v1153_v6  ;;  %v1200_v24 = vunpack.c.l.b16 %v1160_v3  ;;  %v6135_v29 = vld [vmem:[%s7410_s12 + $0x78] ss:$12 sps:$4 sm:$0xff]   ;;  %v6140_v6 = vld [vmem:[%s7410_s12 + $0x80] ss:$12 sps:$4 sm:$0xff]  }
 0x4e8   :  { %v6147_v3 = vld [vmem:[%s7410_s12 + $0x64] ss:$12 sps:$4 sm:$0xff]  }
 0x4e9   :  { %v1156_v35 = vrot.slane %v1155_v37, 1  ;;  %v1203_v11 = vsel %vm147_vm2, %v1200_v24, %v1202_v52  ;;  %v6113_v24 = vld [vmem:[%s7410_s12 + $0x90] ss:$12 sps:$4 sm:$0xff]   ;;  %v6230_v52 = vld [vmem:[%s7410_s12] ss:$12 sps:$4 sm:$0xff]  }
 0x4eb   :  { %v1157_v25 = vadd.f32 %v1156_v35, %v1155_v37  ;;  %v6211_v37 = vld [vmem:[%s7410_s12 + $0x18] ss:$12 sps:$4 sm:$0xff]  }
 0x4ed   :  { %v1161_v2 = vpack.c.bf16 %v1157_v25, %v1157_v25  ;;  %v6106_v25 = vld [vmem:[%s7410_s12 + $0x94] ss:$12 sps:$4 sm:$0xff]  }
 0x4ef   :  { %v1201_v63 = vunpack.c.l.b16 %v1161_v2  ;;  %v6154_v2 = vld [vmem:[%s7410_s12 + $0x60] ss:$12 sps:$4 sm:$0xff]  }
 0x4f1   :  { %v1204_v0 = vsel %vm149_vm3, %v1201_v63, %v1203_v11  ;;  %v6223_v63 = vld [vmem:[%s7410_s12 + $0x4] ss:$12 sps:$4 sm:$0xff]   ;;  %v6235_v11 = vld [vmem:[%s7410_s12 + $0x8] ss:$12 sps:$4 sm:$0xff]  }
 0x4f2   :  { %v1205_v35 = vpack.c.b16 %v1204_v0, %v1204_v0  ;;  %7526 = vst [vmem:[#allocation26_spill] sm:$0xff] %v6235_v11 }
 0x4f4   :  { %1368 = vmatmul.mubr.bf16.vlgmr.msra.gmra.mxu1 %v1205_v35  ;;  %4632 = vmatmul.mubr.bf16.vlgmr.msra.gmra.mxu0 %v1205_v35  ;;  %v6250_v35 = vld [vmem:[%s7402_s6 + $0x38] sm:$0xff]  }
 0x4f5   :  { %1594 = vmatpush1.bf16.msra.mxu1 %v6096_v61  ;;  %4636 = vmatpush3.bf16.msra.mxu0 %v6101_v39  ;;  %7527 = vst [vmem:[#allocation27_spill] sm:$0xff] %v6250_v35 }
 0x4f6   :  { %1595 = vmatprep.subr.bf16.mxu1 %v6106_v25  ;;  %4637 = vmatprep.subr.bf16.mxu0 %v7524_v36 }
 0x4f7   :  { %1625 = vmatprep.mubr.bf16.mxu1 %v7525_v28  ;;  %4651 = vmatprep.mubr.msk.bf16.mxu0 %vm5364_vm0, %v7524_v36 }
 0x4f9   :  { %1596 = vmatpush1.bf16.msra.mxu1 %v6113_v24  ;;  %4638 = vmatpush3.bf16.msra.mxu0 %v6118_v27 }
 0x4fa   :  { %1597 = vmatprep.subr.bf16.mxu1 %v6125_v23  ;;  %4639 = vmatprep.subr.bf16.mxu0 %v7524_v36 }
 0x4fd   :  { %1598 = vmatpush1.bf16.msra.mxu1 %v6135_v29  ;;  %4640 = vmatpush3.bf16.msra.mxu0 %v6140_v6 }
 0x4fe   :  { %1599 = vmatprep.subr.bf16.mxu1 %v6147_v3  ;;  %4641 = vmatprep.subr.bf16.mxu0 %v7524_v36 }
 0x501   :  { %1600 = vmatpush1.bf16.msra.mxu1 %v6154_v2  ;;  %4642 = vmatpush3.bf16.msra.mxu0 %v6159_v60 }
 0x502   :  { %1601 = vmatprep.subr.bf16.mxu1 %v6166_v10  ;;  %4643 = vmatprep.subr.bf16.mxu0 %v7524_v36 }
 0x505   :  { %1602 = vmatpush1.bf16.msra.mxu1 %v6173_v62  ;;  %4644 = vmatpush3.bf16.msra.mxu0 %v6178_v34 }
 0x506   :  { %1603 = vmatprep.subr.bf16.mxu1 %v6185_v16  ;;  %4645 = vmatprep.subr.bf16.mxu0 %v7524_v36 }
 0x507   :  { %v6245_v0 = vpop.f32.mrf.mxu1 }
 0x509   :  { %1604 = vmatpush1.bf16.msra.mxu1 %v6192_v38  ;;  %4646 = vmatpush3.bf16.msra.mxu0 %v6197_v59 }
 0x50a   :  { %1605 = vmatprep.subr.bf16.mxu1 %v6204_v58  ;;  %4647 = vmatprep.subr.bf16.mxu0 %v7524_v36 }
 0x50d   :  { %1606 = vmatpush1.bf16.msra.mxu1 %v6211_v37  ;;  %4648 = vmatpush3.bf16.msra.mxu0 %v6216_v5 }
 0x50e   :  { %1607 = vmatprep.subr.bf16.mxu1 %v6223_v63  ;;  %4649 = vmatprep.subr.bf16.mxu0 %v7524_v36 }
 0x511   :  { %1608 = vmatpush1.bf16.msra.mxu1 %v6230_v52  ;;  %4650 = vmatpush3.bf16.msra.mxu0 %v6235_v11  ;;  %v6257_v11 = vrot.slane %v5692_v47, %v5796_v18 }
 0x512   :  { %4655 = vmatprep.subr.bf16.mxu1 %v7524_v36  ;;  %2132 = vmatprep.subr.bf16.mxu0 %v5885_v7 }
 0x514   :  { %1626 = vmatmul.mubr.bf16.vlgmr.msra.gmra.mxu1 %v5678_v45  ;;  %4652 = vmatmul.mubr.bf16.vlgmr.msra.gmra.mxu0 %v5678_v45  ;;  %v4593_v45 = vpop.f32.mrf.mxu1 }
 0x515   :  { %4656 = vmatpush3.bf16.msra.mxu1 %v6250_v35  ;;  %4671 = vmatprep.mubr.msk.bf16.mxu1 %vm5364_vm0, %v7524_v36  ;;  %v6266_v35 = vld [vmem:[%s7402_s6 + $0x30] sm:$0xff]  }
 0x516   :  { %4657 = vmatprep.subr.bf16.mxu1 %v7524_v36  ;;  %2133 = vmatpush1.bf16.msra.mxu0 %v5890_v12  ;;  %v650_v7 = vpop.f32.mrf.mxu1  ;;  %7528 = vst [vmem:[#allocation28_spill] sm:$0xff] %v6266_v35 }
 0x517   :  { %2134 = vmatprep.subr.bf16.mxu0 %v5904_v51  ;;  %2164 = vmatprep.mubr.bf16.mxu0 %v7525_v28  ;;  %v6270_v47 = vadd.f32 %v650_v7, %v6257_v11  ;;  %v6278_v51 = vld [vmem:[%s7402_s6 + $0x28] sm:$0xff]   ;;  %v1448_v7 = vld [vmem:[%s7411_s14] sm:$0x7] }
 0x518   :  { %v4594_v12 = vpop.f32.mrf.mxu1  ;;  %7530 = vst [vmem:[#allocation30_spill] sm:$0xff] %v6278_v51 }
 0x519   :  { %4658 = vmatpush3.bf16.msra.mxu1 %v6266_v35  ;;  %7529 = vst [vmem:[#allocation29_spill] sm:$0xff] %v6270_v47  ;;  %v6333_v12 = vrot.slane %v1448_v7, %v5687_v46 }
 0x51a   :  { %4659 = vmatprep.subr.bf16.mxu1 %v7524_v36  ;;  %2135 = vmatpush1.bf16.msra.mxu0 %v5910_v13  ;;  %v6287_v13 = vld [vmem:[%s7402_s6 + $0x20] sm:$0xff]  }
 0x51b   :  { %2136 = vmatprep.subr.bf16.mxu0 %v5924_v17  ;;  %7531 = vst [vmem:[#allocation31_spill] sm:$0xff] %v6287_v13  ;;  %v6296_v17 = vld [vmem:[%s7402_s6 + $0x18] sm:$0xff]   ;;  %7536 = vst [vmem:[#allocation36_spill] sm:$0xff] %v6333_v12 }
 0x51c   :  { %7532 = vst [vmem:[#allocation32_spill] sm:$0xff] %v6296_v17 }
 0x51d   :  { %4660 = vmatpush3.bf16.msra.mxu1 %v6278_v51 }
 0x51e   :  { %4661 = vmatprep.subr.bf16.mxu1 %v7524_v36  ;;  %2137 = vmatpush1.bf16.msra.mxu0 %v5930_v19  ;;  %v6305_v19 = vld [vmem:[%s7402_s6 + $0x10] sm:$0xff]  }
 0x51f   :  { %2138 = vmatprep.subr.bf16.mxu0 %v5943_v21  ;;  %7533 = vst [vmem:[#allocation33_spill] sm:$0xff] %v6305_v19  ;;  %v6314_v21 = vld [vmem:[%s7402_s6 + $0x8] sm:$0xff]  }
 0x520   :  { %7534 = vst [vmem:[#allocation34_spill] sm:$0xff] %v6314_v21 }
 0x521   :  { %4662 = vmatpush3.bf16.msra.mxu1 %v6287_v13 }
 0x522   :  { %4663 = vmatprep.subr.bf16.mxu1 %v7524_v36  ;;  %2139 = vmatpush1.bf16.msra.mxu0 %v5949_v22  ;;  %v6323_v22 = vld [vmem:[%s7402_s6] sm:$0xff]  }
 0x523   :  { %2140 = vmatprep.subr.bf16.mxu0 %v5962_v40  ;;  %7535 = vst [vmem:[#allocation35_spill] sm:$0xff] %v6323_v22 }
 0x525   :  { %4664 = vmatpush3.bf16.msra.mxu1 %v6296_v17 }
 0x526   :  { %4665 = vmatprep.subr.bf16.mxu1 %v7524_v36  ;;  %2141 = vmatpush1.bf16.msra.mxu0 %v5968_v41 }
 0x527   :  { %2142 = vmatprep.subr.bf16.mxu0 %v5981_v44 }
 0x529   :  { %4666 = vmatpush3.bf16.msra.mxu1 %v6305_v19 }
 0x52a   :  { %4667 = vmatprep.subr.bf16.mxu1 %v7524_v36  ;;  %2143 = vmatpush1.bf16.msra.mxu0 %v5987_v8 }
 0x52b   :  { %2144 = vmatprep.subr.bf16.mxu0 %v5999_v15 }
 0x52d   :  { %4668 = vmatpush3.bf16.msra.mxu1 %v6314_v21 }
 0x52e   :  { %4669 = vmatprep.subr.bf16.mxu1 %v7524_v36  ;;  %2145 = vmatpush1.bf16.msra.mxu0 %v6004_v32 }
 0x52f   :  { %2146 = vmatprep.subr.bf16.mxu0 %v6015_v54 }
 0x531   :  { %4670 = vmatpush3.bf16.msra.mxu1 %v6323_v22 }
 0x532   :  { %4675 = vmatprep.subr.bf16.mxu1 %v7524_v36  ;;  %2147 = vmatpush1.bf16.msra.mxu0 %v6022_v55  ;;  %v6337_v55 = vadd.f32 %v5694_v48, %v5698_v49 }
 0x533   :  { %2213 = vmatprep.subr.bf16.mxu0 %v6035_v57 }
 0x534   :  { %7537 = vst [vmem:[#allocation37_spill] sm:$0xff] %v6337_v55 }
 0x5b4   :  { %v1369_v40 = vpop.f32.mrf.mxu1  ;;  %v1410_v41 = vpop.f32.mrf.mxu0 }
 0x5b6   :  { %v1371_v44 = vpop.f32.mrf.mxu1  ;;  %v4633_v8 = vpop.f32.mrf.mxu0 }
 0x5b7   :  { %v5294_v8 = vld [vmem:[%s7404_s13] sm:$0x7] }
 0x5b8   :  { %v1373_v15 = vpop.f32.mrf.mxu1  ;;  %v1413_v32 = vpop.f32.mrf.mxu0 }
 0x5b9   :  { %v6343_v15 = vrot.slane %v5294_v8, %v5790_v4  ;;  %v1370_v32 = vadd.f32 %v1369_v40, %v6337_v55 }
 0x5ba   :  { %v1374_v54 = vpop.f32.mrf.mxu1  ;;  %v4634_v45 = vpop.f32.mrf.mxu0 }
 0x5bb   :  { %7538 = vst [vmem:[#allocation38_spill] sm:$0xff] %v6343_v15  ;;  %v6348_v45 = vrot.slane %v1448_v7, %v5790_v4  ;;  %v6352_v17 = vadd.f32 %v5700_v50, %v6343_v15 }
 0x5bd   :  { %v1372_v40 = vadd.f32 %v1371_v44, %v6352_v17 }
 0x5d4   :  { %v1627_v57 = vpop.f32.mrf.mxu1  ;;  %v1668_v47 = vpop.f32.mrf.mxu0 }
 0x5d5   :  { %v1628_v54 = vadd.f32 %v1627_v57, %v6333_v12 }
 0x5d6   :  { %v1629_v22 = vpop.f32.mrf.mxu1  ;;  %v4653_v21 = vpop.f32.mrf.mxu0 }
 0x5d7   :  { %v1674_v48 = vadd.f32 %v1628_v54, %v1370_v32  ;;  %v1630_v8 = vadd.f32 %v1629_v22, %v6348_v45  ;;  %v6361_v54 = vadd.f32 %v6245_v0, %v6257_v11 }
 0x5d8   :  { %v1631_v49 = vpop.f32.mrf.mxu1  ;;  %v1671_v19 = vpop.f32.mrf.mxu0 }
 0x5d9   :  { %v4241_v13 = vmul.f32 -1.442695, %v1674_v48  ;;  %v1681_v57 = vadd.f32 %v1630_v8, %v1372_v40  ;;  %v6357_v19 = vrot.slane %v1448_v7, %v5796_v18 }
 0x5da   :  { %v1632_v51 = vpop.f32.mrf.mxu1  ;;  %v4654_v35 = vpop.f32.mrf.mxu0 }
 0x5db   :  { %5136 = vpow2.f32 %v4241_v13  ;;  %v4242_v12 = vmul.f32 -1.442695, %v1681_v57  ;;  %7539 = vst [vmem:[#allocation39_spill] sm:$0xff] %v6357_v19  ;;  %v1669_v35 = vadd.f32 %v1668_v47, %v6357_v19  ;;  %v1411_v13 = vadd.f32 %v1410_v41, %v6361_v54 }
 0x5dd   :  { %5138 = vpow2.f32 %v4242_v12 }
 0x5e8   :  { %v5137_v55 = vpop.eup %5136 }
 0x5e9   :  { %v1678_v21 = vadd.f32 1.0, %v5137_v55 }
 0x5ea   :  { %v5139_v32 = vpop.eup %5138 }
 0x5eb   :  { %5140 = vrcp.f32 %v1678_v21  ;;  %v1685_v50 = vadd.f32 1.0, %v5139_v32  ;;  %v7541_v32 = vld [vmem:[#allocation7_spill] sm:$0xff] }
 0x5ed   :  { %5142 = vrcp.f32 %v1685_v50 }
 0x5f8   :  { %v5141_v51 = vpop.eup %5140 }
 0x5f9   :  { %v1688_v22 = vmul.f32 %v5141_v51, %v1669_v35  ;;  %v7542_v51 = vld [vmem:[#allocation8_spill] sm:$0xff] }
 0x5fa   :  { %v5143_v12 = vpop.eup %5142 }
 0x5fb   :  { %v1689_v44 = vadd.f32 %v1688_v22, %v1411_v13  ;;  %v1691_v55 = vsub.f32 1.0, %v5143_v12  ;;  %v1693_v7 = vmul.f32 %v5143_v12, %v5674_v43 }
 0x5fd   :  { %5144 = vtanh.f32 %v1689_v44  ;;  %v7543_v44 = vld [vmem:[#allocation10_spill] sm:$0xff] }
 0x60a   :  { %v5145_v48 = vpop.eup %5144 }
 0x60b   :  { %v1692_v49 = vmul.f32 %v5145_v48, %v1691_v55  ;;  %v7544_v48 = vld [vmem:[#allocation11_spill] sm:$0xff] }
 0x60d   :  { %v6366_v8 = vadd.f32 %v1693_v7, %v1692_v49 }
 0x60f   :  { %7540 = vst [vmem:[#allocation40_spill] sm:$0xff] %v6366_v8  ;;  %v6370_v11 = vpack.c.bf16 %v6366_v8, %v6366_v8 }
 0x611   :  { %4672 = vmatmul.mubr.bf16.vlgmr.msra.gmra.mxu1 %v6370_v11 }
 0x612   :  { %4676 = vmatpush3.bf16.msra.mxu1 %v5896_v9  ;;  %4691 = vmatprep.mubr.msk.bf16.mxu1 %vm5364_vm0, %v7524_v36  ;;  %v6394_v9 = vld [vmem:[%s7406_s7] ss:$0 sm:$0xff] }
 0x613   :  { %4677 = vmatprep.subr.bf16.mxu1 %v7524_v36 }
 0x616   :  { %4678 = vmatpush3.bf16.msra.mxu1 %v5915_v53 }
 0x617   :  { %4679 = vmatprep.subr.bf16.mxu1 %v7524_v36 }
 0x61a   :  { %4680 = vmatpush3.bf16.msra.mxu1 %v5935_v14 }
 0x61b   :  { %4681 = vmatprep.subr.bf16.mxu1 %v7524_v36 }
 0x61e   :  { %4682 = vmatpush3.bf16.msra.mxu1 %v5954_v30 }
 0x61f   :  { %4683 = vmatprep.subr.bf16.mxu1 %v7524_v36 }
 0x622   :  { %4684 = vmatpush3.bf16.msra.mxu1 %v5973_v42 }
 0x623   :  { %4685 = vmatprep.subr.bf16.mxu1 %v7524_v36 }
 0x626   :  { %4686 = vmatpush3.bf16.msra.mxu1 %v5992_v31 }
 0x627   :  { %4687 = vmatprep.subr.bf16.mxu1 %v7524_v36 }
 0x62a   :  { %4688 = vmatpush3.bf16.msra.mxu1 %v6010_v33 }
 0x62b   :  { %4689 = vmatprep.subr.bf16.mxu1 %v7524_v36 }
 0x62e   :  { %4690 = vmatpush3.bf16.msra.mxu1 %v6027_v56 }
 0x62f   :  { %4695 = vmatprep.subr.bf16.mxu1 %v7524_v36 }
 0x6d1   :  { %v1730_v43 = vpop.f32.mrf.mxu1 }
 0x6d2   :  { %v1731_v53 = vadd.f32 %v6394_v9, %v1730_v43 }
 0x6d3   :  { %v4673_v14 = vpop.f32.mrf.mxu1 }
 0x6d4   :  { %v1743_v30 = vrot.slane %v1731_v53, %v5714_v1  ;;  %v6413_v53 = vld [vmem:[%s7408_s8] ss:$0 sm:$0xff] }
 0x6d5   :  { %v1733_v42 = vpop.f32.mrf.mxu1  ;;  %7545 = vst [vmem:[#allocation41_spill] sm:$0xff] %v6413_v53 }
 0x6d6   :  { %v1744_v31 = vcombine.high %v1743_v30, %v1743_v30  ;;  %v1751_v33 = vrot.slane %v1743_v30, %v5714_v1  ;;  %v7546_v30 = vld [vmem:[#allocation12_spill] sm:$0xff] }
 0x6d7   :  { %v4674_v0 = vpop.f32.mrf.mxu1 }
 0x6d8   :  { %v1758_v56 = vrot.slane %v1744_v31, %v5714_v1  ;;  %v1764_v47 = vrot.slane %v1751_v33, %v5687_v46  ;;  %v1759_v21 = vcombine.high %v1751_v33, %v1751_v33  ;;  %v7547_v0 = vld [vmem:[#allocation13_spill] sm:$0xff] }
 0x6da   :  { %v1768_v41 = vrot.slane %v1758_v56, %v5687_v46  ;;  %v1781_v40 = vadd.f32 %v1764_v47, %v5721_v20  ;;  %v1782_v57 = vadd.f32 %v1764_v47, %v5729_v26  ;;  %v1772_v35 = vrot.slane %v1759_v21, %v5687_v46 }
 0x6db   :  { %v1760_v22 = vcombine.high %v1758_v56, %v1758_v56 }
 0x6dc   :  { %v1783_v50 = vadd.f32 %v1768_v41, %v7541_v32  ;;  %5146 = vtanh.f32 %v1781_v40  ;;  %v1784_v13 = vadd.f32 %v1768_v41, %v7542_v51  ;;  %v1785_v12 = vadd.f32 %v1772_v35, %v7543_v44 }
 0x6dd   :  { %5148 = vtanh.f32 %v1782_v57  ;;  %v1776_v55 = vrot.slane %v1760_v22, %v5687_v46  ;;  %v1786_v49 = vadd.f32 %v1772_v35, %v7544_v48 }
 0x6de   :  { %5150 = vtanh.f32 %v1783_v50 }
 0x6df   :  { %5152 = vtanh.f32 %v1784_v13  ;;  %v1787_v42 = vadd.f32 %v1776_v55, %v7546_v30  ;;  %v1788_v56 = vadd.f32 %v1776_v55, %v7547_v0 }
 0x6e0   :  { %5154 = vtanh.f32 %v1785_v12 }
 0x6e1   :  { %5156 = vtanh.f32 %v1786_v49 }
 0x6e2   :  { %5158 = vtanh.f32 %v1787_v42 }
 0x6e3   :  { %5160 = vtanh.f32 %v1788_v56 }
 0x6e9   :  { %v5147_v7 = vpop.eup %5146 }
 0x6ea   :  { %v5149_v43 = vpop.eup %5148  ;;  %v1797_v14 = vmul.f32 %v6413_v53, %v5147_v7 }
 0x6eb   :  { %v1798_v31 = vmul.f32 %v6413_v53, %v5149_v43  ;;  %v5151_v33 = vpop.eup %5150 }
 0x6ec   :  { %1805 = vadd.xlane.f32.xlu0 %v1797_v14  ;;  %v1799_v47 = vmul.f32 %v6413_v53, %v5151_v33  ;;  %v5153_v41 = vpop.eup %5152  ;;  %v7548_v33 = vld [vmem:[#allocation16_spill] sm:$0xff] }
 0x6ed   :  { %1807 = vadd.xlane.f32.xlu1 %v1798_v31  ;;  %v1800_v40 = vmul.f32 %v6413_v53, %v5153_v41  ;;  %v5155_v57 = vpop.eup %5154 }
 0x6ee   :  { %v1801_v21 = vmul.f32 %v6413_v53, %v5155_v57  ;;  %v5157_v50 = vpop.eup %5156 }
 0x6ef   :  { %v1802_v35 = vmul.f32 %v6413_v53, %v5157_v50  ;;  %v5159_v13 = vpop.eup %5158 }
 0x6f0   :  { %v1803_v22 = vmul.f32 %v6413_v53, %v5159_v13  ;;  %v5161_v12 = vpop.eup %5160 }
 0x6f1   :  { %1809 = vadd.xlane.f32.xlu1 %v1799_v47  ;;  %v1804_v55 = vmul.f32 %v6413_v53, %v5161_v12 }
 0x6f5   :  { %1811 = vadd.xlane.f32.xlu1 %v1800_v40 }
 0x6f9   :  { %1813 = vadd.xlane.f32.xlu1 %v1801_v21 }
 0x6fd   :  { %1815 = vadd.xlane.f32.xlu1 %v1802_v35  ;;  %v7549_v35 = vld [vmem:[#allocation15_spill] sm:$0xff] }
 0x701   :  { %1817 = vadd.xlane.f32.xlu1 %v1803_v22 }
 0x705   :  { %1819 = vadd.xlane.f32.xlu1 %v1804_v55  ;;  %v7550_v55 = vld [vmem:[#allocation14_spill] sm:$0xff] }
 0x775   :  { %v1806_v42 = vpop.xlane.xlu0 %1805 }
 0x776   :  { %v1808_v49 = vpop.xlane.xlu1 %1807  ;;  %v1821_v40 = vadd.f32 %v1806_v42, %v7548_v33 }
 0x777   :  { %v1822_v41 = vadd.f32 %v1808_v49, %v7548_v33 }
 0x778   :  { %v1840_v15 = vrot.slane %v1821_v40, %v7550_v55 }
 0x779   :  { %v1844_v12 = vrot.slane %v1822_v41, %v7549_v35 }
 0x77a   :  { %v1810_v7 = vpop.xlane.xlu1 %1809 }
 0x77b   :  { %v1823_v57 = vadd.f32 %v1810_v7, %v7548_v33  ;;  %v1845_v30 = vsel %vm895_vm4, %v1844_v12, %v1840_v15 }
 0x77e   :  { %v1812_v43 = vpop.xlane.xlu1 %1811 }
 0x77f   :  { %v1824_v56 = vadd.f32 %v1812_v43, %v7548_v33  ;;  %v1849_v43 = vrot.slane %v1823_v57, %v7550_v55 }
 0x781   :  { %v1853_v13 = vrot.slane %v1824_v56, %v7549_v35 }
 0x782   :  { %v1814_v14 = vpop.xlane.xlu1 %1813 }
 0x783   :  { %v1825_v21 = vadd.f32 %v1814_v14, %v7548_v33  ;;  %v1854_v7 = vsel %vm895_vm4, %v1853_v13, %v1849_v43 }
 0x784   :  { %v1873_v44 = vsel %vm145_vm1, %v1854_v7, %v1845_v30 }
 0x785   :  { %v1858_v49 = vrot.slane %v1825_v21, %v7550_v55 }
 0x786   :  { %v1816_v31 = vpop.xlane.xlu1 %1815 }
 0x787   :  { %v1826_v47 = vadd.f32 %v1816_v31, %v7548_v33 }
 0x789   :  { %v1862_v22 = vrot.slane %v1826_v47, %v7549_v35 }
 0x78a   :  { %v1818_v50 = vpop.xlane.xlu1 %1817 }
 0x78b   :  { %v1827_v31 = vadd.f32 %v1818_v50, %v7548_v33  ;;  %v1863_v0 = vsel %vm895_vm4, %v1862_v22, %v1858_v49 }
 0x78c   :  { %v1874_v50 = vsel %vm147_vm2, %v1863_v0, %v1873_v44 }
 0x78d   :  { %v1867_v53 = vrot.slane %v1827_v31, %v7550_v55 }
 0x78e   :  { %v1820_v42 = vpop.xlane.xlu1 %1819 }
 0x78f   :  { %v1828_v14 = vadd.f32 %v1820_v42, %v7548_v33 }
 0x791   :  { %v1871_v48 = vrot.slane %v1828_v14, %v7549_v35 }
 0x793   :  { %v1872_v51 = vsel %vm895_vm4, %v1871_v48, %v1867_v53  ;;  %v7551_v53 = vld [vmem:[#allocation17_spill] sm:$0xff] }
 0x794   :  { %v1875_v32 = vsel %vm149_vm3, %v1872_v51, %v1874_v50 }
 0x795   :  { %v1877_v13 = vsel %vm928_vm5, %v1875_v32, -inf }
 0x796   :  { %1878 = vmax.xlane.f32.xlu1 %v1877_v13 }
 0x81f   :  { %v1879_v43 = vpop.xlane.xlu1 %1878 }
 0x820   :  { %v1884_v22 = vrot.slane %v1879_v43, %v5687_v46  ;;  %v1888_v15 = vrot.slane %v1879_v43, %v5790_v4  ;;  %v1892_v12 = vrot.slane %v1879_v43, %v5796_v18  ;;  %v1896_v44 = vrot.slane %v1879_v43, %v7551_v53 }
 0x822   :  { %v1901_v49 = vsub.f32 %v1821_v40, %v1884_v22  ;;  %v1902_v42 = vsub.f32 %v1822_v41, %v1884_v22  ;;  %v1904_v33 = vsub.f32 %v1824_v56, %v1888_v15  ;;  %v1903_v30 = vsub.f32 %v1823_v57, %v1888_v15 }
 0x823   :  { %v1906_v0 = vsub.f32 %v1826_v47, %v1892_v12  ;;  %v1905_v32 = vsub.f32 %v1825_v21, %v1892_v12  ;;  %v1908_v13 = vsub.f32 %v1828_v14, %v1896_v44  ;;  %v1907_v20 = vsub.f32 %v1827_v31, %v1896_v44 }
 0x824   :  { %v1909_v7 = vmul.f32 1.442695, %v1901_v49  ;;  %v1911_v48 = vmul.f32 1.442695, %v1902_v42  ;;  %v1915_v51 = vmul.f32 1.442695, %v1904_v33 }
 0x825   :  { %v1913_v50 = vmul.f32 1.442695, %v1903_v30  ;;  %v1919_v26 = vmul.f32 1.442695, %v1906_v0  ;;  %v1917_v1 = vmul.f32 1.442695, %v1905_v32 }
 0x826   :  { %5162 = vpow2.f32 %v1909_v7  ;;  %v1923_v41 = vmul.f32 1.442695, %v1908_v13  ;;  %v1921_v56 = vmul.f32 1.442695, %v1907_v20 }
 0x827   :  { %5164 = vpow2.f32 %v1911_v48 }
 0x828   :  { %5166 = vpow2.f32 %v1915_v51 }
 0x829   :  { %5168 = vpow2.f32 %v1913_v50 }
 0x82a   :  { %5170 = vpow2.f32 %v1919_v26 }
 0x82b   :  { %5172 = vpow2.f32 %v1917_v1 }
 0x82c   :  { %5174 = vpow2.f32 %v1923_v41 }
 0x82d   :  { %5176 = vpow2.f32 %v1921_v56 }
 0x833   :  { %v5163_v40 = vpop.eup %5162 }
 0x834   :  { %v5165_v57 = vpop.eup %5164  ;;  %1934 = vperm.xlu0 %4939, %v5163_v40  }
 0x835   :  { %1937 = vperm.xlu1 %4940, %v5165_v57   ;;  %v5167_v33 = vpop.eup %5166 }
 0x836   :  { %v5169_v47 = vpop.eup %5168 }
 0x837   :  { %v5171_v21 = vpop.eup %5170 }
 0x838   :  { %1943 = vperm.xlu0 %4939, %v5167_v33   ;;  %v5173_v14 = vpop.eup %5172 }
 0x839   :  { %1940 = vperm.xlu1 %4940, %v5169_v47   ;;  %v5175_v31 = vpop.eup %5174 }
 0x83a   :  { %v5177_v43 = vpop.eup %5176 }
 0x83c   :  { %1949 = vperm.xlu0 %4939, %v5171_v21  }
 0x83d   :  { %1946 = vperm.xlu1 %4940, %v5173_v14  }
 0x840   :  { %1955 = vperm.xlu0 %4939, %v5175_v31  }
 0x841   :  { %1952 = vperm.xlu1 %4940, %v5177_v43  }
 0x8af   :  { %v1935_v1 = vpop.permute.xlu0 %1934 }
 0x8b0   :  { %v1938_v20 = vpop.permute.xlu1 %1937  ;;  %v1960_v48 = vrot.slane %v1935_v1, %v7550_v55 }
 0x8b1   :  { %v1964_v7 = vrot.slane %v1938_v20, %v7549_v35 }
 0x8b3   :  { %v1944_v26 = vpop.permute.xlu0 %1943  ;;  %v1965_v41 = vsel %vm895_vm4, %v1964_v7, %v1960_v48 }
 0x8b4   :  { %v1941_v22 = vpop.permute.xlu1 %1940  ;;  %v1973_v12 = vrot.slane %v1944_v26, %v7549_v35 }
 0x8b5   :  { %v1969_v15 = vrot.slane %v1941_v22, %v7550_v55 }
 0x8b7   :  { %v1950_v49 = vpop.permute.xlu0 %1949  ;;  %v1974_v0 = vsel %vm895_vm4, %v1973_v12, %v1969_v15 }
 0x8b8   :  { %v1947_v42 = vpop.permute.xlu1 %1946  ;;  %v1982_v30 = vrot.slane %v1950_v49, %v7549_v35  ;;  %v1993_v26 = vsel %vm145_vm1, %v1974_v0, %v1965_v41 }
 0x8b9   :  { %v1978_v44 = vrot.slane %v1947_v42, %v7550_v55 }
 0x8bb   :  { %v1956_v51 = vpop.permute.xlu0 %1955  ;;  %v1983_v32 = vsel %vm895_vm4, %v1982_v30, %v1978_v44 }
 0x8bc   :  { %v1953_v50 = vpop.permute.xlu1 %1952  ;;  %v1991_v13 = vrot.slane %v1956_v51, %v7549_v35  ;;  %v1994_v1 = vsel %vm147_vm2, %v1983_v32, %v1993_v26 }
 0x8bd   :  { %v1987_v56 = vrot.slane %v1953_v50, %v7550_v55 }
 0x8bf   :  { %v1992_v20 = vsel %vm895_vm4, %v1991_v13, %v1987_v56 }
 0x8c0   :  { %v1995_v22 = vsel %vm149_vm3, %v1992_v20, %v1994_v1  ;;  %v7552_v20 = vld [vmem:[#allocation18_spill] sm:$0xff]  ;;  %v7553_v1 = vld [vmem:[#allocation19_spill] sm:$0xff] }
 0x8c1   :  { %v1997_v15 = vsel %vm928_vm5, %v1995_v22, 0.0 }
 0x8c2   :  { %1998 = vadd.xlane.f32.xlu1 %v1997_v15 }
 0x94b   :  { %v1999_v12 = vpop.xlane.xlu1 %1998 }
 0x94c   :  { %5178 = vrcp.f32 %v1999_v12  ;;  %v7554_v12 = vld [vmem:[#allocation20_spill] sm:$0xff] }
 0x959   :  { %v5179_v49 = vpop.eup %5178 }
 0x95a   :  { %v2005_v42 = vrot.slane %v5179_v49, %v5687_v46  ;;  %v2009_v48 = vrot.slane %v5179_v49, %v5790_v4  ;;  %v2013_v51 = vrot.slane %v5179_v49, %v5796_v18  ;;  %v2017_v13 = vrot.slane %v5179_v49, %v7551_v53 }
 0x95c   :  { %v2022_v30 = vmul.f32 %v5163_v40, %v2005_v42  ;;  %v2023_v7 = vmul.f32 %v5165_v57, %v2005_v42  ;;  %v2024_v44 = vmul.f32 %v5169_v47, %v2009_v48  ;;  %v2025_v0 = vmul.f32 %v5167_v33, %v2009_v48  ;;  %v7555_v42 = vld [vmem:[#allocation21_spill] sm:$0xff] }
 0x95d   :  { %v2026_v32 = vmul.f32 %v5173_v14, %v2013_v51  ;;  %v2027_v50 = vmul.f32 %v5171_v21, %v2013_v51  ;;  %v2028_v41 = vmul.f32 %v5177_v43, %v2017_v13  ;;  %v2029_v40 = vmul.f32 %v5175_v31, %v2017_v13 }
 0x95e   :  { %2032 = vperm.xlu0 %4939, %v2022_v30  }
 0x962   :  { %2037 = vperm.xlu0 %4939, %v2023_v7  }
 0x966   :  { %2042 = vperm.xlu0 %4939, %v2024_v44  }
 0x96a   :  { %2047 = vperm.xlu0 %4939, %v2025_v0   ;;  %v7556_v0 = vld [vmem:[#allocation22_spill] sm:$0xff] }
 0x96e   :  { %2052 = vperm.xlu0 %4939, %v2026_v32   ;;  %v7557_v32 = vld [vmem:[#allocation23_spill] sm:$0xff] }
 0x972   :  { %2057 = vperm.xlu0 %4939, %v2027_v50  }
 0x976   :  { %2062 = vperm.xlu0 %4939, %v2028_v41  }
 0x97a   :  { %2067 = vperm.xlu0 %4939, %v2029_v40  }
 0x9d9   :  { %v2033_v57 = vpop.permute.xlu0 %2032 }
 0x9da   :  { %v2070_v33 = vmul.f32 %v7553_v1, %v2033_v57 }
 0x9dd   :  { %v2038_v56 = vpop.permute.xlu0 %2037 }
 0x9de   :  { %v2071_v47 = vmul.f32 %v7552_v20, %v2038_v56 }
 0x9e0   :  { %v2078_v15 = vadd.f32 %v2071_v47, %v2070_v33 }
 0x9e1   :  { %v2043_v26 = vpop.permute.xlu0 %2042 }
 0x9e2   :  { %v2072_v14 = vmul.f32 %v7554_v12, %v2043_v26  ;;  %v2079_v7 = vrot.slane %v2078_v15, 4 }
 0x9e4   :  { %v2080_v44 = vadd.f32 %v2079_v7, %v2078_v15 }
 0x9e5   :  { %v2048_v22 = vpop.permute.xlu0 %2047 }
 0x9e6   :  { %v2073_v21 = vmul.f32 %v7555_v42, %v2048_v22  ;;  %v2081_v57 = vrot.slane %v2080_v44, 2  ;;  %v7558_v22 = vld [vmem:[#allocation24_spill] sm:$0xff] }
 0x9e8   :  { %v2085_v30 = vadd.f32 %v2073_v21, %v2072_v14  ;;  %v2082_v1 = vadd.f32 %v2081_v57, %v2080_v44  ;;  %v7559_v14 = vld [vmem:[#allocation25_spill] sm:$0xff] }
 0x9e9   :  { %v2053_v49 = vpop.permute.xlu0 %2052 }
 0x9ea   :  { %v2086_v43 = vrot.slane %v2085_v30, 4  ;;  %v2074_v51 = vmul.f32 %v7556_v0, %v2053_v49  ;;  %v2083_v49 = vrot.slane %v2082_v1, 1 }
 0x9ec   :  { %v2087_v48 = vadd.f32 %v2086_v43, %v2085_v30 }
 0x9ed   :  { %v2058_v31 = vpop.permute.xlu0 %2057 }
 0x9ee   :  { %v2075_v50 = vmul.f32 %v7557_v32, %v2058_v31  ;;  %v2088_v13 = vrot.slane %v2087_v48, 2  ;;  %v2084_v32 = vadd.f32 %v2083_v49, %v2082_v1  ;;  %v7568_v1 = vld [vmem:[#allocation35_spill] sm:$0xff] }
 0x9f0   :  { %v2092_v41 = vadd.f32 %v2075_v50, %v2074_v51  ;;  %v2089_v20 = vadd.f32 %v2088_v13, %v2087_v48  ;;  %v2106_v44 = vpack.c.bf16 %v2084_v32, %v2084_v32 }
 0x9f1   :  { %v2063_v40 = vpop.permute.xlu0 %2062 }
 0x9f2   :  { %v2093_v56 = vrot.slane %v2092_v41, 4  ;;  %v2076_v12 = vmul.f32 %v7558_v22, %v2063_v40  ;;  %v2090_v21 = vrot.slane %v2089_v20, 1 }
 0x9f4   :  { %v2094_v26 = vadd.f32 %v2093_v56, %v2092_v41  ;;  %v2091_v31 = vadd.f32 %v2090_v21, %v2089_v20  ;;  %v6632_v21 = vld [vmem:[%s7409_s10] ss:$12 sps:$4 sm:$0xff]  }
 0x9f5   :  { %v2068_v47 = vpop.permute.xlu0 %2067 }
 0x9f6   :  { %v2095_v33 = vrot.slane %v2094_v26, 2  ;;  %v2077_v42 = vmul.f32 %v7559_v14, %v2068_v47  ;;  %v2107_v48 = vpack.c.bf16 %v2091_v31, %v2091_v31  ;;  %v2114_v47 = vunpack.c.l.b16 %v2106_v44 }
 0x9f8   :  { %v2096_v15 = vadd.f32 %v2095_v33, %v2094_v26  ;;  %v2099_v30 = vadd.f32 %v2077_v42, %v2076_v12  ;;  %v2115_v56 = vunpack.c.l.b16 %v2107_v48 }
 0x9fa   :  { %v2097_v7 = vrot.slane %v2096_v15, 1  ;;  %v2100_v43 = vrot.slane %v2099_v30, 4  ;;  %v2118_v33 = vsel %vm145_vm1, %v2115_v56, %v2114_v47 }
 0x9fc   :  { %v2101_v0 = vadd.f32 %v2100_v43, %v2099_v30  ;;  %v2098_v51 = vadd.f32 %v2097_v7, %v2096_v15  ;;  %v6638_v15 = vld [vmem:[%s7410_s12 + $0xac] ss:$12 sps:$4 sm:$0xff]  }
 0x9fe   :  { %v2102_v50 = vrot.slane %v2101_v0, 2  ;;  %v2108_v41 = vpack.c.bf16 %v2098_v51, %v2098_v51 }
 0xa00   :  { %v2103_v13 = vadd.f32 %v2102_v50, %v2101_v0  ;;  %v2116_v22 = vunpack.c.l.b16 %v2108_v41  ;;  %v7569_v50 = vld [vmem:[#allocation37_spill] sm:$0xff] }
 0xa01   :  { %v2126_v48 = vrot.slane %v7569_v50, 4 }
 0xa02   :  { %v2104_v57 = vrot.slane %v2103_v13, 1  ;;  %v2119_v12 = vsel %vm147_vm2, %v2116_v22, %v2118_v33  ;;  %v2127_v33 = vrot.slane %v6352_v17, 4 }
 0xa04   :  { %v2105_v40 = vadd.f32 %v2104_v57, %v2103_v13  ;;  %v7570_v57 = vld [vmem:[#allocation36_spill] sm:$0xff] }
 0xa06   :  { %v2109_v14 = vpack.c.bf16 %v2105_v40, %v2105_v40 }
 0xa08   :  { %v2117_v26 = vunpack.c.l.b16 %v2109_v14 }
 0xa0a   :  { %v2120_v20 = vsel %vm149_vm3, %v2117_v26, %v2119_v12 }
 0xa0b   :  { %v2121_v42 = vpack.c.b16 %v2120_v20, %v2120_v20 }
 0xa0d   :  { %2165 = vmatmul.mubr.bf16.vlgmr.msra.gmra.mxu0 %v2121_v42  ;;  %4692 = vmatmul.mubr.bf16.vlgmr.msra.gmra.mxu1 %v2121_v42 }
 0xa0e   :  { %2214 = vmatpush1.bf16.msra.mxu0 %v6096_v61  ;;  %4696 = vmatpush3.bf16.msra.mxu1 %v6101_v39  ;;  %v7560_v61 = vld [vmem:[#allocation26_spill] sm:$0xff] }
 0xa0f   :  { %2215 = vmatprep.subr.bf16.mxu0 %v6106_v25  ;;  %4697 = vmatprep.subr.bf16.mxu1 %v7524_v36  ;;  %v6521_v39 = vld [vmem:[%s7409_s10 + $0xac] ss:$12 sps:$4 sm:$0xff]   ;;  %v7561_v25 = vld [vmem:[#allocation27_spill] sm:$0xff] }
 0xa10   :  { %2245 = vmatprep.mubr.bf16.mxu0 %v7525_v28  ;;  %4711 = vmatprep.mubr.msk.bf16.mxu1 %vm5364_vm0, %v7524_v36 }
 0xa12   :  { %2216 = vmatpush1.bf16.msra.mxu0 %v6113_v24  ;;  %4698 = vmatpush3.bf16.msra.mxu1 %v6118_v27  ;;  %v6533_v24 = vld [vmem:[%s7409_s10 + $0xa8] ss:$12 sps:$4 sm:$0xff]  }
 0xa13   :  { %2217 = vmatprep.subr.bf16.mxu0 %v6125_v23  ;;  %4699 = vmatprep.subr.bf16.mxu1 %v7524_v36  ;;  %v6539_v27 = vld [vmem:[%s7409_s10 + $0x94] ss:$12 sps:$4 sm:$0xff]   ;;  %v7562_v23 = vld [vmem:[#allocation28_spill] sm:$0xff] }
 0xa16   :  { %2218 = vmatpush1.bf16.msra.mxu0 %v6135_v29  ;;  %4700 = vmatpush3.bf16.msra.mxu1 %v6140_v6  ;;  %v6548_v29 = vld [vmem:[%s7409_s10 + $0x90] ss:$12 sps:$4 sm:$0xff]  }
 0xa17   :  { %2219 = vmatprep.subr.bf16.mxu0 %v6147_v3  ;;  %4701 = vmatprep.subr.bf16.mxu1 %v7524_v36  ;;  %v6554_v6 = vld [vmem:[%s7409_s10 + $0x7c] ss:$12 sps:$4 sm:$0xff]  }
 0xa18   :  { %v7563_v3 = vld [vmem:[#allocation30_spill] sm:$0xff] }
 0xa1a   :  { %2220 = vmatpush1.bf16.msra.mxu0 %v6154_v2  ;;  %4702 = vmatpush3.bf16.msra.mxu1 %v6159_v60  ;;  %v6562_v2 = vld [vmem:[%s7409_s10 + $0x78] ss:$12 sps:$4 sm:$0xff]  }
 0xa1b   :  { %2221 = vmatprep.subr.bf16.mxu0 %v6166_v10  ;;  %4703 = vmatprep.subr.bf16.mxu1 %v7524_v36  ;;  %v6568_v60 = vld [vmem:[%s7409_s10 + $0x64] ss:$12 sps:$4 sm:$0xff]  }
 0xa1c   :  { %v7564_v10 = vld [vmem:[#allocation31_spill] sm:$0xff] }
 0xa1e   :  { %2222 = vmatpush1.bf16.msra.mxu0 %v6173_v62  ;;  %4704 = vmatpush3.bf16.msra.mxu1 %v6178_v34  ;;  %v6576_v62 = vld [vmem:[%s7409_s10 + $0x60] ss:$12 sps:$4 sm:$0xff]  }
 0xa1f   :  { %2223 = vmatprep.subr.bf16.mxu0 %v6185_v16  ;;  %4705 = vmatprep.subr.bf16.mxu1 %v7524_v36  ;;  %v6582_v34 = vld [vmem:[%s7409_s10 + $0x4c] ss:$12 sps:$4 sm:$0xff]  }
 0xa20   :  { %v7565_v16 = vld [vmem:[#allocation32_spill] sm:$0xff] }
 0xa22   :  { %2224 = vmatpush1.bf16.msra.mxu0 %v6192_v38  ;;  %4706 = vmatpush3.bf16.msra.mxu1 %v6197_v59  ;;  %v6590_v38 = vld [vmem:[%s7409_s10 + $0x48] ss:$12 sps:$4 sm:$0xff]  }
 0xa23   :  { %2225 = vmatprep.subr.bf16.mxu0 %v6204_v58  ;;  %4707 = vmatprep.subr.bf16.mxu1 %v7524_v36  ;;  %v6596_v59 = vld [vmem:[%s7409_s10 + $0x34] ss:$12 sps:$4 sm:$0xff]  }
 0xa24   :  { %v7566_v58 = vld [vmem:[#allocation33_spill] sm:$0xff] }
 0xa26   :  { %2226 = vmatpush1.bf16.msra.mxu0 %v6211_v37  ;;  %4708 = vmatpush3.bf16.msra.mxu1 %v6216_v5  ;;  %v6604_v37 = vld [vmem:[%s7409_s10 + $0x30] ss:$12 sps:$4 sm:$0xff]  }
 0xa27   :  { %2227 = vmatprep.subr.bf16.mxu0 %v6223_v63  ;;  %4709 = vmatprep.subr.bf16.mxu1 %v7524_v36  ;;  %v6610_v5 = vld [vmem:[%s7409_s10 + $0x1c] ss:$12 sps:$4 sm:$0xff]  }
 0xa28   :  { %v7567_v63 = vld [vmem:[#allocation34_spill] sm:$0xff] }
 0xa2a   :  { %2228 = vmatpush1.bf16.msra.mxu0 %v6230_v52  ;;  %4710 = vmatpush3.bf16.msra.mxu1 %v7560_v61  ;;  %v6618_v52 = vld [vmem:[%s7409_s10 + $0x18] ss:$12 sps:$4 sm:$0xff]  }
 0xa2b   :  { %4715 = vmatprep.subr.bf16.mxu0 %v7524_v36  ;;  %2743 = vmatprep.subr.bf16.mxu1 %v6521_v39 }
 0xa2d   :  { %2246 = vmatmul.mubr.bf16.vlgmr.msra.gmra.mxu0 %v6370_v11  ;;  %4712 = vmatmul.mubr.bf16.vlgmr.msra.gmra.mxu1 %v6370_v11  ;;  %v6624_v11 = vld [vmem:[%s7409_s10 + $0x4] ss:$12 sps:$4 sm:$0xff]  }
 0xa2e   :  { %4716 = vmatpush3.bf16.msra.mxu0 %v7561_v25  ;;  %4731 = vmatprep.mubr.msk.bf16.mxu0 %vm5364_vm0, %v7524_v36 }
 0xa2f   :  { %4717 = vmatprep.subr.bf16.mxu0 %v7524_v36  ;;  %2744 = vmatpush1.bf16.msra.mxu1 %v6533_v24 }
 0xa30   :  { %2745 = vmatprep.subr.bf16.mxu1 %v6539_v27  ;;  %2775 = vmatprep.mubr.bf16.mxu1 %v7525_v28 }
 0xa32   :  { %4718 = vmatpush3.bf16.msra.mxu0 %v7562_v23 }
 0xa33   :  { %4719 = vmatprep.subr.bf16.mxu0 %v7524_v36  ;;  %2746 = vmatpush1.bf16.msra.mxu1 %v6548_v29 }
 0xa34   :  { %2747 = vmatprep.subr.bf16.mxu1 %v6554_v6 }
 0xa36   :  { %4720 = vmatpush3.bf16.msra.mxu0 %v7563_v3 }
 0xa37   :  { %4721 = vmatprep.subr.bf16.mxu0 %v7524_v36  ;;  %2748 = vmatpush1.bf16.msra.mxu1 %v6562_v2 }
 0xa38   :  { %2749 = vmatprep.subr.bf16.mxu1 %v6568_v60 }
 0xa3a   :  { %4722 = vmatpush3.bf16.msra.mxu0 %v7564_v10 }
 0xa3b   :  { %4723 = vmatprep.subr.bf16.mxu0 %v7524_v36  ;;  %2750 = vmatpush1.bf16.msra.mxu1 %v6576_v62 }
 0xa3c   :  { %2751 = vmatprep.subr.bf16.mxu1 %v6582_v34 }
 0xa3e   :  { %4724 = vmatpush3.bf16.msra.mxu0 %v7565_v16 }
 0xa3f   :  { %4725 = vmatprep.subr.bf16.mxu0 %v7524_v36  ;;  %2752 = vmatpush1.bf16.msra.mxu1 %v6590_v38 }
 0xa40   :  { %2753 = vmatprep.subr.bf16.mxu1 %v6596_v59 }
 0xa42   :  { %4726 = vmatpush3.bf16.msra.mxu0 %v7566_v58 }
 0xa43   :  { %4727 = vmatprep.subr.bf16.mxu0 %v7524_v36  ;;  %2754 = vmatpush1.bf16.msra.mxu1 %v6604_v37 }
 0xa44   :  { %2755 = vmatprep.subr.bf16.mxu1 %v6610_v5 }
 0xa46   :  { %4728 = vmatpush3.bf16.msra.mxu0 %v7567_v63 }
 0xa47   :  { %4729 = vmatprep.subr.bf16.mxu0 %v7524_v36  ;;  %2756 = vmatpush1.bf16.msra.mxu1 %v6618_v52 }
 0xa48   :  { %2757 = vmatprep.subr.bf16.mxu1 %v6624_v11 }
 0xa4a   :  { %4730 = vmatpush3.bf16.msra.mxu0 %v7568_v1  ;;  %v2128_v1 = vrot.slane %v6361_v54, 4  ;;  %v6658_v54 = vld [vmem:[%s7409_s10 + $0xb0] ss:$12 sps:$4 sm:$0xff]  }
 0xa4b   :  { %4735 = vmatprep.subr.bf16.mxu0 %v7524_v36  ;;  %2758 = vmatpush1.bf16.msra.mxu1 %v6632_v21 }
 0xa4c   :  { %2824 = vmatprep.subr.bf16.mxu1 %v6638_v15 }
 0xacd   :  { %v2166_v30 = vpop.f32.mrf.mxu0  ;;  %v2207_v49 = vpop.f32.mrf.mxu1 }
 0xace   :  { %v2167_v44 = vadd.f32 %v2166_v30, %v2126_v48 }
 0xacf   :  { %v2168_v7 = vpop.f32.mrf.mxu0  ;;  %v4693_v43 = vpop.f32.mrf.mxu1 }
 0xad0   :  { %v2169_v25 = vadd.f32 %v2168_v7, %v2127_v33  ;;  %v2208_v43 = vadd.f32 %v2207_v49, %v2128_v1  ;;  %v6667_v49 = vld [vmem:[%s7409_s10 + $0x98] ss:$12 sps:$4 sm:$0xff]  }
 0xad1   :  { %v2170_v31 = vpop.f32.mrf.mxu0  ;;  %v2210_v0 = vpop.f32.mrf.mxu1 }
 0xad3   :  { %v2171_v51 = vpop.f32.mrf.mxu0  ;;  %v4694_v32 = vpop.f32.mrf.mxu1 }
 0xaed   :  { %v2247_v13 = vpop.f32.mrf.mxu0  ;;  %v2288_v41 = vpop.f32.mrf.mxu1 }
 0xaee   :  { %v2248_v56 = vadd.f32 %v2247_v13, %v7570_v57  ;;  %v2289_v30 = vadd.f32 %v2288_v41, %v6357_v19  ;;  %v6674_v41 = vld [vmem:[%s7409_s10 + $0x80] ss:$12 sps:$4 sm:$0xff]  }
 0xaef   :  { %v2249_v40 = vpop.f32.mrf.mxu0  ;;  %v4713_v22 = vpop.f32.mrf.mxu1 }
 0xaf0   :  { %v2294_v47 = vadd.f32 %v2248_v56, %v2167_v44  ;;  %v2250_v20 = vadd.f32 %v2249_v40, %v6348_v45  ;;  %v6681_v56 = vld [vmem:[%s7409_s10 + $0x68] ss:$12 sps:$4 sm:$0xff]   ;;  %v6688_v40 = vld [vmem:[%s7409_s10 + $0x50] ss:$12 sps:$4 sm:$0xff]   ;;  %v6695_v22 = vld [vmem:[%s7409_s10 + $0x38] ss:$12 sps:$4 sm:$0xff]  }
 0xaf1   :  { %v2251_v14 = vpop.f32.mrf.mxu0  ;;  %v2291_v26 = vpop.f32.mrf.mxu1 }
 0xaf2   :  { %v4243_v12 = vmul.f32 -1.442695, %v2294_v47  ;;  %v2301_v23 = vadd.f32 %v2250_v20, %v2169_v25  ;;  %v6702_v47 = vld [vmem:[%s7409_s10 + $0x20] ss:$12 sps:$4 sm:$0xff]   ;;  %v6709_v14 = vld [vmem:[%s7409_s10 + $0x8] ss:$12 sps:$4 sm:$0xff]  }
 0xaf3   :  { %v2252_v42 = vpop.f32.mrf.mxu0  ;;  %v4714_v61 = vpop.f32.mrf.mxu1  ;;  %7572 = vst [vmem:[#allocation14_spill] sm:$0xff] %v6709_v14  ;;  %v7573_v20 = vld [vmem:[#allocation5_spill] sm:$0xff] }
 0xaf4   :  { %5180 = vpow2.f32 %v4243_v12  ;;  %v4244_v3 = vmul.f32 -1.442695, %v2301_v23 }
 0xaf6   :  { %5182 = vpow2.f32 %v4244_v3 }
 0xb01   :  { %v5181_v10 = vpop.eup %5180 }
 0xb02   :  { %v2298_v16 = vadd.f32 1.0, %v5181_v10 }
 0xb03   :  { %v5183_v58 = vpop.eup %5182 }
 0xb04   :  { %5184 = vrcp.f32 %v2298_v16  ;;  %v2305_v63 = vadd.f32 1.0, %v5183_v58 }
 0xb06   :  { %5186 = vrcp.f32 %v2305_v63  ;;  %v7574_v63 = vld [vmem:[#allocation6_spill] sm:$0xff] }
 0xb11   :  { %v5185_v17 = vpop.eup %5184 }
 0xb12   :  { %v2308_v31 = vmul.f32 %v5185_v17, %v2289_v30  ;;  %v7575_v30 = vld [vmem:[#allocation9_spill] sm:$0xff] }
 0xb13   :  { %v5187_v7 = vpop.eup %5186 }
 0xb14   :  { %v2309_v0 = vadd.f32 %v2308_v31, %v2208_v43  ;;  %v2311_v51 = vsub.f32 1.0, %v5187_v7  ;;  %v2313_v48 = vmul.f32 %v5187_v7, %v6366_v8  ;;  %v7577_v7 = vld [vmem:[#allocation8_spill] sm:$0xff] }
 0xb16   :  { %5188 = vtanh.f32 %v2309_v0 }
 0xb23   :  { %v5189_v32 = vpop.eup %5188 }
 0xb24   :  { %v2312_v50 = vmul.f32 %v5189_v32, %v2311_v51 }
 0xb26   :  { %v6648_v13 = vadd.f32 %v2313_v48, %v2312_v50  ;;  %v7578_v50 = vld [vmem:[#allocation10_spill] sm:$0xff] }
 0xb28   :  { %7571 = vst [vmem:[#allocation15_spill] sm:$0xff] %v6648_v13  ;;  %v6652_v44 = vpack.c.bf16 %v6648_v13, %v6648_v13 }
 0xb2a   :  { %4732 = vmatmul.mubr.bf16.vlgmr.msra.gmra.mxu0 %v6652_v44 }
 0xb2b   :  { %4736 = vmatpush3.bf16.msra.mxu0 %v6658_v54  ;;  %4751 = vmatprep.mubr.msk.bf16.mxu0 %vm5364_vm0, %v7524_v36 }
 0xb2c   :  { %4737 = vmatprep.subr.bf16.mxu0 %v7524_v36 }
 0xb2f   :  { %4738 = vmatpush3.bf16.msra.mxu0 %v6667_v49 }
 0xb30   :  { %4739 = vmatprep.subr.bf16.mxu0 %v7524_v36 }
 0xb33   :  { %4740 = vmatpush3.bf16.msra.mxu0 %v6674_v41 }
 0xb34   :  { %4741 = vmatprep.subr.bf16.mxu0 %v7524_v36 }
 0xb37   :  { %4742 = vmatpush3.bf16.msra.mxu0 %v6681_v56 }
 0xb38   :  { %4743 = vmatprep.subr.bf16.mxu0 %v7524_v36 }
 0xb3b   :  { %4744 = vmatpush3.bf16.msra.mxu0 %v6688_v40 }
 0xb3c   :  { %4745 = vmatprep.subr.bf16.mxu0 %v7524_v36 }
 0xb3f   :  { %4746 = vmatpush3.bf16.msra.mxu0 %v6695_v22 }
 0xb40   :  { %4747 = vmatprep.subr.bf16.mxu0 %v7524_v36 }
 0xb43   :  { %4748 = vmatpush3.bf16.msra.mxu0 %v6702_v47 }
 0xb44   :  { %4749 = vmatprep.subr.bf16.mxu0 %v7524_v36 }
 0xb47   :  { %4750 = vmatpush3.bf16.msra.mxu0 %v6709_v14 }
 0xb48   :  { %4755 = vmatprep.subr.bf16.mxu0 %v7524_v36 }
 0xbea   :  { %v2350_v26 = vpop.f32.mrf.mxu0 }
 0xbeb   :  { %v2351_v33 = vadd.f32 %v6394_v9, %v2350_v26  ;;  %v7576_v9 = vld [vmem:[#allocation7_spill] sm:$0xff] }
 0xbec   :  { %v4733_v12 = vpop.f32.mrf.mxu0 }
 0xbed   :  { %v2363_v42 = vrot.slane %v2351_v33, %v7573_v20  ;;  %v7579_v33 = vld [vmem:[#allocation11_spill] sm:$0xff] }
 0xbee   :  { %v2353_v61 = vpop.f32.mrf.mxu0 }
 0xbef   :  { %v2364_v25 = vcombine.high %v2363_v42, %v2363_v42  ;;  %v2371_v23 = vrot.slane %v2363_v42, %v7573_v20 }
 0xbf0   :  { %v4734_v3 = vpop.f32.mrf.mxu0 }
 0xbf1   :  { %v2378_v10 = vrot.slane %v2364_v25, %v7573_v20  ;;  %v2384_v16 = vrot.slane %v2371_v23, %v5687_v46  ;;  %v2379_v43 = vcombine.high %v2371_v23, %v2371_v23  ;;  %v7580_v25 = vld [vmem:[#allocation41_spill] sm:$0xff]  ;;  %v7581_v3 = vld [vmem:[#allocation12_spill] sm:$0xff] }
 0xbf3   :  { %v2388_v58 = vrot.slane %v2378_v10, %v5687_v46  ;;  %v2401_v1 = vadd.f32 %v2384_v16, %v7574_v63  ;;  %v2402_v17 = vadd.f32 %v2384_v16, %v7575_v30  ;;  %v2392_v0 = vrot.slane %v2379_v43, %v5687_v46 }
 0xbf4   :  { %v2380_v32 = vcombine.high %v2378_v10, %v2378_v10  ;;  %v7582_v10 = vld [vmem:[#allocation13_spill] sm:$0xff] }
 0xbf5   :  { %v2403_v31 = vadd.f32 %v2388_v58, %v7576_v9  ;;  %5190 = vtanh.f32 %v2401_v1  ;;  %v2404_v51 = vadd.f32 %v2388_v58, %v7577_v7  ;;  %v2405_v48 = vadd.f32 %v2392_v0, %v7578_v50 }
 0xbf6   :  { %5192 = vtanh.f32 %v2402_v17  ;;  %v2396_v26 = vrot.slane %v2380_v32, %v5687_v46  ;;  %v2406_v12 = vadd.f32 %v2392_v0, %v7579_v33 }
 0xbf7   :  { %5194 = vtanh.f32 %v2403_v31 }
 0xbf8   :  { %5196 = vtanh.f32 %v2404_v51  ;;  %v2407_v16 = vadd.f32 %v2396_v26, %v7581_v3  ;;  %v2408_v17 = vadd.f32 %v2396_v26, %v7582_v10 }
 0xbf9   :  { %5198 = vtanh.f32 %v2405_v48 }
 0xbfa   :  { %5200 = vtanh.f32 %v2406_v12 }
 0xbfb   :  { %5202 = vtanh.f32 %v2407_v16 }
 0xbfc   :  { %5204 = vtanh.f32 %v2408_v17 }
 0xc02   :  { %v5191_v42 = vpop.eup %5190 }
 0xc03   :  { %v5193_v61 = vpop.eup %5192  ;;  %v2417_v23 = vmul.f32 %v7580_v25, %v5191_v42 }
 0xc04   :  { %v2418_v1 = vmul.f32 %v7580_v25, %v5193_v61  ;;  %v5195_v58 = vpop.eup %5194 }
 0xc05   :  { %2425 = vadd.xlane.f32.xlu0 %v2417_v23  ;;  %v2419_v43 = vmul.f32 %v7580_v25, %v5195_v58  ;;  %v5197_v31 = vpop.eup %5196 }
 0xc06   :  { %2427 = vadd.xlane.f32.xlu1 %v2418_v1  ;;  %v2420_v0 = vmul.f32 %v7580_v25, %v5197_v31  ;;  %v5199_v51 = vpop.eup %5198 }
 0xc07   :  { %v2421_v32 = vmul.f32 %v7580_v25, %v5199_v51  ;;  %v5201_v48 = vpop.eup %5200 }
 0xc08   :  { %v2422_v12 = vmul.f32 %v7580_v25, %v5201_v48  ;;  %v5203_v42 = vpop.eup %5202 }
 0xc09   :  { %v2423_v26 = vmul.f32 %v7580_v25, %v5203_v42  ;;  %v5205_v61 = vpop.eup %5204 }
 0xc0a   :  { %2429 = vadd.xlane.f32.xlu1 %v2419_v43  ;;  %v2424_v23 = vmul.f32 %v7580_v25, %v5205_v61 }
 0xc0e   :  { %2431 = vadd.xlane.f32.xlu1 %v2420_v0  ;;  %v7583_v0 = vld [vmem:[#allocation16_spill] sm:$0xff] }
 0xc12   :  { %2433 = vadd.xlane.f32.xlu1 %v2421_v32 }
 0xc16   :  { %2435 = vadd.xlane.f32.xlu1 %v2422_v12 }
 0xc1a   :  { %2437 = vadd.xlane.f32.xlu1 %v2423_v26 }
 0xc1e   :  { %2439 = vadd.xlane.f32.xlu1 %v2424_v23 }
 0xc8e   :  { %v2426_v43 = vpop.xlane.xlu0 %2425 }
 0xc8f   :  { %v2428_v16 = vpop.xlane.xlu1 %2427  ;;  %v2441_v12 = vadd.f32 %v2426_v43, %v7583_v0 }
 0xc90   :  { %v2442_v48 = vadd.f32 %v2428_v16, %v7583_v0 }
 0xc91   :  { %v2460_v10 = vrot.slane %v2441_v12, %v7550_v55 }
 0xc92   :  { %v2464_v8 = vrot.slane %v2442_v48, %v7549_v35 }
 0xc93   :  { %v2430_v1 = vpop.xlane.xlu1 %2429 }
 0xc94   :  { %v2443_v42 = vadd.f32 %v2430_v1, %v7583_v0  ;;  %v2465_v33 = vsel %vm895_vm4, %v2464_v8, %v2460_v10 }
 0xc97   :  { %v2432_v58 = vpop.xlane.xlu1 %2431 }
 0xc98   :  { %v2444_v51 = vadd.f32 %v2432_v58, %v7583_v0  ;;  %v2469_v58 = vrot.slane %v2443_v42, %v7550_v55 }
 0xc9a   :  { %v2473_v61 = vrot.slane %v2444_v51, %v7549_v35 }
 0xc9b   :  { %v2434_v17 = vpop.xlane.xlu1 %2433 }
 0xc9c   :  { %v2445_v26 = vadd.f32 %v2434_v17, %v7583_v0  ;;  %v2474_v1 = vsel %vm895_vm4, %v2473_v61, %v2469_v58 }
 0xc9d   :  { %v2493_v9 = vsel %vm145_vm1, %v2474_v1, %v2465_v33 }
 0xc9e   :  { %v2478_v16 = vrot.slane %v2445_v26, %v7550_v55 }
 0xc9f   :  { %v2436_v31 = vpop.xlane.xlu1 %2435 }
 0xca0   :  { %v2446_v32 = vadd.f32 %v2436_v31, %v7583_v0 }
 0xca2   :  { %v2482_v23 = vrot.slane %v2446_v32, %v7549_v35 }
 0xca3   :  { %v2438_v25 = vpop.xlane.xlu1 %2437 }
 0xca4   :  { %v2447_v31 = vadd.f32 %v2438_v25, %v7583_v0  ;;  %v2483_v3 = vsel %vm895_vm4, %v2482_v23, %v2478_v16 }
 0xca5   :  { %v2494_v25 = vsel %vm147_vm2, %v2483_v3, %v2493_v9 }
 0xca6   :  { %v2487_v50 = vrot.slane %v2447_v31, %v7550_v55 }
 0xca7   :  { %v2440_v43 = vpop.xlane.xlu1 %2439 }
 0xca8   :  { %v2448_v17 = vadd.f32 %v2440_v43, %v7583_v0 }
 0xcaa   :  { %v2491_v7 = vrot.slane %v2448_v17, %v7549_v35 }
 0xcac   :  { %v2492_v30 = vsel %vm895_vm4, %v2491_v7, %v2487_v50 }
 0xcad   :  { %v2495_v63 = vsel %vm149_vm3, %v2492_v30, %v2494_v25 }
 0xcae   :  { %v2497_v61 = vsel %vm928_vm5, %v2495_v63, -inf }
 0xcaf   :  { %2498 = vmax.xlane.f32.xlu1 %v2497_v61 }
 0xd38   :  { %v2499_v58 = vpop.xlane.xlu1 %2498 }
 0xd39   :  { %v2504_v23 = vrot.slane %v2499_v58, %v5687_v46  ;;  %v2508_v8 = vrot.slane %v2499_v58, %v5790_v4  ;;  %v2512_v10 = vrot.slane %v2499_v58, %v5796_v18  ;;  %v2516_v9 = vrot.slane %v2499_v58, %v7551_v53 }
 0xd3b   :  { %v2521_v16 = vsub.f32 %v2441_v12, %v2504_v23  ;;  %v2522_v43 = vsub.f32 %v2442_v48, %v2504_v23  ;;  %v2524_v0 = vsub.f32 %v2444_v51, %v2508_v8  ;;  %v2523_v33 = vsub.f32 %v2443_v42, %v2508_v8 }
 0xd3c   :  { %v2526_v50 = vsub.f32 %v2446_v32, %v2512_v10  ;;  %v2525_v63 = vsub.f32 %v2445_v26, %v2512_v10  ;;  %v2528_v25 = vsub.f32 %v2448_v17, %v2516_v9  ;;  %v2527_v20 = vsub.f32 %v2447_v31, %v2516_v9 }
 0xd3d   :  { %v2529_v1 = vmul.f32 1.442695, %v2521_v16  ;;  %v2531_v7 = vmul.f32 1.442695, %v2522_v43  ;;  %v2535_v30 = vmul.f32 1.442695, %v2524_v0 }
 0xd3e   :  { %v2533_v3 = vmul.f32 1.442695, %v2523_v33  ;;  %v2539_v61 = vmul.f32 1.442695, %v2526_v50  ;;  %v2537_v14 = vmul.f32 1.442695, %v2525_v63 }
 0xd3f   :  { %5206 = vpow2.f32 %v2529_v1  ;;  %v2543_v48 = vmul.f32 1.442695, %v2528_v25  ;;  %v2541_v51 = vmul.f32 1.442695, %v2527_v20 }
 0xd40   :  { %5208 = vpow2.f32 %v2531_v7 }
 0xd41   :  { %5210 = vpow2.f32 %v2535_v30 }
 0xd42   :  { %5212 = vpow2.f32 %v2533_v3 }
 0xd43   :  { %5214 = vpow2.f32 %v2539_v61 }
 0xd44   :  { %5216 = vpow2.f32 %v2537_v14 }
 0xd45   :  { %5218 = vpow2.f32 %v2543_v48 }
 0xd46   :  { %5220 = vpow2.f32 %v2541_v51 }
 0xd4c   :  { %v5207_v12 = vpop.eup %5206 }
 0xd4d   :  { %v5209_v42 = vpop.eup %5208  ;;  %2554 = vperm.xlu0 %4939, %v5207_v12  }
 0xd4e   :  { %2557 = vperm.xlu1 %4940, %v5209_v42   ;;  %v5211_v0 = vpop.eup %5210 }
 0xd4f   :  { %v5213_v32 = vpop.eup %5212 }
 0xd50   :  { %v5215_v26 = vpop.eup %5214 }
 0xd51   :  { %2563 = vperm.xlu0 %4939, %v5211_v0   ;;  %v5217_v17 = vpop.eup %5216 }
 0xd52   :  { %2560 = vperm.xlu1 %4940, %v5213_v32   ;;  %v5219_v31 = vpop.eup %5218 }
 0xd53   :  { %v5221_v58 = vpop.eup %5220 }
 0xd55   :  { %2569 = vperm.xlu0 %4939, %v5215_v26  }
 0xd56   :  { %2566 = vperm.xlu1 %4940, %v5217_v17  }
 0xd59   :  { %2575 = vperm.xlu0 %4939, %v5219_v31  }
 0xd5a   :  { %2572 = vperm.xlu1 %4940, %v5221_v58  }
 0xdc8   :  { %v2555_v14 = vpop.permute.xlu0 %2554 }
 0xdc9   :  { %v2558_v20 = vpop.permute.xlu1 %2557  ;;  %v2580_v9 = vrot.slane %v2555_v14, %v7550_v55 }
 0xdca   :  { %v2584_v7 = vrot.slane %v2558_v20, %v7549_v35 }
 0xdcc   :  { %v2564_v23 = vpop.permute.xlu0 %2563  ;;  %v2585_v48 = vsel %vm895_vm4, %v2584_v7, %v2580_v9 }
 0xdcd   :  { %v2561_v8 = vpop.permute.xlu1 %2560  ;;  %v2593_v16 = vrot.slane %v2564_v23, %v7549_v35 }
 0xdce   :  { %v2589_v10 = vrot.slane %v2561_v8, %v7550_v55 }
 0xdd0   :  { %v2570_v43 = vpop.permute.xlu0 %2569  ;;  %v2594_v30 = vsel %vm895_vm4, %v2593_v16, %v2589_v10 }
 0xdd1   :  { %v2567_v33 = vpop.permute.xlu1 %2566  ;;  %v2602_v1 = vrot.slane %v2570_v43, %v7549_v35  ;;  %v2613_v23 = vsel %vm145_vm1, %v2594_v30, %v2585_v48 }
 0xdd2   :  { %v2598_v50 = vrot.slane %v2567_v33, %v7550_v55 }
 0xdd4   :  { %v2576_v63 = vpop.permute.xlu0 %2575  ;;  %v2603_v3 = vsel %vm895_vm4, %v2602_v1, %v2598_v50 }
 0xdd5   :  { %v2573_v25 = vpop.permute.xlu1 %2572  ;;  %v2611_v61 = vrot.slane %v2576_v63, %v7549_v35  ;;  %v2614_v14 = vsel %vm147_vm2, %v2603_v3, %v2613_v23 }
 0xdd6   :  { %v2607_v51 = vrot.slane %v2573_v25, %v7550_v55 }
 0xdd8   :  { %v2612_v20 = vsel %vm895_vm4, %v2611_v61, %v2607_v51 }
 0xdd9   :  { %v2615_v8 = vsel %vm149_vm3, %v2612_v20, %v2614_v14  ;;  %v6800_v20 = vld [vmem:[%s7498_s26 + $0x10] sm:$0xff] }
 0xdda   :  { %v2617_v10 = vsel %vm928_vm5, %v2615_v8, 0.0  ;;  %7586 = vst [vmem:[#allocation19_spill] sm:$0xff] %v6800_v20  ;;  %v6806_v8 = vld [vmem:[%s7498_s26 + $0x18] sm:$0xff] }
 0xddb   :  { %2618 = vadd.xlane.f32.xlu1 %v2617_v10  ;;  %7587 = vst [vmem:[#allocation20_spill] sm:$0xff] %v6806_v8 }
 0xe64   :  { %v2619_v16 = vpop.xlane.xlu1 %2618 }
 0xe65   :  { %5222 = vrcp.f32 %v2619_v16 }
 0xe72   :  { %v5223_v43 = vpop.eup %5222 }
 0xe73   :  { %v2625_v33 = vrot.slane %v5223_v43, %v5687_v46  ;;  %v2629_v9 = vrot.slane %v5223_v43, %v5790_v4  ;;  %v2633_v63 = vrot.slane %v5223_v43, %v5796_v18  ;;  %v2637_v61 = vrot.slane %v5223_v43, %v7551_v53 }
 0xe75   :  { %v2642_v1 = vmul.f32 %v5207_v12, %v2625_v33  ;;  %v2643_v7 = vmul.f32 %v5209_v42, %v2625_v33  ;;  %v2644_v50 = vmul.f32 %v5213_v32, %v2629_v9  ;;  %v2645_v30 = vmul.f32 %v5211_v0, %v2629_v9  ;;  %v6788_v0 = vld [vmem:[%s7498_s26 + $0x8] sm:$0xff] }
 0xe76   :  { %v2646_v3 = vmul.f32 %v5217_v17, %v2633_v63  ;;  %v2647_v25 = vmul.f32 %v5215_v26, %v2633_v63  ;;  %v2648_v48 = vmul.f32 %v5221_v58, %v2637_v61  ;;  %v2649_v12 = vmul.f32 %v5219_v31, %v2637_v61  ;;  %7584 = vst [vmem:[#allocation17_spill] sm:$0xff] %v6788_v0  ;;  %v6794_v26 = vld [vmem:[%s7498_s26] sm:$0xff] }
 0xe77   :  { %2652 = vperm.xlu0 %4939, %v2642_v1   ;;  %7585 = vst [vmem:[#allocation18_spill] sm:$0xff] %v6794_v26 }
 0xe7b   :  { %2657 = vperm.xlu0 %4939, %v2643_v7  }
 0xe7f   :  { %2662 = vperm.xlu0 %4939, %v2644_v50  }
 0xe83   :  { %2667 = vperm.xlu0 %4939, %v2645_v30   ;;  %v6812_v30 = vld [vmem:[%s7498_s26 + $0x20] sm:$0xff] }
 0xe84   :  { %7588 = vst [vmem:[#allocation21_spill] sm:$0xff] %v6812_v30 }
 0xe87   :  { %2672 = vperm.xlu0 %4939, %v2646_v3   ;;  %v6818_v3 = vld [vmem:[%s7498_s26 + $0x28] sm:$0xff] }
 0xe88   :  { %7589 = vst [vmem:[#allocation22_spill] sm:$0xff] %v6818_v3 }
 0xe8b   :  { %2677 = vperm.xlu0 %4939, %v2647_v25  }
 0xe8f   :  { %2682 = vperm.xlu0 %4939, %v2648_v48  }
 0xe93   :  { %2687 = vperm.xlu0 %4939, %v2649_v12  }
 0xef2   :  { %v2653_v42 = vpop.permute.xlu0 %2652 }
 0xef3   :  { %v2690_v17 = vmul.f32 %v6794_v26, %v2653_v42 }
 0xef6   :  { %v2658_v51 = vpop.permute.xlu0 %2657 }
 0xef7   :  { %v2691_v32 = vmul.f32 %v6788_v0, %v2658_v51 }
 0xef9   :  { %v2698_v31 = vadd.f32 %v2691_v32, %v2690_v17 }
 0xefa   :  { %v2663_v23 = vpop.permute.xlu0 %2662 }
 0xefb   :  { %v2692_v14 = vmul.f32 %v6800_v20, %v2663_v23  ;;  %v2699_v33 = vrot.slane %v2698_v31, 4 }
 0xefd   :  { %v2700_v50 = vadd.f32 %v2699_v33, %v2698_v31 }
 0xefe   :  { %v2668_v58 = vpop.permute.xlu0 %2667 }
 0xeff   :  { %v2693_v10 = vmul.f32 %v6806_v8, %v2668_v58  ;;  %v2701_v42 = vrot.slane %v2700_v50, 2 }
 0xf01   :  { %v2705_v16 = vadd.f32 %v2693_v10, %v2692_v14  ;;  %v2702_v58 = vadd.f32 %v2701_v42, %v2700_v50  ;;  %v6824_v14 = vld [vmem:[%s7498_s26 + $0x30] sm:$0xff] }
 0xf02   :  { %v2673_v43 = vpop.permute.xlu0 %2672  ;;  %7590 = vst [vmem:[#allocation23_spill] sm:$0xff] %v6824_v14 }
 0xf03   :  { %v2706_v1 = vrot.slane %v2705_v16, 4  ;;  %v2694_v63 = vmul.f32 %v6812_v30, %v2673_v43 }
 0xf05   :  { %v2707_v7 = vadd.f32 %v2706_v1, %v2705_v16  ;;  %v6830_v16 = vld [vmem:[%s7498_s26 + $0x38] sm:$0xff] }
 0xf06   :  { %v2678_v9 = vpop.permute.xlu0 %2677  ;;  %7591 = vst [vmem:[#allocation24_spill] sm:$0xff] %v6830_v16 }
 0xf07   :  { %v2695_v25 = vmul.f32 %v6818_v3, %v2678_v9  ;;  %v2708_v61 = vrot.slane %v2707_v7, 2  ;;  %v2703_v9 = vrot.slane %v2702_v58, 1 }
 0xf09   :  { %v2712_v48 = vadd.f32 %v2695_v25, %v2694_v63  ;;  %v2709_v23 = vadd.f32 %v2708_v61, %v2707_v7  ;;  %v2704_v42 = vadd.f32 %v2703_v9, %v2702_v58  ;;  %v6839_v58 = vld [vmem:[%s7410_s12 + $0xa8] ss:$12 sps:$4 sm:$0xff]  }
 0xf0a   :  { %v2683_v12 = vpop.permute.xlu0 %2682  ;;  %v6918_v9 = vld [vmem:[%s7410_s12 + $0x48] ss:$12 sps:$4 sm:$0xff]  }
 0xf0b   :  { %v2713_v51 = vrot.slane %v2712_v48, 4  ;;  %v2696_v10 = vmul.f32 %v6824_v14, %v2683_v12  ;;  %v2710_v33 = vrot.slane %v2709_v23, 1  ;;  %v2726_v30 = vpack.c.bf16 %v2704_v42, %v2704_v42  ;;  %v6956_v42 = vld [vmem:[%s7410_s12 + $0x18] ss:$12 sps:$4 sm:$0xff]  }
 0xf0d   :  { %v2714_v32 = vadd.f32 %v2713_v51, %v2712_v48  ;;  %v2711_v25 = vadd.f32 %v2710_v33, %v2709_v23  ;;  %v6899_v33 = vld [vmem:[%s7410_s12 + $0x60] ss:$12 sps:$4 sm:$0xff]  }
 0xf0e   :  { %v2688_v17 = vpop.permute.xlu0 %2687 }
 0xf0f   :  { %v2715_v31 = vrot.slane %v2714_v32, 2  ;;  %v2697_v43 = vmul.f32 %v6830_v16, %v2688_v17  ;;  %v2727_v3 = vpack.c.bf16 %v2711_v25, %v2711_v25  ;;  %v2734_v17 = vunpack.c.l.b16 %v2726_v30  ;;  %v6873_v30 = vld [vmem:[%s7410_s12 + $0x7c] ss:$12 sps:$4 sm:$0xff]  }
 0xf10   :  { %v6937_v25 = vld [vmem:[%s7410_s12 + $0x30] ss:$12 sps:$4 sm:$0xff]  }
 0xf11   :  { %v2716_v1 = vadd.f32 %v2715_v31, %v2714_v32  ;;  %v2719_v7 = vadd.f32 %v2697_v43, %v2696_v10  ;;  %v2735_v20 = vunpack.c.l.b16 %v2727_v3  ;;  %v6880_v3 = vld [vmem:[%s7410_s12 + $0x78] ss:$12 sps:$4 sm:$0xff]  }
 0xf13   :  { %v2717_v50 = vrot.slane %v2716_v1, 1  ;;  %v2720_v63 = vrot.slane %v2719_v7, 4  ;;  %v2738_v31 = vsel %vm145_vm1, %v2735_v20, %v2734_v17  ;;  %v6861_v20 = vld [vmem:[%s7410_s12 + $0x90] ss:$12 sps:$4 sm:$0xff]   ;;  %v6975_v17 = vld [vmem:[%s7410_s12] ss:$12 sps:$4 sm:$0xff]  }
 0xf15   :  { %v2721_v61 = vadd.f32 %v2720_v63, %v2719_v7  ;;  %v2718_v48 = vadd.f32 %v2717_v50, %v2716_v1  ;;  %v6905_v1 = vld [vmem:[%s7410_s12 + $0x68] ss:$12 sps:$4 sm:$0xff]   ;;  %v6911_v7 = vld [vmem:[%s7410_s12 + $0x4c] ss:$12 sps:$4 sm:$0xff]   ;;  %v6924_v50 = vld [vmem:[%s7410_s12 + $0x50] ss:$12 sps:$4 sm:$0xff]  }
 0xf16   :  { %v6930_v63 = vld [vmem:[%s7410_s12 + $0x34] ss:$12 sps:$4 sm:$0xff]  }
 0xf17   :  { %v2722_v51 = vrot.slane %v2721_v61, 2  ;;  %v2728_v14 = vpack.c.bf16 %v2718_v48, %v2718_v48  ;;  %v6949_v48 = vld [vmem:[%s7410_s12 + $0x1c] ss:$12 sps:$4 sm:$0xff]  }
 0xf19   :  { %v2723_v12 = vadd.f32 %v2722_v51, %v2721_v61  ;;  %v2736_v0 = vunpack.c.l.b16 %v2728_v14  ;;  %v6886_v14 = vld [vmem:[%s7410_s12 + $0x80] ss:$12 sps:$4 sm:$0xff]   ;;  %v6943_v61 = vld [vmem:[%s7410_s12 + $0x38] ss:$12 sps:$4 sm:$0xff]  }
 0xf1a   :  { %v6962_v51 = vld [vmem:[%s7410_s12 + $0x20] ss:$12 sps:$4 sm:$0xff]  }
 0xf1b   :  { %v2724_v8 = vrot.slane %v2723_v12, 1  ;;  %v2739_v10 = vsel %vm147_vm2, %v2736_v0, %v2738_v31  ;;  %v6851_v0 = vld [vmem:[%s7410_s12 + $0x94] ss:$12 sps:$4 sm:$0xff]   ;;  %v5353_v31 = vld [vmem:[%s7402_s6 + $0x38] sm:$0xff]  }
 0xf1d   :  { %v2725_v26 = vadd.f32 %v2724_v8, %v2723_v12  ;;  %v6867_v8 = vld [vmem:[%s7410_s12 + $0x98] ss:$12 sps:$4 sm:$0xff]  }
 0xf1e   :  { %v6968_v12 = vld [vmem:[%s7410_s12 + $0x4] ss:$12 sps:$4 sm:$0xff]  }
 0xf1f   :  { %v2729_v16 = vpack.c.bf16 %v2725_v26, %v2725_v26  ;;  %v6845_v26 = vld [vmem:[%s7410_s12 + $0xb0] ss:$12 sps:$4 sm:$0xff]  }
 0xf21   :  { %v2737_v32 = vunpack.c.l.b16 %v2729_v16  ;;  %v6892_v16 = vld [vmem:[%s7410_s12 + $0x64] ss:$12 sps:$4 sm:$0xff]  }
 0xf23   :  { %v2740_v23 = vsel %vm149_vm3, %v2737_v32, %v2739_v10  ;;  %v6981_v32 = vld [vmem:[%s7410_s12 + $0x8] ss:$12 sps:$4 sm:$0xff]  }
 0xf24   :  { %v2741_v43 = vpack.c.b16 %v2740_v23, %v2740_v23  ;;  %v7592_v23 = vld [vmem:[#allocation3_spill] sm:$0xff] }
 0xf26   :  { %2776 = vmatmul.mubr.bf16.vlgmr.msra.gmra.mxu1 %v2741_v43  ;;  %4752 = vmatmul.mubr.bf16.vlgmr.msra.gmra.mxu0 %v2741_v43 }
 0xf27   :  { %2825 = vmatpush1.bf16.msra.mxu1 %v6839_v58  ;;  %4756 = vmatpush3.bf16.msra.mxu0 %v6845_v26 }
 0xf28   :  { %2826 = vmatprep.subr.bf16.mxu1 %v6851_v0  ;;  %4757 = vmatprep.subr.bf16.mxu0 %v7524_v36 }
 0xf29   :  { %2856 = vmatprep.mubr.bf16.mxu1 %v7525_v28  ;;  %4771 = vmatprep.mubr.msk.bf16.mxu0 %vm5364_vm0, %v7524_v36 }
 0xf2b   :  { %2827 = vmatpush1.bf16.msra.mxu1 %v6861_v20  ;;  %4758 = vmatpush3.bf16.msra.mxu0 %v6867_v8 }
 0xf2c   :  { %2828 = vmatprep.subr.bf16.mxu1 %v6873_v30  ;;  %4759 = vmatprep.subr.bf16.mxu0 %v7524_v36 }
 0xf2f   :  { %2829 = vmatpush1.bf16.msra.mxu1 %v6880_v3  ;;  %4760 = vmatpush3.bf16.msra.mxu0 %v6886_v14 }
 0xf30   :  { %2830 = vmatprep.subr.bf16.mxu1 %v6892_v16  ;;  %4761 = vmatprep.subr.bf16.mxu0 %v7524_v36 }
 0xf33   :  { %2831 = vmatpush1.bf16.msra.mxu1 %v6899_v33  ;;  %4762 = vmatpush3.bf16.msra.mxu0 %v6905_v1 }
 0xf34   :  { %2832 = vmatprep.subr.bf16.mxu1 %v6911_v7  ;;  %4763 = vmatprep.subr.bf16.mxu0 %v7524_v36 }
 0xf37   :  { %2833 = vmatpush1.bf16.msra.mxu1 %v6918_v9  ;;  %4764 = vmatpush3.bf16.msra.mxu0 %v6924_v50 }
 0xf38   :  { %2834 = vmatprep.subr.bf16.mxu1 %v6930_v63  ;;  %4765 = vmatprep.subr.bf16.mxu0 %v7524_v36 }
 0xf3b   :  { %2835 = vmatpush1.bf16.msra.mxu1 %v6937_v25  ;;  %4766 = vmatpush3.bf16.msra.mxu0 %v6943_v61 }
 0xf3c   :  { %2836 = vmatprep.subr.bf16.mxu1 %v6949_v48  ;;  %4767 = vmatprep.subr.bf16.mxu0 %v7524_v36 }
 0xf3f   :  { %2837 = vmatpush1.bf16.msra.mxu1 %v6956_v42  ;;  %4768 = vmatpush3.bf16.msra.mxu0 %v6962_v51 }
 0xf40   :  { %2838 = vmatprep.subr.bf16.mxu1 %v6968_v12  ;;  %4769 = vmatprep.subr.bf16.mxu0 %v7524_v36 }
 0xf43   :  { %2839 = vmatpush1.bf16.msra.mxu1 %v6975_v17  ;;  %4770 = vmatpush3.bf16.msra.mxu0 %v6981_v32 }
 0xf44   :  { %4775 = vmatprep.subr.bf16.mxu1 %v7524_v36  ;;  %3363 = vmatprep.subr.bf16.mxu0 %v6521_v39  ;;  %v5354_v39 = vld [vmem:[%s7402_s6 + $0x30] sm:$0xff]  }
 0xf46   :  { %2857 = vmatmul.mubr.bf16.vlgmr.msra.gmra.mxu1 %v6652_v44  ;;  %4772 = vmatmul.mubr.bf16.vlgmr.msra.gmra.mxu0 %v6652_v44  ;;  %v5355_v44 = vld [vmem:[%s7402_s6 + $0x28] sm:$0xff]  }
 0xf47   :  { %4776 = vmatpush3.bf16.msra.mxu1 %v5353_v31  ;;  %4791 = vmatprep.mubr.msk.bf16.mxu1 %vm5364_vm0, %v7524_v36 }
 0xf48   :  { %4777 = vmatprep.subr.bf16.mxu1 %v7524_v36  ;;  %3364 = vmatpush1.bf16.msra.mxu0 %v6533_v24  ;;  %v5356_v24 = vld [vmem:[%s7402_s6 + $0x20] sm:$0xff]  }
 0xf49   :  { %3365 = vmatprep.subr.bf16.mxu0 %v6539_v27  ;;  %3395 = vmatprep.mubr.bf16.mxu0 %v7525_v28  ;;  %v5357_v27 = vld [vmem:[%s7402_s6 + $0x18] sm:$0xff]  }
 0xf4b   :  { %4778 = vmatpush3.bf16.msra.mxu1 %v5354_v39 }
 0xf4c   :  { %4779 = vmatprep.subr.bf16.mxu1 %v7524_v36  ;;  %3366 = vmatpush1.bf16.msra.mxu0 %v6548_v29  ;;  %v5358_v29 = vld [vmem:[%s7402_s6 + $0x10] sm:$0xff]  }
 0xf4d   :  { %3367 = vmatprep.subr.bf16.mxu0 %v6554_v6  ;;  %v5359_v6 = vld [vmem:[%s7402_s6 + $0x8] sm:$0xff]  }
 0xf4f   :  { %4780 = vmatpush3.bf16.msra.mxu1 %v5355_v44 }
 0xf50   :  { %4781 = vmatprep.subr.bf16.mxu1 %v7524_v36  ;;  %3368 = vmatpush1.bf16.msra.mxu0 %v6562_v2  ;;  %v5360_v2 = vld [vmem:[%s7402_s6] sm:$0xff]  }
 0xf51   :  { %3369 = vmatprep.subr.bf16.mxu0 %v6568_v60 }
 0xf53   :  { %4782 = vmatpush3.bf16.msra.mxu1 %v5356_v24 }
 0xf54   :  { %4783 = vmatprep.subr.bf16.mxu1 %v7524_v36  ;;  %3370 = vmatpush1.bf16.msra.mxu0 %v6576_v62 }
 0xf55   :  { %3371 = vmatprep.subr.bf16.mxu0 %v6582_v34 }
 0xf57   :  { %4784 = vmatpush3.bf16.msra.mxu1 %v5357_v27 }
 0xf58   :  { %4785 = vmatprep.subr.bf16.mxu1 %v7524_v36  ;;  %3372 = vmatpush1.bf16.msra.mxu0 %v6590_v38 }
 0xf59   :  { %3373 = vmatprep.subr.bf16.mxu0 %v6596_v59 }
 0xf5b   :  { %4786 = vmatpush3.bf16.msra.mxu1 %v5358_v29  ;;  %v7594_v29 = vld [vmem:[#allocation4_spill] sm:$0xff] }
 0xf5c   :  { %4787 = vmatprep.subr.bf16.mxu1 %v7524_v36  ;;  %3374 = vmatpush1.bf16.msra.mxu0 %v6604_v37 }
 0xf5d   :  { %3375 = vmatprep.subr.bf16.mxu0 %v6610_v5 }
 0xf5f   :  { %4788 = vmatpush3.bf16.msra.mxu1 %v5359_v6 }
 0xf60   :  { %4789 = vmatprep.subr.bf16.mxu1 %v7524_v36  ;;  %3376 = vmatpush1.bf16.msra.mxu0 %v6618_v52 }
 0xf61   :  { %3377 = vmatprep.subr.bf16.mxu0 %v6624_v11 }
 0xf63   :  { %4790 = vmatpush3.bf16.msra.mxu1 %v5360_v2 }
 0xf64   :  { %4795 = vmatprep.subr.bf16.mxu1 %v7524_v36  ;;  %3378 = vmatpush1.bf16.msra.mxu0 %v6632_v21 }
 0xf65   :  { %3444 = vmatprep.subr.bf16.mxu0 %v6638_v15  ;;  %v7593_v15 = vld [vmem:[#allocation38_spill] sm:$0xff] }
 0xf66   :  { %v7043_v6 = vadd.f32 %v7594_v29, %v7593_v15  ;;  %v7595_v15 = vld [vmem:[#allocation29_spill] sm:$0xff] }
 0xfe6   :  { %v2777_v60 = vpop.f32.mrf.mxu1  ;;  %v2818_v62 = vpop.f32.mrf.mxu0 }
 0xfe7   :  { %v2778_v43 = vadd.f32 %v2777_v60, %v7592_v23 }
 0xfe8   :  { %v2779_v34 = vpop.f32.mrf.mxu1  ;;  %v4753_v38 = vpop.f32.mrf.mxu0 }
 0xfea   :  { %v2781_v59 = vpop.f32.mrf.mxu1  ;;  %v2821_v37 = vpop.f32.mrf.mxu0 }
 0xfec   :  { %v2782_v5 = vpop.f32.mrf.mxu1  ;;  %v4754_v52 = vpop.f32.mrf.mxu0 }
 0xfed   :  { %v2780_v5 = vadd.f32 %v2779_v34, %v7043_v6 }
0x1006   :  { %v2858_v11 = vpop.f32.mrf.mxu1  ;;  %v2899_v10 = vpop.f32.mrf.mxu0 }
0x1007   :  { %v2859_v31 = vadd.f32 %v2858_v11, %v7570_v57 }
0x1008   :  { %v2860_v39 = vpop.f32.mrf.mxu1  ;;  %v4773_v44 = vpop.f32.mrf.mxu0 }
0x1009   :  { %v2905_v24 = vadd.f32 %v2859_v31, %v2778_v43  ;;  %v2861_v38 = vadd.f32 %v2860_v39, %v6348_v45 }
0x100a   :  { %v2862_v21 = vpop.f32.mrf.mxu1  ;;  %v2902_v27 = vpop.f32.mrf.mxu0 }
0x100b   :  { %v4245_v2 = vmul.f32 -1.442695, %v2905_v24  ;;  %v2912_v60 = vadd.f32 %v2861_v38, %v2780_v5  ;;  %v2900_v21 = vadd.f32 %v2899_v10, %v6357_v19  ;;  %v2819_v24 = vadd.f32 %v2818_v62, %v7595_v15  ;;  %v7598_v62 = vld [vmem:[#allocation5_spill] sm:$0xff] }
0x100c   :  { %v2863_v59 = vpop.f32.mrf.mxu1  ;;  %v4774_v37 = vpop.f32.mrf.mxu0 }
0x100d   :  { %5224 = vpow2.f32 %v4245_v2  ;;  %v4246_v52 = vmul.f32 -1.442695, %v2912_v60 }
0x100f   :  { %5226 = vpow2.f32 %v4246_v52 }
0x101a   :  { %v5225_v11 = vpop.eup %5224 }
0x101b   :  { %v2909_v44 = vadd.f32 1.0, %v5225_v11 }
0x101c   :  { %v5227_v43 = vpop.eup %5226 }
0x101d   :  { %5228 = vrcp.f32 %v2909_v44  ;;  %v2916_v31 = vadd.f32 1.0, %v5227_v43 }
0x101f   :  { %5230 = vrcp.f32 %v2916_v31 }
0x102a   :  { %v5229_v27 = vpop.eup %5228 }
0x102b   :  { %v2919_v29 = vmul.f32 %v5229_v27, %v2900_v21  ;;  %v7599_v21 = vld [vmem:[#allocation6_spill] sm:$0xff] }
0x102c   :  { %v5231_v59 = vpop.eup %5230 }
0x102d   :  { %v2920_v39 = vadd.f32 %v2919_v29, %v2819_v24  ;;  %v2922_v34 = vsub.f32 1.0, %v5231_v59  ;;  %v2924_v37 = vmul.f32 %v5231_v59, %v6648_v13  ;;  %v7600_v24 = vld [vmem:[#allocation9_spill] sm:$0xff]  ;;  %v7601_v59 = vld [vmem:[#allocation7_spill] sm:$0xff] }
0x102f   :  { %5232 = vtanh.f32 %v2920_v39 }
0x103c   :  { %v5233_v2 = vpop.eup %5232 }
0x103d   :  { %v2923_v38 = vmul.f32 %v5233_v2, %v2922_v34 }
0x103f   :  { %v7050_v5 = vadd.f32 %v2924_v37, %v2923_v38  ;;  %v7602_v38 = vld [vmem:[#allocation8_spill] sm:$0xff] }
0x1041   :  { %7596 = vst [vmem:[#allocation25_spill] sm:$0xff] %v7050_v5  ;;  %v7054_v60 = vpack.c.bf16 %v7050_v5, %v7050_v5 }
0x1043   :  { %4792 = vmatmul.mubr.bf16.vlgmr.msra.gmra.mxu1 %v7054_v60 }
0x1044   :  { %4796 = vmatpush3.bf16.msra.mxu1 %v6658_v54  ;;  %4811 = vmatprep.mubr.msk.bf16.mxu1 %vm5364_vm0, %v7524_v36  ;;  %v7597_v54 = vld [vmem:[#allocation14_spill] sm:$0xff] }
0x1045   :  { %4797 = vmatprep.subr.bf16.mxu1 %v7524_v36 }
0x1048   :  { %4798 = vmatpush3.bf16.msra.mxu1 %v6667_v49 }
0x1049   :  { %4799 = vmatprep.subr.bf16.mxu1 %v7524_v36 }
0x104c   :  { %4800 = vmatpush3.bf16.msra.mxu1 %v6674_v41  ;;  %v5361_v41 = vld [vmem:[%s7406_s7] ss:$0 sm:$0xff] }
0x104d   :  { %4801 = vmatprep.subr.bf16.mxu1 %v7524_v36 }
0x1050   :  { %4802 = vmatpush3.bf16.msra.mxu1 %v6681_v56 }
0x1051   :  { %4803 = vmatprep.subr.bf16.mxu1 %v7524_v36 }
0x1054   :  { %4804 = vmatpush3.bf16.msra.mxu1 %v6688_v40 }
0x1055   :  { %4805 = vmatprep.subr.bf16.mxu1 %v7524_v36 }
0x1058   :  { %4806 = vmatpush3.bf16.msra.mxu1 %v6695_v22 }
0x1059   :  { %4807 = vmatprep.subr.bf16.mxu1 %v7524_v36 }
0x105c   :  { %4808 = vmatpush3.bf16.msra.mxu1 %v6702_v47 }
0x105d   :  { %4809 = vmatprep.subr.bf16.mxu1 %v7524_v36 }
0x1060   :  { %4810 = vmatpush3.bf16.msra.mxu1 %v7597_v54 }
0x1061   :  { %4815 = vmatprep.subr.bf16.mxu1 %v7524_v36 }
0x1103   :  { %v2961_v49 = vpop.f32.mrf.mxu1 }
0x1104   :  { %v2962_v56 = vadd.f32 %v5361_v41, %v2961_v49  ;;  %v7603_v49 = vld [vmem:[#allocation10_spill] sm:$0xff] }
0x1105   :  { %v4793_v40 = vpop.f32.mrf.mxu1 }
0x1106   :  { %v2974_v10 = vrot.slane %v2962_v56, %v7598_v62  ;;  %v7604_v40 = vld [vmem:[#allocation11_spill] sm:$0xff] }
0x1107   :  { %v2964_v22 = vpop.f32.mrf.mxu1 }
0x1108   :  { %v2975_v52 = vcombine.high %v2974_v10, %v2974_v10  ;;  %v2982_v11 = vrot.slane %v2974_v10, %v7598_v62 }
0x1109   :  { %v4794_v47 = vpop.f32.mrf.mxu1 }
0x110a   :  { %v2989_v44 = vrot.slane %v2975_v52, %v7598_v62  ;;  %v2995_v43 = vrot.slane %v2982_v11, %v5687_v46  ;;  %v2990_v39 = vcombine.high %v2982_v11, %v2982_v11  ;;  %v5362_v52 = vld [vmem:[%s7408_s8] ss:$0 sm:$0xff]  ;;  %v7605_v47 = vld [vmem:[#allocation12_spill] sm:$0xff] }
0x110c   :  { %v2999_v31 = vrot.slane %v2989_v44, %v5687_v46  ;;  %v3012_v27 = vadd.f32 %v2995_v43, %v7599_v21  ;;  %v3013_v29 = vadd.f32 %v2995_v43, %v7600_v24  ;;  %v3003_v2 = vrot.slane %v2990_v39, %v5687_v46  ;;  %v7606_v21 = vld [vmem:[#allocation13_spill] sm:$0xff] }
0x110d   :  { %v2991_v54 = vcombine.high %v2989_v44, %v2989_v44 }
0x110e   :  { %v3014_v34 = vadd.f32 %v2999_v31, %v7601_v59  ;;  %5234 = vtanh.f32 %v3012_v27  ;;  %v3015_v37 = vadd.f32 %v2999_v31, %v7602_v38  ;;  %v3016_v41 = vadd.f32 %v3003_v2, %v7603_v49 }
0x110f   :  { %5236 = vtanh.f32 %v3013_v29  ;;  %v3007_v56 = vrot.slane %v2991_v54, %v5687_v46  ;;  %v3017_v62 = vadd.f32 %v3003_v2, %v7604_v40 }
0x1110   :  { %5238 = vtanh.f32 %v3014_v34 }
0x1111   :  { %5240 = vtanh.f32 %v3015_v37  ;;  %v3018_v43 = vadd.f32 %v3007_v56, %v7605_v47  ;;  %v3019_v27 = vadd.f32 %v3007_v56, %v7606_v21  ;;  %v7607_v47 = vld [vmem:[#allocation16_spill] sm:$0xff] }
0x1112   :  { %5242 = vtanh.f32 %v3016_v41 }
0x1113   :  { %5244 = vtanh.f32 %v3017_v62 }
0x1114   :  { %5246 = vtanh.f32 %v3018_v43 }
0x1115   :  { %5248 = vtanh.f32 %v3019_v27 }
0x111b   :  { %v5235_v10 = vpop.eup %5234 }
0x111c   :  { %v5237_v22 = vpop.eup %5236  ;;  %v3028_v11 = vmul.f32 %v5362_v52, %v5235_v10 }
0x111d   :  { %v3029_v31 = vmul.f32 %v5362_v52, %v5237_v22  ;;  %v5239_v44 = vpop.eup %5238 }
0x111e   :  { %3036 = vadd.xlane.f32.xlu0 %v3028_v11  ;;  %v3030_v24 = vmul.f32 %v5362_v52, %v5239_v44  ;;  %v5241_v29 = vpop.eup %5240 }
0x111f   :  { %3038 = vadd.xlane.f32.xlu1 %v3029_v31  ;;  %v3031_v39 = vmul.f32 %v5362_v52, %v5241_v29  ;;  %v5243_v59 = vpop.eup %5242 }
0x1120   :  { %v3032_v34 = vmul.f32 %v5362_v52, %v5243_v59  ;;  %v5245_v2 = vpop.eup %5244 }
0x1121   :  { %v3033_v38 = vmul.f32 %v5362_v52, %v5245_v2  ;;  %v5247_v37 = vpop.eup %5246 }
0x1122   :  { %v3034_v54 = vmul.f32 %v5362_v52, %v5247_v37  ;;  %v5249_v49 = vpop.eup %5248 }
0x1123   :  { %3040 = vadd.xlane.f32.xlu1 %v3030_v24  ;;  %v3035_v41 = vmul.f32 %v5362_v52, %v5249_v49 }
0x1127   :  { %3042 = vadd.xlane.f32.xlu1 %v3031_v39 }
0x112b   :  { %3044 = vadd.xlane.f32.xlu1 %v3032_v34 }
0x112f   :  { %3046 = vadd.xlane.f32.xlu1 %v3033_v38 }
0x1133   :  { %3048 = vadd.xlane.f32.xlu1 %v3034_v54 }
0x1137   :  { %3050 = vadd.xlane.f32.xlu1 %v3035_v41 }
0x11a7   :  { %v3037_v22 = vpop.xlane.xlu0 %3036 }
0x11a8   :  { %v3039_v56 = vpop.xlane.xlu1 %3038  ;;  %v3052_v21 = vadd.f32 %v3037_v22, %v7607_v47 }
0x11a9   :  { %v3053_v44 = vadd.f32 %v3039_v56, %v7607_v47 }
0x11aa   :  { %v3071_v34 = vrot.slane %v3052_v21, %v7550_v55 }
0x11ab   :  { %v3075_v59 = vrot.slane %v3053_v44, %v7549_v35 }
0x11ac   :  { %v3041_v40 = vpop.xlane.xlu1 %3040 }
0x11ad   :  { %v3054_v27 = vadd.f32 %v3041_v40, %v7607_v47  ;;  %v3076_v40 = vsel %vm895_vm4, %v3075_v59, %v3071_v34 }
0x11af   :  { %v3080_v2 = vrot.slane %v3054_v27, %v7550_v55 }
0x11b0   :  { %v3043_v62 = vpop.xlane.xlu1 %3042 }
0x11b1   :  { %v3055_v43 = vadd.f32 %v3043_v62, %v7607_v47 }
0x11b3   :  { %v3084_v29 = vrot.slane %v3055_v43, %v7549_v35 }
0x11b4   :  { %v3045_v10 = vpop.xlane.xlu1 %3044 }
0x11b5   :  { %v3056_v24 = vadd.f32 %v3045_v10, %v7607_v47  ;;  %v3085_v49 = vsel %vm895_vm4, %v3084_v29, %v3080_v2 }
0x11b6   :  { %v3104_v22 = vsel %vm145_vm1, %v3085_v49, %v3076_v40 }
0x11b7   :  { %v3089_v37 = vrot.slane %v3056_v24, %v7550_v55 }
0x11b8   :  { %v3047_v11 = vpop.xlane.xlu1 %3046 }
0x11b9   :  { %v3057_v31 = vadd.f32 %v3047_v11, %v7607_v47 }
0x11bb   :  { %v3093_v39 = vrot.slane %v3057_v31, %v7549_v35 }
0x11bc   :  { %v3049_v52 = vpop.xlane.xlu1 %3048 }
0x11bd   :  { %v3058_v38 = vadd.f32 %v3049_v52, %v7607_v47  ;;  %v3094_v56 = vsel %vm895_vm4, %v3093_v39, %v3089_v37 }
0x11be   :  { %v3105_v52 = vsel %vm147_vm2, %v3094_v56, %v3104_v22 }
0x11bf   :  { %v3098_v62 = vrot.slane %v3058_v38, %v7550_v55 }
0x11c0   :  { %v3051_v54 = vpop.xlane.xlu1 %3050 }
0x11c1   :  { %v3059_v41 = vadd.f32 %v3051_v54, %v7607_v47 }
0x11c3   :  { %v3102_v10 = vrot.slane %v3059_v41, %v7549_v35 }
0x11c5   :  { %v3103_v11 = vsel %vm895_vm4, %v3102_v10, %v3098_v62 }
0x11c6   :  { %v3106_v13 = vsel %vm149_vm3, %v3103_v11, %v3105_v52 }
0x11c7   :  { %v3108_v29 = vsel %vm928_vm5, %v3106_v13, -inf }
0x11c8   :  { %3109 = vmax.xlane.f32.xlu1 %v3108_v29 }
0x1251   :  { %v3110_v47 = vpop.xlane.xlu1 %3109 }
0x1252   :  { %v3115_v39 = vrot.slane %v3110_v47, %v5687_v46  ;;  %v3119_v59 = vrot.slane %v3110_v47, %v5790_v4  ;;  %v3123_v34 = vrot.slane %v3110_v47, %v5796_v18  ;;  %v3127_v56 = vrot.slane %v3110_v47, %v7551_v53 }
0x1254   :  { %v3132_v2 = vsub.f32 %v3052_v21, %v3115_v39  ;;  %v3133_v37 = vsub.f32 %v3053_v44, %v3115_v39  ;;  %v3135_v54 = vsub.f32 %v3055_v43, %v3119_v59  ;;  %v3134_v49 = vsub.f32 %v3054_v27, %v3119_v59 }
0x1255   :  { %v3137_v10 = vsub.f32 %v3057_v31, %v3123_v34  ;;  %v3136_v13 = vsub.f32 %v3056_v24, %v3123_v34  ;;  %v3139_v52 = vsub.f32 %v3059_v41, %v3127_v56  ;;  %v3138_v5 = vsub.f32 %v3058_v38, %v3127_v56 }
0x1256   :  { %v3140_v40 = vmul.f32 1.442695, %v3132_v2  ;;  %v3142_v62 = vmul.f32 1.442695, %v3133_v37  ;;  %v3146_v22 = vmul.f32 1.442695, %v3135_v54 }
0x1257   :  { %v3144_v11 = vmul.f32 1.442695, %v3134_v49  ;;  %v3150_v29 = vmul.f32 1.442695, %v3137_v10  ;;  %v3148_v19 = vmul.f32 1.442695, %v3136_v13 }
0x1258   :  { %5250 = vpow2.f32 %v3140_v40  ;;  %v3154_v44 = vmul.f32 1.442695, %v3139_v52  ;;  %v3152_v43 = vmul.f32 1.442695, %v3138_v5 }
0x1259   :  { %5252 = vpow2.f32 %v3142_v62 }
0x125a   :  { %5254 = vpow2.f32 %v3146_v22 }
0x125b   :  { %5256 = vpow2.f32 %v3144_v11 }
0x125c   :  { %5258 = vpow2.f32 %v3150_v29 }
0x125d   :  { %5260 = vpow2.f32 %v3148_v19 }
0x125e   :  { %5262 = vpow2.f32 %v3154_v44 }
0x125f   :  { %5264 = vpow2.f32 %v3152_v43 }
0x1265   :  { %v5251_v21 = vpop.eup %5250 }
0x1266   :  { %v5253_v27 = vpop.eup %5252  ;;  %3165 = vperm.xlu0 %4939, %v5251_v21  }
0x1267   :  { %3168 = vperm.xlu1 %4940, %v5253_v27   ;;  %v5255_v31 = vpop.eup %5254 }
0x1268   :  { %v5257_v24 = vpop.eup %5256 }
0x1269   :  { %v5259_v41 = vpop.eup %5258 }
0x126a   :  { %3174 = vperm.xlu0 %4939, %v5255_v31   ;;  %v5261_v47 = vpop.eup %5260 }
0x126b   :  { %3171 = vperm.xlu1 %4940, %v5257_v24   ;;  %v5263_v38 = vpop.eup %5262 }
0x126c   :  { %v5265_v39 = vpop.eup %5264 }
0x126e   :  { %3180 = vperm.xlu0 %4939, %v5259_v41  }
0x126f   :  { %3177 = vperm.xlu1 %4940, %v5261_v47  }
0x1272   :  { %3186 = vperm.xlu0 %4939, %v5263_v38  }
0x1273   :  { %3183 = vperm.xlu1 %4940, %v5265_v39  }
0x12e1   :  { %v3166_v19 = vpop.permute.xlu0 %3165 }
0x12e2   :  { %v3169_v5 = vpop.permute.xlu1 %3168  ;;  %v3191_v56 = vrot.slane %v3166_v19, %v7550_v55 }
0x12e3   :  { %v3195_v62 = vrot.slane %v3169_v5, %v7549_v35 }
0x12e5   :  { %v3175_v59 = vpop.permute.xlu0 %3174  ;;  %v3196_v44 = vsel %vm895_vm4, %v3195_v62, %v3191_v56 }
0x12e6   :  { %v3172_v34 = vpop.permute.xlu1 %3171  ;;  %v3204_v37 = vrot.slane %v3175_v59, %v7549_v35 }
0x12e7   :  { %v3200_v2 = vrot.slane %v3172_v34, %v7550_v55 }
0x12e9   :  { %v3181_v54 = vpop.permute.xlu0 %3180  ;;  %v3205_v22 = vsel %vm895_vm4, %v3204_v37, %v3200_v2 }
0x12ea   :  { %v3178_v49 = vpop.permute.xlu1 %3177  ;;  %v3213_v40 = vrot.slane %v3181_v54, %v7549_v35  ;;  %v3224_v59 = vsel %vm145_vm1, %v3205_v22, %v3196_v44  ;;  %v7609_v44 = vld [vmem:[#allocation18_spill] sm:$0xff] }
0x12eb   :  { %v3209_v10 = vrot.slane %v3178_v49, %v7550_v55 }
0x12ed   :  { %v3187_v13 = vpop.permute.xlu0 %3186  ;;  %v3214_v11 = vsel %vm895_vm4, %v3213_v40, %v3209_v10 }
0x12ee   :  { %v3184_v52 = vpop.permute.xlu1 %3183  ;;  %v3222_v29 = vrot.slane %v3187_v13, %v7549_v35  ;;  %v3225_v19 = vsel %vm147_vm2, %v3214_v11, %v3224_v59  ;;  %v7610_v59 = vld [vmem:[#allocation19_spill] sm:$0xff] }
0x12ef   :  { %v3218_v43 = vrot.slane %v3184_v52, %v7550_v55 }
0x12f1   :  { %v3223_v5 = vsel %vm895_vm4, %v3222_v29, %v3218_v43  ;;  %v7608_v29 = vld [vmem:[#allocation17_spill] sm:$0xff] }
0x12f2   :  { %v3226_v34 = vsel %vm149_vm3, %v3223_v5, %v3225_v19  ;;  %v7611_v5 = vld [vmem:[#allocation20_spill] sm:$0xff] }
0x12f3   :  { %v3228_v2 = vsel %vm928_vm5, %v3226_v34, 0.0 }
0x12f4   :  { %3229 = vadd.xlane.f32.xlu1 %v3228_v2 }
0x137d   :  { %v3230_v37 = vpop.xlane.xlu1 %3229 }
0x137e   :  { %5266 = vrcp.f32 %v3230_v37 }
0x138b   :  { %v5267_v54 = vpop.eup %5266 }
0x138c   :  { %v3236_v35 = vrot.slane %v5267_v54, %v5687_v46  ;;  %v3240_v55 = vrot.slane %v5267_v54, %v5790_v4  ;;  %v3244_v10 = vrot.slane %v5267_v54, %v5796_v18  ;;  %v3248_v11 = vrot.slane %v5267_v54, %v7551_v53  ;;  %v7612_v54 = vld [vmem:[#allocation21_spill] sm:$0xff] }
0x138e   :  { %v3253_v49 = vmul.f32 %v5251_v21, %v3236_v35  ;;  %v3254_v40 = vmul.f32 %v5253_v27, %v3236_v35  ;;  %v3255_v62 = vmul.f32 %v5257_v24, %v3240_v55  ;;  %v3256_v56 = vmul.f32 %v5255_v31, %v3240_v55 }
0x138f   :  { %v3257_v22 = vmul.f32 %v5261_v47, %v3244_v10  ;;  %v3258_v13 = vmul.f32 %v5259_v41, %v3244_v10  ;;  %v3259_v52 = vmul.f32 %v5265_v39, %v3248_v11  ;;  %v3260_v46 = vmul.f32 %v5263_v38, %v3248_v11 }
0x1390   :  { %3263 = vperm.xlu0 %4939, %v3253_v49   ;;  %v7613_v49 = vld [vmem:[#allocation22_spill] sm:$0xff] }
0x1394   :  { %3268 = vperm.xlu0 %4939, %v3254_v40  }
0x1398   :  { %3273 = vperm.xlu0 %4939, %v3255_v62  }
0x139c   :  { %3278 = vperm.xlu0 %4939, %v3256_v56  }
0x13a0   :  { %3283 = vperm.xlu0 %4939, %v3257_v22  }
0x13a4   :  { %3288 = vperm.xlu0 %4939, %v3258_v13  }
0x13a8   :  { %3293 = vperm.xlu0 %4939, %v3259_v52  }
0x13ac   :  { %3298 = vperm.xlu0 %4939, %v3260_v46  }
0x140b   :  { %v3264_v21 = vpop.permute.xlu0 %3263 }
0x140c   :  { %v3301_v31 = vmul.f32 %v7609_v44, %v3264_v21 }
0x140f   :  { %v3269_v27 = vpop.permute.xlu0 %3268 }
0x1410   :  { %v3302_v24 = vmul.f32 %v7608_v29, %v3269_v27  ;;  %v7614_v27 = vld [vmem:[#allocation23_spill] sm:$0xff]  ;;  %v7615_v29 = vld [vmem:[#allocation24_spill] sm:$0xff] }
0x1412   :  { %v3309_v18 = vadd.f32 %v3302_v24, %v3301_v31 }
0x1413   :  { %v3274_v4 = vpop.permute.xlu0 %3273 }
0x1414   :  { %v3303_v47 = vmul.f32 %v7610_v59, %v3274_v4  ;;  %v3310_v34 = vrot.slane %v3309_v18, 4 }
0x1416   :  { %v3311_v37 = vadd.f32 %v3310_v34, %v3309_v18 }
0x1417   :  { %v3279_v43 = vpop.permute.xlu0 %3278 }
0x1418   :  { %v3304_v41 = vmul.f32 %v7611_v5, %v3279_v43  ;;  %v3312_v10 = vrot.slane %v3311_v37, 2 }
0x141a   :  { %v3316_v19 = vadd.f32 %v3304_v41, %v3303_v47  ;;  %v3313_v46 = vadd.f32 %v3312_v10, %v3311_v37 }
0x141b   :  { %v3284_v53 = vpop.permute.xlu0 %3283 }
0x141c   :  { %v3317_v39 = vrot.slane %v3316_v19, 4  ;;  %v3305_v35 = vmul.f32 %v7612_v54, %v3284_v53  ;;  %v3314_v18 = vrot.slane %v3313_v46, 1 }
0x141e   :  { %v3318_v2 = vadd.f32 %v3317_v39, %v3316_v19  ;;  %v3315_v53 = vadd.f32 %v3314_v18, %v3313_v46 }
0x141f   :  { %v3289_v38 = vpop.permute.xlu0 %3288 }
0x1420   :  { %v3306_v40 = vmul.f32 %v7613_v49, %v3289_v38  ;;  %v3319_v55 = vrot.slane %v3318_v2, 2  ;;  %v3337_v37 = vpack.c.bf16 %v3315_v53, %v3315_v53 }
0x1422   :  { %v3323_v62 = vadd.f32 %v3306_v40, %v3305_v35  ;;  %v3320_v13 = vadd.f32 %v3319_v55, %v3318_v2  ;;  %v3345_v55 = vunpack.c.l.b16 %v3337_v37 }
0x1423   :  { %v3294_v56 = vpop.permute.xlu0 %3293 }
0x1424   :  { %v3324_v22 = vrot.slane %v3323_v62, 4  ;;  %v3307_v4 = vmul.f32 %v7614_v27, %v3294_v56  ;;  %v3321_v44 = vrot.slane %v3320_v13, 1 }
0x1426   :  { %v3325_v11 = vadd.f32 %v3324_v22, %v3323_v62  ;;  %v3322_v5 = vadd.f32 %v3321_v44, %v3320_v13 }
0x1427   :  { %v3299_v52 = vpop.permute.xlu0 %3298 }
0x1428   :  { %v3326_v21 = vrot.slane %v3325_v11, 2  ;;  %v3308_v24 = vmul.f32 %v7615_v29, %v3299_v52  ;;  %v3338_v39 = vpack.c.bf16 %v3322_v5, %v3322_v5 }
0x142a   :  { %v3327_v31 = vadd.f32 %v3326_v21, %v3325_v11  ;;  %v3330_v43 = vadd.f32 %v3308_v24, %v3307_v4  ;;  %v3346_v35 = vunpack.c.l.b16 %v3338_v39  ;;  %v3359_v39 = vrot.slane %v7595_v15, 4  ;;  %v7619_v15 = vld [vmem:[#allocation40_spill] sm:$0xff] }
0x142c   :  { %v3328_v59 = vrot.slane %v3327_v31, 1  ;;  %v3331_v47 = vrot.slane %v3330_v43, 4  ;;  %v3349_v10 = vsel %vm145_vm1, %v3346_v35, %v3345_v55 }
0x142e   :  { %v3332_v41 = vadd.f32 %v3331_v47, %v3330_v43  ;;  %v3329_v19 = vadd.f32 %v3328_v59, %v3327_v31  ;;  %v3358_v31 = vrot.slane %v7043_v6, 4 }
0x1430   :  { %v3333_v34 = vrot.slane %v3332_v41, 2  ;;  %v3339_v38 = vpack.c.bf16 %v3329_v19, %v3329_v19 }
0x1432   :  { %v3334_v2 = vadd.f32 %v3333_v34, %v3332_v41  ;;  %v3347_v40 = vunpack.c.l.b16 %v3339_v38 }
0x1434   :  { %v3335_v54 = vrot.slane %v3334_v2, 1  ;;  %v3350_v22 = vsel %vm147_vm2, %v3347_v40, %v3349_v10 }
0x1436   :  { %v3336_v49 = vadd.f32 %v3335_v54, %v3334_v2  ;;  %v7616_v2 = vld [vmem:[#allocation39_spill] sm:$0xff] }
0x1438   :  { %v3340_v62 = vpack.c.bf16 %v3336_v49, %v3336_v49 }
0x143a   :  { %v3348_v56 = vunpack.c.l.b16 %v3340_v62  ;;  %v7617_v62 = vld [vmem:[#allocation25_spill] sm:$0xff] }
0x143c   :  { %v3351_v13 = vsel %vm149_vm3, %v3348_v56, %v3350_v22  ;;  %v7618_v22 = vld [vmem:[#allocation15_spill] sm:$0xff] }
0x143d   :  { %v3352_v11 = vpack.c.b16 %v3351_v13, %v3351_v13  ;;  %v3547_v13 = vrot.slane %v7618_v22, 4 }
0x143f   :  { %3396 = vmatmul.mubr.bf16.vlgmr.msra.gmra.mxu0 %v3352_v11  ;;  %4812 = vmatmul.mubr.bf16.vlgmr.msra.gmra.mxu1 %v3352_v11 }
0x1440   :  { %3445 = vmatpush1.bf16.msra.mxu0 %v6839_v58  ;;  %4816 = vmatpush3.bf16.msra.mxu1 %v6845_v26  ;;  %v5063_v58 = vld [vmem:[%s7412_s15 + $0x30] sm:$0xff]   ;;  %v5064_v26 = vld [vmem:[%s7412_s15 + $0x28] sm:$0xff]  }
0x1441   :  { %3446 = vmatprep.subr.bf16.mxu0 %v6851_v0  ;;  %4817 = vmatprep.subr.bf16.mxu1 %v7524_v36  ;;  %v5065_v0 = vld [vmem:[%s7412_s15 + $0x20] sm:$0xff]  }
0x1442   :  { %3476 = vmatprep.mubr.bf16.mxu0 %v7525_v28  ;;  %4831 = vmatprep.mubr.msk.bf16.mxu1 %vm5364_vm0, %v7524_v36  ;;  %v5062_v28 = vld [vmem:[%s7412_s15 + $0x38] sm:$0xff]  }
0x1444   :  { %3447 = vmatpush1.bf16.msra.mxu0 %v6861_v20  ;;  %4818 = vmatpush3.bf16.msra.mxu1 %v6867_v8  ;;  %v5066_v20 = vld [vmem:[%s7412_s15 + $0x18] sm:$0xff]   ;;  %v5067_v8 = vld [vmem:[%s7412_s15 + $0x10] sm:$0xff]  }
0x1445   :  { %3448 = vmatprep.subr.bf16.mxu0 %v6873_v30  ;;  %4819 = vmatprep.subr.bf16.mxu1 %v7524_v36  ;;  %v5068_v30 = vld [vmem:[%s7412_s15 + $0x8] sm:$0xff]  }
0x1448   :  { %3449 = vmatpush1.bf16.msra.mxu0 %v6880_v3  ;;  %4820 = vmatpush3.bf16.msra.mxu1 %v6886_v14  ;;  %v5069_v3 = vld [vmem:[%s7412_s15] sm:$0xff]   ;;  %v5070_v14 = vld [vmem:[%s7413_s17 + $0x38] sm:$0xff]  }
0x1449   :  { %3450 = vmatprep.subr.bf16.mxu0 %v6892_v16  ;;  %4821 = vmatprep.subr.bf16.mxu1 %v7524_v36  ;;  %v5072_v16 = vld [vmem:[%s7413_s17 + $0x30] sm:$0xff]  }
0x144c   :  { %3451 = vmatpush1.bf16.msra.mxu0 %v6899_v33  ;;  %4822 = vmatpush3.bf16.msra.mxu1 %v6905_v1  ;;  %v5074_v33 = vld [vmem:[%s7413_s17 + $0x28] sm:$0xff]   ;;  %v5076_v1 = vld [vmem:[%s7413_s17 + $0x20] sm:$0xff]  }
0x144d   :  { %3452 = vmatprep.subr.bf16.mxu0 %v6911_v7  ;;  %4823 = vmatprep.subr.bf16.mxu1 %v7524_v36  ;;  %v5078_v7 = vld [vmem:[%s7413_s17 + $0x18] sm:$0xff]  }
0x1450   :  { %3453 = vmatpush1.bf16.msra.mxu0 %v6918_v9  ;;  %4824 = vmatpush3.bf16.msra.mxu1 %v6924_v50  ;;  %v5080_v9 = vld [vmem:[%s7413_s17 + $0x10] sm:$0xff]   ;;  %v5082_v50 = vld [vmem:[%s7413_s17 + $0x8] sm:$0xff]  }
0x1451   :  { %3454 = vmatprep.subr.bf16.mxu0 %v6930_v63  ;;  %4825 = vmatprep.subr.bf16.mxu1 %v7524_v36 }
0x1454   :  { %3455 = vmatpush1.bf16.msra.mxu0 %v6937_v25  ;;  %4826 = vmatpush3.bf16.msra.mxu1 %v6943_v61 }
0x1455   :  { %3456 = vmatprep.subr.bf16.mxu0 %v6949_v48  ;;  %4827 = vmatprep.subr.bf16.mxu1 %v7524_v36 }
0x1458   :  { %3457 = vmatpush1.bf16.msra.mxu0 %v6956_v42  ;;  %4828 = vmatpush3.bf16.msra.mxu1 %v6962_v51 }
0x1459   :  { %3458 = vmatprep.subr.bf16.mxu0 %v6968_v12  ;;  %4829 = vmatprep.subr.bf16.mxu1 %v7524_v36 }
0x145c   :  { %3459 = vmatpush1.bf16.msra.mxu0 %v6975_v17  ;;  %4830 = vmatpush3.bf16.msra.mxu1 %v6981_v32  ;;  %v3357_v32 = vrot.slane %v7592_v23, 4 }
0x145d   :  { %4835 = vmatprep.subr.bf16.mxu0 %v7524_v36  ;;  %4855 = vmatprep.subr.bf16.mxu1 %v7524_v36 }
0x145f   :  { %3477 = vmatmul.mubr.bf16.vlgmr.msra.gmra.mxu0 %v7054_v60  ;;  %4832 = vmatmul.mubr.bf16.vlgmr.msra.gmra.mxu1 %v7054_v60 }
0x1460   :  { %4851 = vmatprep.mubr.msk.bf16.mxu0 %vm5364_vm0, %v7524_v36  ;;  %4871 = vmatprep.mubr.msk.bf16.mxu1 %vm5364_vm0, %v7524_v36 }
0x1461   :  { %4836 = vmatpush3.bf16.msra.mxu0 %v5062_v28  ;;  %4856 = vmatpush3.bf16.msra.mxu1 %v5070_v14  ;;  %v3553_v28 = vsel %vm3552_vm6, %v7619_v15, %v3547_v13  ;;  %v5081_v14 = vld [vmem:[%s7413_s17 + $0x50] sm:$0xff]  }
0x1462   :  { %4837 = vmatprep.subr.bf16.mxu0 %v7524_v36  ;;  %4857 = vmatprep.subr.bf16.mxu1 %v7524_v36 }
0x1465   :  { %4838 = vmatpush3.bf16.msra.mxu0 %v5063_v58  ;;  %4858 = vmatpush3.bf16.msra.mxu1 %v5072_v16  ;;  %v5083_v16 = vld [vmem:[%s7413_s17 + $0x48] sm:$0xff]  }
0x1466   :  { %4839 = vmatprep.subr.bf16.mxu0 %v7524_v36  ;;  %4859 = vmatprep.subr.bf16.mxu1 %v7524_v36 }
0x1469   :  { %4840 = vmatpush3.bf16.msra.mxu0 %v5064_v26  ;;  %4860 = vmatpush3.bf16.msra.mxu1 %v5074_v33  ;;  %v5071_v26 = vld [vmem:[%s7413_s17 + $0x78] sm:$0xff]   ;;  %v5084_v33 = vld [vmem:[%s7413_s17] sm:$0xff]  }
0x146a   :  { %4841 = vmatprep.subr.bf16.mxu0 %v7524_v36  ;;  %4861 = vmatprep.subr.bf16.mxu1 %v7524_v36 }
0x146d   :  { %4842 = vmatpush3.bf16.msra.mxu0 %v5065_v0  ;;  %4862 = vmatpush3.bf16.msra.mxu1 %v5076_v1  ;;  %v5085_v1 = vld [vmem:[%s7413_s17 + $0x40] sm:$0xff]  }
0x146e   :  { %4843 = vmatprep.subr.bf16.mxu0 %v7524_v36  ;;  %4863 = vmatprep.subr.bf16.mxu1 %v7524_v36 }
0x1471   :  { %4844 = vmatpush3.bf16.msra.mxu0 %v5066_v20  ;;  %4864 = vmatpush3.bf16.msra.mxu1 %v5078_v7  ;;  %v5073_v20 = vld [vmem:[%s7413_s17 + $0x70] sm:$0xff]   ;;  %v4249_v7 = vld [vmem:[%s7414_s16] ss:$0 sm:$0xff] }
0x1472   :  { %4845 = vmatprep.subr.bf16.mxu0 %v7524_v36  ;;  %4865 = vmatprep.subr.bf16.mxu1 %v7524_v36 }
0x1475   :  { %4846 = vmatpush3.bf16.msra.mxu0 %v5067_v8  ;;  %4866 = vmatpush3.bf16.msra.mxu1 %v5080_v9  ;;  %v5075_v8 = vld [vmem:[%s7413_s17 + $0x68] sm:$0xff]  }
0x1476   :  { %4847 = vmatprep.subr.bf16.mxu0 %v7524_v36  ;;  %4867 = vmatprep.subr.bf16.mxu1 %v7524_v36 }
0x1479   :  { %4848 = vmatpush3.bf16.msra.mxu0 %v5068_v30  ;;  %4868 = vmatpush3.bf16.msra.mxu1 %v5082_v50  ;;  %v5077_v30 = vld [vmem:[%s7413_s17 + $0x60] sm:$0xff]  }
0x147a   :  { %4849 = vmatprep.subr.bf16.mxu0 %v7524_v36  ;;  %4869 = vmatprep.subr.bf16.mxu1 %v7524_v36 }
0x147d   :  { %4850 = vmatpush3.bf16.msra.mxu0 %v5069_v3  ;;  %v5079_v3 = vld [vmem:[%s7413_s17 + $0x58] sm:$0xff]   ;;  %4870 = vmatpush3.bf16.msra.mxu1 %v5084_v33 }
0x147e   :  { %4875 = vmatprep.subr.bf16.mxu0 %v7524_v36  ;;  %4895 = vmatprep.subr.bf16.mxu1 %v7524_v36 }
0x14ff   :  { %v3397_v63 = vpop.f32.mrf.mxu0  ;;  %v3438_v25 = vpop.f32.mrf.mxu1 }
0x1500   :  { %v3398_v46 = vadd.f32 %v3397_v63, %v3357_v32  ;;  %v3439_v37 = vadd.f32 %v3438_v25, %v3359_v39  ;;  %v5088_v32 = vld [vmem:[%s7413_s17 + $0xb0] sm:$0xff]  }
0x1501   :  { %v3399_v61 = vpop.f32.mrf.mxu0  ;;  %v4813_v48 = vpop.f32.mrf.mxu1 }
0x1502   :  { %v3400_v5 = vadd.f32 %v3399_v61, %v3358_v31  ;;  %v5086_v48 = vld [vmem:[%s7413_s17 + $0xb8] sm:$0xff]  }
0x1503   :  { %v3401_v42 = vpop.f32.mrf.mxu0  ;;  %v3441_v51 = vpop.f32.mrf.mxu1 }
0x1505   :  { %v3402_v12 = vpop.f32.mrf.mxu0  ;;  %v4814_v17 = vpop.f32.mrf.mxu1 }
0x1506   :  { %v5087_v12 = vld [vmem:[%s7413_s17 + $0xf8] sm:$0xff]  }
0x151f   :  { %v3478_v60 = vpop.f32.mrf.mxu0  ;;  %v3519_v52 = vpop.f32.mrf.mxu1 }
0x1520   :  { %v3479_v21 = vadd.f32 %v3478_v60, %v7570_v57  ;;  %v3520_v38 = vadd.f32 %v3519_v52, %v7616_v2  ;;  %v5089_v60 = vld [vmem:[%s7413_s17 + $0xf0] sm:$0xff]   ;;  %v5090_v52 = vld [vmem:[%s7413_s17 + $0xa8] sm:$0xff]  }
0x1521   :  { %v3480_v27 = vpop.f32.mrf.mxu0  ;;  %v4833_v4 = vpop.f32.mrf.mxu1 }
0x1522   :  { %v3525_v29 = vadd.f32 %v3479_v21, %v3398_v46  ;;  %v3481_v18 = vadd.f32 %v3480_v27, %v6348_v45  ;;  %v5091_v46 = vld [vmem:[%s7413_s17 + $0xe8] sm:$0xff]   ;;  %v5092_v21 = vld [vmem:[%s7413_s17 + $0xa0] sm:$0xff]   ;;  %v5094_v4 = vld [vmem:[%s7413_s17 + $0x98] sm:$0xff]  }
0x1523   :  { %v3482_v24 = vpop.f32.mrf.mxu0  ;;  %v3522_v44 = vpop.f32.mrf.mxu1  ;;  %v5093_v27 = vld [vmem:[%s7413_s17 + $0xe0] sm:$0xff]  }
0x1524   :  { %v4247_v43 = vmul.f32 -1.442695, %v3525_v29  ;;  %v3532_v23 = vadd.f32 %v3481_v18, %v3400_v5  ;;  %v5095_v29 = vld [vmem:[%s7413_s17 + $0xd8] sm:$0xff]   ;;  %v5096_v24 = vld [vmem:[%s7413_s17 + $0x90] sm:$0xff]   ;;  %v5099_v18 = vld [vmem:[%s7413_s17 + $0xc8] sm:$0xff]  }
0x1525   :  { %v3483_v59 = vpop.f32.mrf.mxu0  ;;  %v4834_v47 = vpop.f32.mrf.mxu1  ;;  %v5097_v44 = vld [vmem:[%s7413_s17 + $0xd0] sm:$0xff]   ;;  %v5101_v5 = vld [vmem:[%s7413_s17 + $0xc0] sm:$0xff]  }
0x1526   :  { %5268 = vpow2.f32 %v4247_v43  ;;  %v4248_v41 = vmul.f32 -1.442695, %v3532_v23  ;;  %v5098_v43 = vld [vmem:[%s7413_s17 + $0x88] sm:$0xff]   ;;  %v5100_v47 = vld [vmem:[%s7413_s17 + $0x80] sm:$0xff]  }
0x1528   :  { %5270 = vpow2.f32 %v4248_v41 }
0x1533   :  { %v5269_v19 = vpop.eup %5268 }
0x1534   :  { %v3529_v53 = vadd.f32 1.0, %v5269_v19  ;;  %v4258_v19 = vld [vmem:[%s7415_s18] ss:$0 sm:$0xff] }
0x1535   :  { %v5271_v57 = vpop.eup %5270 }
0x1536   :  { %5272 = vrcp.f32 %v3529_v53  ;;  %v3536_v34 = vadd.f32 1.0, %v5271_v57  ;;  %v4284_v57 = vld [vmem:[%s7415_s18 + $0x1] ss:$0 sm:$0xff] }
0x1538   :  { %5274 = vrcp.f32 %v3536_v34 }
0x1543   :  { %v5273_v6 = vpop.eup %5272 }
0x1544   :  { %v3539_v54 = vmul.f32 %v5273_v6, %v3520_v38 }
0x1545   :  { %v5275_v35 = vpop.eup %5274 }
0x1546   :  { %v3540_v45 = vadd.f32 %v3539_v54, %v3439_v37  ;;  %v3542_v49 = vsub.f32 1.0, %v5275_v35  ;;  %v3544_v56 = vmul.f32 %v5275_v35, %v7617_v62  ;;  %v4311_v35 = vld [vmem:[%s7415_s18 + $0x2] ss:$0 sm:$0xff] }
0x1548   :  { %5276 = vtanh.f32 %v3540_v45 }
0x1555   :  { %v5277_v40 = vpop.eup %5276 }
0x1556   :  { %v3543_v55 = vmul.f32 %v5277_v40, %v3542_v49  ;;  %v4338_v40 = vld [vmem:[%s7415_s18 + $0x3] ss:$0 sm:$0xff] }
0x1558   :  { %v3545_v10 = vadd.f32 %v3544_v56, %v3543_v55 }
0x155a   :  { %v3550_v11 = vrot.slane %v3545_v10, 4 }
0x155c   :  { %v3554_v58 = vsel %vm3552_vm6, %v7617_v62, %v3550_v11 }
0x155d   :  { %v3555_v0 = vpack.c.bf16 %v3554_v58, %v3553_v28 }
0x155f   :  { %4852 = vmatmul.mubr.bf16.vlgmr.msra.gmra.mxu0 %v3555_v0 }
0x1560   :  { %4876 = vmatpush3.bf16.msra.mxu0 %v5071_v26  ;;  %4891 = vmatprep.mubr.msk.bf16.mxu0 %vm5364_vm0, %v7524_v36 }
0x1561   :  { %4877 = vmatprep.subr.bf16.mxu0 %v7524_v36 }
0x1564   :  { %4878 = vmatpush3.bf16.msra.mxu0 %v5073_v20 }
0x1565   :  { %4879 = vmatprep.subr.bf16.mxu0 %v7524_v36 }
0x1568   :  { %4880 = vmatpush3.bf16.msra.mxu0 %v5075_v8 }
0x1569   :  { %4881 = vmatprep.subr.bf16.mxu0 %v7524_v36 }
0x156c   :  { %4882 = vmatpush3.bf16.msra.mxu0 %v5077_v30 }
0x156d   :  { %4883 = vmatprep.subr.bf16.mxu0 %v7524_v36 }
0x1570   :  { %4884 = vmatpush3.bf16.msra.mxu0 %v5079_v3 }
0x1571   :  { %4885 = vmatprep.subr.bf16.mxu0 %v7524_v36 }
0x1574   :  { %4886 = vmatpush3.bf16.msra.mxu0 %v5081_v14 }
0x1575   :  { %4887 = vmatprep.subr.bf16.mxu0 %v7524_v36 }
0x1578   :  { %4888 = vmatpush3.bf16.msra.mxu0 %v5083_v16 }
0x1579   :  { %4889 = vmatprep.subr.bf16.mxu0 %v7524_v36 }
0x157c   :  { %4890 = vmatpush3.bf16.msra.mxu0 %v5085_v1 }
0x157d   :  { %4915 = vmatprep.subr.bf16.mxu0 %v7524_v36 }
0x161f   :  { %v3661_v9 = vpop.f32.mrf.mxu0 }
0x1620   :  { %v3662_v50 = vadd.f32 %v4249_v7, %v3661_v9 }
0x1621   :  { %v4853_v63 = vpop.f32.mrf.mxu0 }
0x1622   :  { %v3668_v25 = vmax.f32 %v3662_v50, 0.0 }
0x1623   :  { %v3664_v61 = vpop.f32.mrf.mxu0 }
0x1624   :  { %v3670_v42 = vpack.c.bf16 %v3668_v25, %v3668_v25  ;;  %v3665_v31 = vadd.f32 %v4249_v7, %v3664_v61 }
0x1625   :  { %v4854_v51 = vpop.f32.mrf.mxu0 }
0x1626   :  { %v3809_v17 = vrot.slane %v3670_v42, 2  ;;  %4872 = vmatmul.mubr.bf16.vlgmr.msra.gmra.mxu1 %v3670_v42  ;;  %v3669_v59 = vmax.f32 %v3665_v31, 0.0 }
0x1627   :  { %4896 = vmatpush3.bf16.msra.mxu1 %v5086_v48  ;;  %4911 = vmatprep.mubr.msk.bf16.mxu1 %vm5364_vm0, %v7524_v36 }
0x1628   :  { %4892 = vmatmul.mubr.bf16.vlgmr.msra.gmra.mxu0 %v3809_v17  ;;  %4897 = vmatprep.subr.bf16.mxu1 %v7524_v36  ;;  %v3901_v23 = vpack.c.bf16 %v3669_v59, %v3669_v59 }
0x1629   :  { %4916 = vmatpush3.bf16.msra.mxu0 %v5087_v12  ;;  %4931 = vmatprep.mubr.msk.bf16.mxu0 %vm5364_vm0, %v7524_v36 }
0x162a   :  { %4917 = vmatprep.subr.bf16.mxu0 %v7524_v36  ;;  %v4043_v41 = vrot.slane %v3901_v23, 2 }
0x162b   :  { %4898 = vmatpush3.bf16.msra.mxu1 %v5088_v32 }
0x162c   :  { %4899 = vmatprep.subr.bf16.mxu1 %v7524_v36 }
0x162d   :  { %4918 = vmatpush3.bf16.msra.mxu0 %v5089_v60 }
0x162e   :  { %4919 = vmatprep.subr.bf16.mxu0 %v7524_v36 }
0x162f   :  { %4900 = vmatpush3.bf16.msra.mxu1 %v5090_v52 }
0x1630   :  { %4901 = vmatprep.subr.bf16.mxu1 %v7524_v36 }
0x1631   :  { %4920 = vmatpush3.bf16.msra.mxu0 %v5091_v46 }
0x1632   :  { %4921 = vmatprep.subr.bf16.mxu0 %v7524_v36 }
0x1633   :  { %4902 = vmatpush3.bf16.msra.mxu1 %v5092_v21 }
0x1634   :  { %4903 = vmatprep.subr.bf16.mxu1 %v7524_v36 }
0x1635   :  { %4922 = vmatpush3.bf16.msra.mxu0 %v5093_v27 }
0x1636   :  { %4923 = vmatprep.subr.bf16.mxu0 %v7524_v36 }
0x1637   :  { %4904 = vmatpush3.bf16.msra.mxu1 %v5094_v4 }
0x1638   :  { %4905 = vmatprep.subr.bf16.mxu1 %v7524_v36 }
0x1639   :  { %4924 = vmatpush3.bf16.msra.mxu0 %v5095_v29 }
0x163a   :  { %4925 = vmatprep.subr.bf16.mxu0 %v7524_v36 }
0x163b   :  { %4906 = vmatpush3.bf16.msra.mxu1 %v5096_v24 }
0x163c   :  { %4907 = vmatprep.subr.bf16.mxu1 %v7524_v36 }
0x163d   :  { %4926 = vmatpush3.bf16.msra.mxu0 %v5097_v44 }
0x163e   :  { %4927 = vmatprep.subr.bf16.mxu0 %v7524_v36 }
0x163f   :  { %4908 = vmatpush3.bf16.msra.mxu1 %v5098_v43 }
0x1640   :  { %4909 = vmatprep.subr.bf16.mxu1 %v7524_v36 }
0x1641   :  { %4928 = vmatpush3.bf16.msra.mxu0 %v5099_v18 }
0x1642   :  { %4929 = vmatprep.subr.bf16.mxu0 %v7524_v36 }
0x1643   :  { %4910 = vmatpush3.bf16.msra.mxu1 %v5100_v47 }
0x1645   :  { %4930 = vmatpush3.bf16.msra.mxu0 %v5101_v5 }
0x1646   :  { %4912 = vmatmul.mubr.bf16.vlgmr.msra.gmra.mxu1 %v3901_v23 }
0x1648   :  { %4932 = vmatmul.mubr.bf16.vlgmr.msra.gmra.mxu0 %v4043_v41 }
0x16e6   :  { %v3776_v53 = vpop.f32.mrf.mxu1 }
0x16e7   :  { %v3777_v34 = vadd.f32 %v4258_v19, %v3776_v53 }
0x16e8   :  { %v4873_v39 = vpop.f32.mrf.mxu1  ;;  %v3893_v2 = vpop.f32.mrf.mxu0 }
0x16e9   :  { %3782 = vst [vmem:[%s7416_s19] sm:$0xf] %v3777_v34  ;;  %v3894_v36 = vadd.f32 %v4284_v57, %v3893_v2 }
0x16ea   :  { %v3779_v38 = vpop.f32.mrf.mxu1  ;;  %v4893_v6 = vpop.f32.mrf.mxu0 }
0x16eb   :  { %4293 = vst [vmem:[%s7416_s19 + $0x4] sm:$0xf] %v3894_v36 }
0x16ec   :  { %v4874_v37 = vpop.f32.mrf.mxu1  ;;  %v3896_v54 = vpop.f32.mrf.mxu0 }
0x16ee   :  { %v4894_v45 = vpop.f32.mrf.mxu0 }
0x1706   :  { %v4009_v49 = vpop.f32.mrf.mxu1 }
0x1707   :  { %v4010_v55 = vadd.f32 %v4311_v35, %v4009_v49 }
0x1708   :  { %v4913_v62 = vpop.f32.mrf.mxu1  ;;  %v4127_v56 = vpop.f32.mrf.mxu0 }
0x1709   :  { %4320 = vst [vmem:[%s7416_s19 + $0x8] sm:$0xf] %v4010_v55  ;;  %v4128_v10 = vadd.f32 %v4338_v40, %v4127_v56 }
0x170a   :  { %v4012_v22 = vpop.f32.mrf.mxu1  ;;  %v4933_v13 = vpop.f32.mrf.mxu0 }
0x170b   :  { %4347 = vst [vmem:[%s7416_s19 + $0xc] sm:$0xf] %v4128_v10 }
0x170c   :  { %v4914_v11 = vpop.f32.mrf.mxu1  ;;  %v4130_v15 = vpop.f32.mrf.mxu0 }
0x170e   :  { %v4934_v28 = vpop.f32.mrf.mxu0 }

</bundles_post_ra>
